<compile_context>
chip_gen: v7x
topology: tpu7x:2x2x1
jax: 0.10.0
libtpu: 0.0.40
codegen_flags: <defaults>
</compile_context>

<pallas_src>
import math
import jax
import jax.numpy as jnp
from jax import lax
from jax.experimental import pallas as pl
from jax.experimental.pallas import tpu as pltpu

LANE = 128
SUBLANE = 8


def round_up(d, m):
    return -(-d // m) * m


# ----------------------------------------------------------------------------
# Hourglass dimension schedule (mirrors cNODE_HourglassFitness.construct_fitness)
# ----------------------------------------------------------------------------
def hourglass_dims(data_dim, hidden_dim, depth):
    depth = depth + 1
    if depth < 3:
        raise ValueError("Depth must be at least 2 for a valid autoencoder structure.")
    half_depth = (depth - 1) // 2
    down_dims = [int(data_dim * (hidden_dim / data_dim) ** (i / half_depth))
                 for i in range(half_depth + 1)]
    is_odd = depth % 2 == 1
    reverse_depth = half_depth if is_odd else half_depth + 1
    up_dims = list(reversed(down_dims[:reverse_depth]))
    return down_dims + up_dims


# ----------------------------------------------------------------------------
# Deterministic parameter init (PyTorch nn.Linear default: U(-1/sqrt(fan_in), +))
# Weights stored TRANSPOSED vs. PyTorch: (in_dim, out_dim), biases as (1, out_dim).
# ----------------------------------------------------------------------------
def init_params(key, dims, bias=True):
    params = []
    for i in range(len(dims) - 1):
        in_d, out_d = dims[i], dims[i + 1]
        key, kw, kb = jax.random.split(key, 3)
        bound = 1.0 / math.sqrt(in_d)
        W = jax.random.uniform(kw, (in_d, out_d), jnp.float32, -bound, bound)
        if bias:
            b = jax.random.uniform(kb, (1, out_d), jnp.float32, -bound, bound)
        else:
            b = jnp.zeros((1, out_d), jnp.float32)
        params.append((W, b))
    return params


# ----------------------------------------------------------------------------
# Fused Pallas kernel: the whole RK4 trajectory in ONE pallas_call, time loop in-kernel.
# ----------------------------------------------------------------------------
def make_fused_rk4(batch_pad, dims_pad, n_steps):
    n_layers = len(dims_pad) - 1
    Dp = dims_pad[0]
    unroll = n_steps <= 16   # give the LLO scheduler visibility for short trajectories

    def kernel(dts_ref, gate_ref, x0_ref, *rest):
        wb_refs = rest[: 2 * n_layers]
        out_ref = rest[2 * n_layers]
        w_refs = wb_refs[0::2]
        b_refs = wb_refs[1::2]

        gate = gate_ref[0]            # scalar f32 from SMEM (runtime-tunable, autodiff-able)

        def mlp(h):
            # All-f32 Linear/ReLU stack; weights read per use (no long live ranges).
            for l in range(n_layers):
                h = jnp.dot(h, w_refs[l][...],
                            preferred_element_type=jnp.float32) + b_refs[l][...]
                if l < n_layers - 1:          # ReLU between all but the last Linear
                    h = jnp.maximum(h, 0.0)
            return h

        def rhs(xx):
            # ODEFunc_cNODEGen_FnFitness.forward
            fx = mlp(xx)                                        # (Bp, Dp)
            xT_fx = jnp.sum(xx * fx, axis=-1, keepdims=True)    # (Bp, 1)
            return gate * (xx * (fx - xT_fx))                   # (Bp, Dp)

        def body(step, x):
            dt = dts_ref[step]                # scalar f32 from SMEM
            half_dt = 0.5 * dt                # scalar-unit constants, computed once/step
            dt6 = dt * (1.0 / 6.0)
            k1 = rhs(x)
            k2 = rhs(x + half_dt * k1)
            k3 = rhs(x + half_dt * k2)
            k4 = rhs(x + dt * k3)
            x_new = x + dt6 * (k1 + 2.0 * k2 + 2.0 * k3 + k4)
            out_ref[step] = x_new             # sublane/lane-dense (Bp, Dp) slab store
            return x_new

        lax.fori_loop(0, n_steps, body, x0_ref[...], unroll=unroll)

    in_specs = [
        pl.BlockSpec(memory_space=pltpu.MemorySpace.SMEM),   # dts  (n_steps,) f32
        pl.BlockSpec(memory_space=pltpu.MemorySpace.SMEM),   # gate (1,)       f32
        pl.BlockSpec(memory_space=pltpu.MemorySpace.VMEM),   # x0   (Bp, Dp)   f32
    ]
    for _ in range(n_layers):
        in_specs.append(pl.BlockSpec(memory_space=pltpu.MemorySpace.VMEM))   # W_l
        in_specs.append(pl.BlockSpec(memory_space=pltpu.MemorySpace.VMEM))   # b_l

    return pl.pallas_call(
        kernel,
        out_shape=jax.ShapeDtypeStruct((n_steps, batch_pad, Dp), jnp.float32),
        in_specs=in_specs,
        out_specs=pl.BlockSpec(memory_space=pltpu.MemorySpace.VMEM),
    )


# ----------------------------------------------------------------------------
# Forward wrapper: y = odeint(func, x, t)  (fixed-step RK4 over the grid t)
# ----------------------------------------------------------------------------
def cnode_hourglass_forward(t, x, params, dims, gate):
    batch, data_dim = x.shape
    assert dims[0] == data_dim and dims[-1] == data_dim
    t = jnp.asarray(t, jnp.float32)
    n_steps = int(t.shape[0]) - 1

    dims_pad = [round_up(d, LANE) for d in dims]
    Dp = dims_pad[0]
    Bp = round_up(batch, SUBLANE)            # sublane-dense rows (f32 -> multiples of 8)

    # Zero-pad x (rows & lanes) and parameters to padded widths. Padded lanes/rows of x are
    # 0 and padded weight rows/cols & bias lanes are 0, so the dynamics are unchanged and
    # padded batch rows stay identically 0 (x==0 => dx/dt==0).
    x_pad = jnp.zeros((Bp, Dp), jnp.float32).at[:batch, :data_dim].set(x)

    flat_wb = []
    for l, (W, b) in enumerate(params):
        in_d, out_d = dims[l], dims[l + 1]
        in_p, out_p = dims_pad[l], dims_pad[l + 1]
        Wp = jnp.zeros((in_p, out_p), jnp.float32).at[:in_d, :out_d].set(W)
        bp = jnp.zeros((1, out_p), jnp.float32).at[:, :out_d].set(b)
        flat_wb += [Wp, bp]                  # all f32 (latency-bound: bf16 saves nothing)

    if n_steps <= 0:
        return x[None]

    step_fn = make_fused_rk4(Bp, dims_pad, n_steps)
    dts = jnp.diff(t)                                     # (T-1,) f32 -> SMEM
    gate_arr = jnp.asarray(gate, jnp.float32).reshape((1,))  # runtime scalar -> SMEM

    traj = step_fn(dts, gate_arr, x_pad, *flat_wb)        # (T-1, Bp, Dp), one kernel launch

    y = jnp.concatenate([x_pad[None], traj], axis=0)      # (T, Bp, Dp), includes state at t[0]
    return y[:, :batch, :data_dim]                        # (T, B, D)


# ----------------------------------------------------------------------------
# Demo
# ----------------------------------------------------------------------------
if __name__ == "__main__":
    data_dim, hidden_dim, depth = 32, 8, 4
    batch = 4

    dims = hourglass_dims(data_dim, hidden_dim, depth)   # [32, 16, 8, 16, 32]

    key = jax.random.PRNGKey(0)
    key, kx = jax.random.split(key)
    params = init_params(key, dims, bias=True)

    # identity_gate=False -> gate is a buffer fixed at 1.0 (exercises the full compute path;
    # identity_gate=True would init the trainable gate to 0.0, giving dx/dt == 0).
    gate = 1.0

    # x: composition-like input on the simplex (typical for cNODE models)
    x = jax.random.uniform(kx, (batch, data_dim), jnp.float32)
    x = x / jnp.sum(x, axis=-1, keepdims=True)

    t = jnp.linspace(0.0, 1.0, 5)

    y = cnode_hourglass_forward(t, x, params, dims, gate)
    y = jax.block_until_ready(y)

    assert y.shape == (t.shape[0], batch, data_dim)
    assert bool(jnp.all(jnp.isfinite(y)))
    print("KERNEL_OK")
</pallas_src>

<mosaic_0001>
module attributes {stable_mosaic.version = 11 : i64} {
  func.func @kernel(%arg0: memref<4xf32, #tpu.memory_space<smem>>, %arg1: memref<1xf32, #tpu.memory_space<smem>>, %arg2: memref<8x128xf32, #tpu.memory_space<vmem>>, %arg3: memref<128x128xf32, #tpu.memory_space<vmem>>, %arg4: memref<1x128xf32, #tpu.memory_space<vmem>>, %arg5: memref<128x128xf32, #tpu.memory_space<vmem>>, %arg6: memref<1x128xf32, #tpu.memory_space<vmem>>, %arg7: memref<128x128xf32, #tpu.memory_space<vmem>>, %arg8: memref<1x128xf32, #tpu.memory_space<vmem>>, %arg9: memref<128x128xf32, #tpu.memory_space<vmem>>, %arg10: memref<1x128xf32, #tpu.memory_space<vmem>>, %arg11: memref<4x8x128xf32, #tpu.memory_space<vmem>>) attributes {dimension_semantics = [], scalar_prefetch = 0 : i64, scratch_operands = 0 : i64, tpu.core_type = #tpu.core_type<tc>} {
    %c0 = arith.constant 0 : index
    %0 = memref.load %arg1[%c0] : memref<1xf32, #tpu.memory_space<smem>>
    %c0_0 = arith.constant 0 : index
    %c0_1 = arith.constant 0 : index
    %1 = vector.load %arg2[%c0_0, %c0_1] : memref<8x128xf32, #tpu.memory_space<vmem>>, vector<8x128xf32>
    %c0_i32 = arith.constant 0 : i32
    %2 = arith.index_cast %c0_i32 : i32 to index
    %3 = memref.load %arg0[%2] : memref<4xf32, #tpu.memory_space<smem>>
    %cst = arith.constant 5.000000e-01 : f32
    %4 = arith.mulf %cst, %3 : f32
    %cst_2 = arith.constant 0.166666672 : f32
    %5 = arith.mulf %3, %cst_2 : f32
    %c0_3 = arith.constant 0 : index
    %c0_4 = arith.constant 0 : index
    %6 = vector.load %arg3[%c0_3, %c0_4] : memref<128x128xf32, #tpu.memory_space<vmem>>, vector<128x128xf32>
    %cst_5 = arith.constant dense<0.000000e+00> : vector<8x128xf32>
    %7 = tpu.matmul %1, %6, %cst_5 {dimension_numbers = #tpu.dot_dimension_numbers<[1], [0], [0], [1], [0, 0, 1, 1], [], []>} : vector<8x128xf32>, vector<128x128xf32>, vector<8x128xf32> -> vector<8x128xf32>
    %c0_6 = arith.constant 0 : index
    %c0_7 = arith.constant 0 : index
    %8 = vector.load %arg4[%c0_6, %c0_7] : memref<1x128xf32, #tpu.memory_space<vmem>>, vector<1x128xf32>
    %9 = vector.broadcast %8 : vector<1x128xf32> to vector<8x128xf32>
    %10 = arith.addf %7, %9 : vector<8x128xf32>
    %cst_8 = arith.constant 0.000000e+00 : f32
    %11 = vector.broadcast %cst_8 : f32 to vector<8x128xf32>
    %12 = arith.maximumf %10, %11 : vector<8x128xf32>
    %c0_9 = arith.constant 0 : index
    %c0_10 = arith.constant 0 : index
    %13 = vector.load %arg5[%c0_9, %c0_10] : memref<128x128xf32, #tpu.memory_space<vmem>>, vector<128x128xf32>
    %cst_11 = arith.constant dense<0.000000e+00> : vector<8x128xf32>
    %14 = tpu.matmul %12, %13, %cst_11 {dimension_numbers = #tpu.dot_dimension_numbers<[1], [0], [0], [1], [0, 0, 1, 1], [], []>} : vector<8x128xf32>, vector<128x128xf32>, vector<8x128xf32> -> vector<8x128xf32>
    %c0_12 = arith.constant 0 : index
    %c0_13 = arith.constant 0 : index
    %15 = vector.load %arg6[%c0_12, %c0_13] : memref<1x128xf32, #tpu.memory_space<vmem>>, vector<1x128xf32>
    %16 = vector.broadcast %15 : vector<1x128xf32> to vector<8x128xf32>
    %17 = arith.addf %14, %16 : vector<8x128xf32>
    %cst_14 = arith.constant 0.000000e+00 : f32
    %18 = vector.broadcast %cst_14 : f32 to vector<8x128xf32>
    %19 = arith.maximumf %17, %18 : vector<8x128xf32>
    %c0_15 = arith.constant 0 : index
    %c0_16 = arith.constant 0 : index
    %20 = vector.load %arg7[%c0_15, %c0_16] : memref<128x128xf32, #tpu.memory_space<vmem>>, vector<128x128xf32>
    %cst_17 = arith.constant dense<0.000000e+00> : vector<8x128xf32>
    %21 = tpu.matmul %19, %20, %cst_17 {dimension_numbers = #tpu.dot_dimension_numbers<[1], [0], [0], [1], [0, 0, 1, 1], [], []>} : vector<8x128xf32>, vector<128x128xf32>, vector<8x128xf32> -> vector<8x128xf32>
    %c0_18 = arith.constant 0 : index
    %c0_19 = arith.constant 0 : index
    %22 = vector.load %arg8[%c0_18, %c0_19] : memref<1x128xf32, #tpu.memory_space<vmem>>, vector<1x128xf32>
    %23 = vector.broadcast %22 : vector<1x128xf32> to vector<8x128xf32>
    %24 = arith.addf %21, %23 : vector<8x128xf32>
    %cst_20 = arith.constant 0.000000e+00 : f32
    %25 = vector.broadcast %cst_20 : f32 to vector<8x128xf32>
    %26 = arith.maximumf %24, %25 : vector<8x128xf32>
    %c0_21 = arith.constant 0 : index
    %c0_22 = arith.constant 0 : index
    %27 = vector.load %arg9[%c0_21, %c0_22] : memref<128x128xf32, #tpu.memory_space<vmem>>, vector<128x128xf32>
    %cst_23 = arith.constant dense<0.000000e+00> : vector<8x128xf32>
    %28 = tpu.matmul %26, %27, %cst_23 {dimension_numbers = #tpu.dot_dimension_numbers<[1], [0], [0], [1], [0, 0, 1, 1], [], []>} : vector<8x128xf32>, vector<128x128xf32>, vector<8x128xf32> -> vector<8x128xf32>
    %c0_24 = arith.constant 0 : index
    %c0_25 = arith.constant 0 : index
    %29 = vector.load %arg10[%c0_24, %c0_25] : memref<1x128xf32, #tpu.memory_space<vmem>>, vector<1x128xf32>
    %30 = vector.broadcast %29 : vector<1x128xf32> to vector<8x128xf32>
    %31 = arith.addf %28, %30 : vector<8x128xf32>
    %32 = arith.mulf %1, %31 : vector<8x128xf32>
    %cst_26 = arith.constant dense<0.000000e+00> : vector<8xf32>
    %33 = vector.multi_reduction <add>, %32, %cst_26 [1] : vector<8x128xf32> to vector<8xf32>
    %34 = vector.shape_cast %33 : vector<8xf32> to vector<8x1xf32>
    %35 = vector.broadcast %34 : vector<8x1xf32> to vector<8x128xf32>
    %36 = arith.subf %31, %35 : vector<8x128xf32>
    %37 = arith.mulf %1, %36 : vector<8x128xf32>
    %38 = vector.broadcast %0 : f32 to vector<8x128xf32>
    %39 = arith.mulf %38, %37 : vector<8x128xf32>
    %40 = vector.broadcast %4 : f32 to vector<8x128xf32>
    %41 = arith.mulf %40, %39 : vector<8x128xf32>
    %42 = arith.addf %1, %41 : vector<8x128xf32>
    %c0_27 = arith.constant 0 : index
    %c0_28 = arith.constant 0 : index
    %43 = vector.load %arg3[%c0_27, %c0_28] : memref<128x128xf32, #tpu.memory_space<vmem>>, vector<128x128xf32>
    %cst_29 = arith.constant dense<0.000000e+00> : vector<8x128xf32>
    %44 = tpu.matmul %42, %43, %cst_29 {dimension_numbers = #tpu.dot_dimension_numbers<[1], [0], [0], [1], [0, 0, 1, 1], [], []>} : vector<8x128xf32>, vector<128x128xf32>, vector<8x128xf32> -> vector<8x128xf32>
    %c0_30 = arith.constant 0 : index
    %c0_31 = arith.constant 0 : index
    %45 = vector.load %arg4[%c0_30, %c0_31] : memref<1x128xf32, #tpu.memory_space<vmem>>, vector<1x128xf32>
    %46 = vector.broadcast %45 : vector<1x128xf32> to vector<8x128xf32>
    %47 = arith.addf %44, %46 : vector<8x128xf32>
    %cst_32 = arith.constant 0.000000e+00 : f32
    %48 = vector.broadcast %cst_32 : f32 to vector<8x128xf32>
    %49 = arith.maximumf %47, %48 : vector<8x128xf32>
    %c0_33 = arith.constant 0 : index
    %c0_34 = arith.constant 0 : index
    %50 = vector.load %arg5[%c0_33, %c0_34] : memref<128x128xf32, #tpu.memory_space<vmem>>, vector<128x128xf32>
    %cst_35 = arith.constant dense<0.000000e+00> : vector<8x128xf32>
    %51 = tpu.matmul %49, %50, %cst_35 {dimension_numbers = #tpu.dot_dimension_numbers<[1], [0], [0], [1], [0, 0, 1, 1], [], []>} : vector<8x128xf32>, vector<128x128xf32>, vector<8x128xf32> -> vector<8x128xf32>
    %c0_36 = arith.constant 0 : index
    %c0_37 = arith.constant 0 : index
    %52 = vector.load %arg6[%c0_36, %c0_37] : memref<1x128xf32, #tpu.memory_space<vmem>>, vector<1x128xf32>
    %53 = vector.broadcast %52 : vector<1x128xf32> to vector<8x128xf32>
    %54 = arith.addf %51, %53 : vector<8x128xf32>
    %cst_38 = arith.constant 0.000000e+00 : f32
    %55 = vector.broadcast %cst_38 : f32 to vector<8x128xf32>
    %56 = arith.maximumf %54, %55 : vector<8x128xf32>
    %c0_39 = arith.constant 0 : index
    %c0_40 = arith.constant 0 : index
    %57 = vector.load %arg7[%c0_39, %c0_40] : memref<128x128xf32, #tpu.memory_space<vmem>>, vector<128x128xf32>
    %cst_41 = arith.constant dense<0.000000e+00> : vector<8x128xf32>
    %58 = tpu.matmul %56, %57, %cst_41 {dimension_numbers = #tpu.dot_dimension_numbers<[1], [0], [0], [1], [0, 0, 1, 1], [], []>} : vector<8x128xf32>, vector<128x128xf32>, vector<8x128xf32> -> vector<8x128xf32>
    %c0_42 = arith.constant 0 : index
    %c0_43 = arith.constant 0 : index
    %59 = vector.load %arg8[%c0_42, %c0_43] : memref<1x128xf32, #tpu.memory_space<vmem>>, vector<1x128xf32>
    %60 = vector.broadcast %59 : vector<1x128xf32> to vector<8x128xf32>
    %61 = arith.addf %58, %60 : vector<8x128xf32>
    %cst_44 = arith.constant 0.000000e+00 : f32
    %62 = vector.broadcast %cst_44 : f32 to vector<8x128xf32>
    %63 = arith.maximumf %61, %62 : vector<8x128xf32>
    %c0_45 = arith.constant 0 : index
    %c0_46 = arith.constant 0 : index
    %64 = vector.load %arg9[%c0_45, %c0_46] : memref<128x128xf32, #tpu.memory_space<vmem>>, vector<128x128xf32>
    %cst_47 = arith.constant dense<0.000000e+00> : vector<8x128xf32>
    %65 = tpu.matmul %63, %64, %cst_47 {dimension_numbers = #tpu.dot_dimension_numbers<[1], [0], [0], [1], [0, 0, 1, 1], [], []>} : vector<8x128xf32>, vector<128x128xf32>, vector<8x128xf32> -> vector<8x128xf32>
    %c0_48 = arith.constant 0 : index
    %c0_49 = arith.constant 0 : index
    %66 = vector.load %arg10[%c0_48, %c0_49] : memref<1x128xf32, #tpu.memory_space<vmem>>, vector<1x128xf32>
    %67 = vector.broadcast %66 : vector<1x128xf32> to vector<8x128xf32>
    %68 = arith.addf %65, %67 : vector<8x128xf32>
    %69 = arith.mulf %42, %68 : vector<8x128xf32>
    %cst_50 = arith.constant dense<0.000000e+00> : vector<8xf32>
    %70 = vector.multi_reduction <add>, %69, %cst_50 [1] : vector<8x128xf32> to vector<8xf32>
    %71 = vector.shape_cast %70 : vector<8xf32> to vector<8x1xf32>
    %72 = vector.broadcast %71 : vector<8x1xf32> to vector<8x128xf32>
    %73 = arith.subf %68, %72 : vector<8x128xf32>
    %74 = arith.mulf %42, %73 : vector<8x128xf32>
    %75 = vector.broadcast %0 : f32 to vector<8x128xf32>
    %76 = arith.mulf %75, %74 : vector<8x128xf32>
    %77 = vector.broadcast %4 : f32 to vector<8x128xf32>
    %78 = arith.mulf %77, %76 : vector<8x128xf32>
    %79 = arith.addf %1, %78 : vector<8x128xf32>
    %c0_51 = arith.constant 0 : index
    %c0_52 = arith.constant 0 : index
    %80 = vector.load %arg3[%c0_51, %c0_52] : memref<128x128xf32, #tpu.memory_space<vmem>>, vector<128x128xf32>
    %cst_53 = arith.constant dense<0.000000e+00> : vector<8x128xf32>
    %81 = tpu.matmul %79, %80, %cst_53 {dimension_numbers = #tpu.dot_dimension_numbers<[1], [0], [0], [1], [0, 0, 1, 1], [], []>} : vector<8x128xf32>, vector<128x128xf32>, vector<8x128xf32> -> vector<8x128xf32>
    %c0_54 = arith.constant 0 : index
    %c0_55 = arith.constant 0 : index
    %82 = vector.load %arg4[%c0_54, %c0_55] : memref<1x128xf32, #tpu.memory_space<vmem>>, vector<1x128xf32>
    %83 = vector.broadcast %82 : vector<1x128xf32> to vector<8x128xf32>
    %84 = arith.addf %81, %83 : vector<8x128xf32>
    %cst_56 = arith.constant 0.000000e+00 : f32
    %85 = vector.broadcast %cst_56 : f32 to vector<8x128xf32>
    %86 = arith.maximumf %84, %85 : vector<8x128xf32>
    %c0_57 = arith.constant 0 : index
    %c0_58 = arith.constant 0 : index
    %87 = vector.load %arg5[%c0_57, %c0_58] : memref<128x128xf32, #tpu.memory_space<vmem>>, vector<128x128xf32>
    %cst_59 = arith.constant dense<0.000000e+00> : vector<8x128xf32>
    %88 = tpu.matmul %86, %87, %cst_59 {dimension_numbers = #tpu.dot_dimension_numbers<[1], [0], [0], [1], [0, 0, 1, 1], [], []>} : vector<8x128xf32>, vector<128x128xf32>, vector<8x128xf32> -> vector<8x128xf32>
    %c0_60 = arith.constant 0 : index
    %c0_61 = arith.constant 0 : index
    %89 = vector.load %arg6[%c0_60, %c0_61] : memref<1x128xf32, #tpu.memory_space<vmem>>, vector<1x128xf32>
    %90 = vector.broadcast %89 : vector<1x128xf32> to vector<8x128xf32>
    %91 = arith.addf %88, %90 : vector<8x128xf32>
    %cst_62 = arith.constant 0.000000e+00 : f32
    %92 = vector.broadcast %cst_62 : f32 to vector<8x128xf32>
    %93 = arith.maximumf %91, %92 : vector<8x128xf32>
    %c0_63 = arith.constant 0 : index
    %c0_64 = arith.constant 0 : index
    %94 = vector.load %arg7[%c0_63, %c0_64] : memref<128x128xf32, #tpu.memory_space<vmem>>, vector<128x128xf32>
    %cst_65 = arith.constant dense<0.000000e+00> : vector<8x128xf32>
    %95 = tpu.matmul %93, %94, %cst_65 {dimension_numbers = #tpu.dot_dimension_numbers<[1], [0], [0], [1], [0, 0, 1, 1], [], []>} : vector<8x128xf32>, vector<128x128xf32>, vector<8x128xf32> -> vector<8x128xf32>
    %c0_66 = arith.constant 0 : index
    %c0_67 = arith.constant 0 : index
    %96 = vector.load %arg8[%c0_66, %c0_67] : memref<1x128xf32, #tpu.memory_space<vmem>>, vector<1x128xf32>
    %97 = vector.broadcast %96 : vector<1x128xf32> to vector<8x128xf32>
    %98 = arith.addf %95, %97 : vector<8x128xf32>
    %cst_68 = arith.constant 0.000000e+00 : f32
    %99 = vector.broadcast %cst_68 : f32 to vector<8x128xf32>
    %100 = arith.maximumf %98, %99 : vector<8x128xf32>
    %c0_69 = arith.constant 0 : index
    %c0_70 = arith.constant 0 : index
    %101 = vector.load %arg9[%c0_69, %c0_70] : memref<128x128xf32, #tpu.memory_space<vmem>>, vector<128x128xf32>
    %cst_71 = arith.constant dense<0.000000e+00> : vector<8x128xf32>
    %102 = tpu.matmul %100, %101, %cst_71 {dimension_numbers = #tpu.dot_dimension_numbers<[1], [0], [0], [1], [0, 0, 1, 1], [], []>} : vector<8x128xf32>, vector<128x128xf32>, vector<8x128xf32> -> vector<8x128xf32>
    %c0_72 = arith.constant 0 : index
    %c0_73 = arith.constant 0 : index
    %103 = vector.load %arg10[%c0_72, %c0_73] : memref<1x128xf32, #tpu.memory_space<vmem>>, vector<1x128xf32>
    %104 = vector.broadcast %103 : vector<1x128xf32> to vector<8x128xf32>
    %105 = arith.addf %102, %104 : vector<8x128xf32>
    %106 = arith.mulf %79, %105 : vector<8x128xf32>
    %cst_74 = arith.constant dense<0.000000e+00> : vector<8xf32>
    %107 = vector.multi_reduction <add>, %106, %cst_74 [1] : vector<8x128xf32> to vector<8xf32>
    %108 = vector.shape_cast %107 : vector<8xf32> to vector<8x1xf32>
    %109 = vector.broadcast %108 : vector<8x1xf32> to vector<8x128xf32>
    %110 = arith.subf %105, %109 : vector<8x128xf32>
    %111 = arith.mulf %79, %110 : vector<8x128xf32>
    %112 = vector.broadcast %0 : f32 to vector<8x128xf32>
    %113 = arith.mulf %112, %111 : vector<8x128xf32>
    %114 = vector.broadcast %3 : f32 to vector<8x128xf32>
    %115 = arith.mulf %114, %113 : vector<8x128xf32>
    %116 = arith.addf %1, %115 : vector<8x128xf32>
    %c0_75 = arith.constant 0 : index
    %c0_76 = arith.constant 0 : index
    %117 = vector.load %arg3[%c0_75, %c0_76] : memref<128x128xf32, #tpu.memory_space<vmem>>, vector<128x128xf32>
    %cst_77 = arith.constant dense<0.000000e+00> : vector<8x128xf32>
    %118 = tpu.matmul %116, %117, %cst_77 {dimension_numbers = #tpu.dot_dimension_numbers<[1], [0], [0], [1], [0, 0, 1, 1], [], []>} : vector<8x128xf32>, vector<128x128xf32>, vector<8x128xf32> -> vector<8x128xf32>
    %c0_78 = arith.constant 0 : index
    %c0_79 = arith.constant 0 : index
    %119 = vector.load %arg4[%c0_78, %c0_79] : memref<1x128xf32, #tpu.memory_space<vmem>>, vector<1x128xf32>
    %120 = vector.broadcast %119 : vector<1x128xf32> to vector<8x128xf32>
    %121 = arith.addf %118, %120 : vector<8x128xf32>
    %cst_80 = arith.constant 0.000000e+00 : f32
    %122 = vector.broadcast %cst_80 : f32 to vector<8x128xf32>
    %123 = arith.maximumf %121, %122 : vector<8x128xf32>
    %c0_81 = arith.constant 0 : index
    %c0_82 = arith.constant 0 : index
    %124 = vector.load %arg5[%c0_81, %c0_82] : memref<128x128xf32, #tpu.memory_space<vmem>>, vector<128x128xf32>
    %cst_83 = arith.constant dense<0.000000e+00> : vector<8x128xf32>
    %125 = tpu.matmul %123, %124, %cst_83 {dimension_numbers = #tpu.dot_dimension_numbers<[1], [0], [0], [1], [0, 0, 1, 1], [], []>} : vector<8x128xf32>, vector<128x128xf32>, vector<8x128xf32> -> vector<8x128xf32>
    %c0_84 = arith.constant 0 : index
    %c0_85 = arith.constant 0 : index
    %126 = vector.load %arg6[%c0_84, %c0_85] : memref<1x128xf32, #tpu.memory_space<vmem>>, vector<1x128xf32>
    %127 = vector.broadcast %126 : vector<1x128xf32> to vector<8x128xf32>
    %128 = arith.addf %125, %127 : vector<8x128xf32>
    %cst_86 = arith.constant 0.000000e+00 : f32
    %129 = vector.broadcast %cst_86 : f32 to vector<8x128xf32>
    %130 = arith.maximumf %128, %129 : vector<8x128xf32>
    %c0_87 = arith.constant 0 : index
    %c0_88 = arith.constant 0 : index
    %131 = vector.load %arg7[%c0_87, %c0_88] : memref<128x128xf32, #tpu.memory_space<vmem>>, vector<128x128xf32>
    %cst_89 = arith.constant dense<0.000000e+00> : vector<8x128xf32>
    %132 = tpu.matmul %130, %131, %cst_89 {dimension_numbers = #tpu.dot_dimension_numbers<[1], [0], [0], [1], [0, 0, 1, 1], [], []>} : vector<8x128xf32>, vector<128x128xf32>, vector<8x128xf32> -> vector<8x128xf32>
    %c0_90 = arith.constant 0 : index
    %c0_91 = arith.constant 0 : index
    %133 = vector.load %arg8[%c0_90, %c0_91] : memref<1x128xf32, #tpu.memory_space<vmem>>, vector<1x128xf32>
    %134 = vector.broadcast %133 : vector<1x128xf32> to vector<8x128xf32>
    %135 = arith.addf %132, %134 : vector<8x128xf32>
    %cst_92 = arith.constant 0.000000e+00 : f32
    %136 = vector.broadcast %cst_92 : f32 to vector<8x128xf32>
    %137 = arith.maximumf %135, %136 : vector<8x128xf32>
    %c0_93 = arith.constant 0 : index
    %c0_94 = arith.constant 0 : index
    %138 = vector.load %arg9[%c0_93, %c0_94] : memref<128x128xf32, #tpu.memory_space<vmem>>, vector<128x128xf32>
    %cst_95 = arith.constant dense<0.000000e+00> : vector<8x128xf32>
    %139 = tpu.matmul %137, %138, %cst_95 {dimension_numbers = #tpu.dot_dimension_numbers<[1], [0], [0], [1], [0, 0, 1, 1], [], []>} : vector<8x128xf32>, vector<128x128xf32>, vector<8x128xf32> -> vector<8x128xf32>
    %c0_96 = arith.constant 0 : index
    %c0_97 = arith.constant 0 : index
    %140 = vector.load %arg10[%c0_96, %c0_97] : memref<1x128xf32, #tpu.memory_space<vmem>>, vector<1x128xf32>
    %141 = vector.broadcast %140 : vector<1x128xf32> to vector<8x128xf32>
    %142 = arith.addf %139, %141 : vector<8x128xf32>
    %143 = arith.mulf %116, %142 : vector<8x128xf32>
    %cst_98 = arith.constant dense<0.000000e+00> : vector<8xf32>
    %144 = vector.multi_reduction <add>, %143, %cst_98 [1] : vector<8x128xf32> to vector<8xf32>
    %145 = vector.shape_cast %144 : vector<8xf32> to vector<8x1xf32>
    %146 = vector.broadcast %145 : vector<8x1xf32> to vector<8x128xf32>
    %147 = arith.subf %142, %146 : vector<8x128xf32>
    %148 = arith.mulf %116, %147 : vector<8x128xf32>
    %149 = vector.broadcast %0 : f32 to vector<8x128xf32>
    %150 = arith.mulf %149, %148 : vector<8x128xf32>
    %cst_99 = arith.constant 2.000000e+00 : f32
    %151 = vector.broadcast %cst_99 : f32 to vector<8x128xf32>
    %152 = arith.mulf %151, %76 : vector<8x128xf32>
    %153 = arith.addf %39, %152 : vector<8x128xf32>
    %cst_100 = arith.constant 2.000000e+00 : f32
    %154 = vector.broadcast %cst_100 : f32 to vector<8x128xf32>
    %155 = arith.mulf %154, %113 : vector<8x128xf32>
    %156 = arith.addf %153, %155 : vector<8x128xf32>
    %157 = arith.addf %156, %150 : vector<8x128xf32>
    %158 = vector.broadcast %5 : f32 to vector<8x128xf32>
    %159 = arith.mulf %158, %157 : vector<8x128xf32>
    %160 = arith.addf %1, %159 : vector<8x128xf32>
    %161 = arith.index_cast %c0_i32 : i32 to index
    %c0_101 = arith.constant 0 : index
    %c0_102 = arith.constant 0 : index
    %162 = vector.load %arg11[%161, %c0_101, %c0_102] : memref<4x8x128xf32, #tpu.memory_space<vmem>>, vector<1x8x128xf32>
    %163 = vector.shape_cast %162 : vector<1x8x128xf32> to vector<8x128xf32>
    %164 = vector.shape_cast %160 : vector<8x128xf32> to vector<1x8x128xf32>
    tpu.vector_store %arg11[%161, %c0_101, %c0_102], %164 {strides = array<i32>} : memref<4x8x128xf32, #tpu.memory_space<vmem>>, vector<1x8x128xf32>,
    %c1_i32 = arith.constant 1 : i32
    %165 = arith.index_cast %c1_i32 : i32 to index
    %166 = memref.load %arg0[%165] : memref<4xf32, #tpu.memory_space<smem>>
    %cst_103 = arith.constant 5.000000e-01 : f32
    %167 = arith.mulf %cst_103, %166 : f32
    %cst_104 = arith.constant 0.166666672 : f32
    %168 = arith.mulf %166, %cst_104 : f32
    %c0_105 = arith.constant 0 : index
    %c0_106 = arith.constant 0 : index
    %169 = vector.load %arg3[%c0_105, %c0_106] : memref<128x128xf32, #tpu.memory_space<vmem>>, vector<128x128xf32>
    %cst_107 = arith.constant dense<0.000000e+00> : vector<8x128xf32>
    %170 = tpu.matmul %160, %169, %cst_107 {dimension_numbers = #tpu.dot_dimension_numbers<[1], [0], [0], [1], [0, 0, 1, 1], [], []>} : vector<8x128xf32>, vector<128x128xf32>, vector<8x128xf32> -> vector<8x128xf32>
    %c0_108 = arith.constant 0 : index
    %c0_109 = arith.constant 0 : index
    %171 = vector.load %arg4[%c0_108, %c0_109] : memref<1x128xf32, #tpu.memory_space<vmem>>, vector<1x128xf32>
    %172 = vector.broadcast %171 : vector<1x128xf32> to vector<8x128xf32>
    %173 = arith.addf %170, %172 : vector<8x128xf32>
    %cst_110 = arith.constant 0.000000e+00 : f32
    %174 = vector.broadcast %cst_110 : f32 to vector<8x128xf32>
    %175 = arith.maximumf %173, %174 : vector<8x128xf32>
    %c0_111 = arith.constant 0 : index
    %c0_112 = arith.constant 0 : index
    %176 = vector.load %arg5[%c0_111, %c0_112] : memref<128x128xf32, #tpu.memory_space<vmem>>, vector<128x128xf32>
    %cst_113 = arith.constant dense<0.000000e+00> : vector<8x128xf32>
    %177 = tpu.matmul %175, %176, %cst_113 {dimension_numbers = #tpu.dot_dimension_numbers<[1], [0], [0], [1], [0, 0, 1, 1], [], []>} : vector<8x128xf32>, vector<128x128xf32>, vector<8x128xf32> -> vector<8x128xf32>
    %c0_114 = arith.constant 0 : index
    %c0_115 = arith.constant 0 : index
    %178 = vector.load %arg6[%c0_114, %c0_115] : memref<1x128xf32, #tpu.memory_space<vmem>>, vector<1x128xf32>
    %179 = vector.broadcast %178 : vector<1x128xf32> to vector<8x128xf32>
    %180 = arith.addf %177, %179 : vector<8x128xf32>
    %cst_116 = arith.constant 0.000000e+00 : f32
    %181 = vector.broadcast %cst_116 : f32 to vector<8x128xf32>
    %182 = arith.maximumf %180, %181 : vector<8x128xf32>
    %c0_117 = arith.constant 0 : index
    %c0_118 = arith.constant 0 : index
    %183 = vector.load %arg7[%c0_117, %c0_118] : memref<128x128xf32, #tpu.memory_space<vmem>>, vector<128x128xf32>
    %cst_119 = arith.constant dense<0.000000e+00> : vector<8x128xf32>
    %184 = tpu.matmul %182, %183, %cst_119 {dimension_numbers = #tpu.dot_dimension_numbers<[1], [0], [0], [1], [0, 0, 1, 1], [], []>} : vector<8x128xf32>, vector<128x128xf32>, vector<8x128xf32> -> vector<8x128xf32>
    %c0_120 = arith.constant 0 : index
    %c0_121 = arith.constant 0 : index
    %185 = vector.load %arg8[%c0_120, %c0_121] : memref<1x128xf32, #tpu.memory_space<vmem>>, vector<1x128xf32>
    %186 = vector.broadcast %185 : vector<1x128xf32> to vector<8x128xf32>
    %187 = arith.addf %184, %186 : vector<8x128xf32>
    %cst_122 = arith.constant 0.000000e+00 : f32
    %188 = vector.broadcast %cst_122 : f32 to vector<8x128xf32>
    %189 = arith.maximumf %187, %188 : vector<8x128xf32>
    %c0_123 = arith.constant 0 : index
    %c0_124 = arith.constant 0 : index
    %190 = vector.load %arg9[%c0_123, %c0_124] : memref<128x128xf32, #tpu.memory_space<vmem>>, vector<128x128xf32>
    %cst_125 = arith.constant dense<0.000000e+00> : vector<8x128xf32>
    %191 = tpu.matmul %189, %190, %cst_125 {dimension_numbers = #tpu.dot_dimension_numbers<[1], [0], [0], [1], [0, 0, 1, 1], [], []>} : vector<8x128xf32>, vector<128x128xf32>, vector<8x128xf32> -> vector<8x128xf32>
    %c0_126 = arith.constant 0 : index
    %c0_127 = arith.constant 0 : index
    %192 = vector.load %arg10[%c0_126, %c0_127] : memref<1x128xf32, #tpu.memory_space<vmem>>, vector<1x128xf32>
    %193 = vector.broadcast %192 : vector<1x128xf32> to vector<8x128xf32>
    %194 = arith.addf %191, %193 : vector<8x128xf32>
    %195 = arith.mulf %160, %194 : vector<8x128xf32>
    %cst_128 = arith.constant dense<0.000000e+00> : vector<8xf32>
    %196 = vector.multi_reduction <add>, %195, %cst_128 [1] : vector<8x128xf32> to vector<8xf32>
    %197 = vector.shape_cast %196 : vector<8xf32> to vector<8x1xf32>
    %198 = vector.broadcast %197 : vector<8x1xf32> to vector<8x128xf32>
    %199 = arith.subf %194, %198 : vector<8x128xf32>
    %200 = arith.mulf %160, %199 : vector<8x128xf32>
    %201 = vector.broadcast %0 : f32 to vector<8x128xf32>
    %202 = arith.mulf %201, %200 : vector<8x128xf32>
    %203 = vector.broadcast %167 : f32 to vector<8x128xf32>
    %204 = arith.mulf %203, %202 : vector<8x128xf32>
    %205 = arith.addf %160, %204 : vector<8x128xf32>
    %c0_129 = arith.constant 0 : index
    %c0_130 = arith.constant 0 : index
    %206 = vector.load %arg3[%c0_129, %c0_130] : memref<128x128xf32, #tpu.memory_space<vmem>>, vector<128x128xf32>
    %cst_131 = arith.constant dense<0.000000e+00> : vector<8x128xf32>
    %207 = tpu.matmul %205, %206, %cst_131 {dimension_numbers = #tpu.dot_dimension_numbers<[1], [0], [0], [1], [0, 0, 1, 1], [], []>} : vector<8x128xf32>, vector<128x128xf32>, vector<8x128xf32> -> vector<8x128xf32>
    %c0_132 = arith.constant 0 : index
    %c0_133 = arith.constant 0 : index
    %208 = vector.load %arg4[%c0_132, %c0_133] : memref<1x128xf32, #tpu.memory_space<vmem>>, vector<1x128xf32>
    %209 = vector.broadcast %208 : vector<1x128xf32> to vector<8x128xf32>
    %210 = arith.addf %207, %209 : vector<8x128xf32>
    %cst_134 = arith.constant 0.000000e+00 : f32
    %211 = vector.broadcast %cst_134 : f32 to vector<8x128xf32>
    %212 = arith.maximumf %210, %211 : vector<8x128xf32>
    %c0_135 = arith.constant 0 : index
    %c0_136 = arith.constant 0 : index
    %213 = vector.load %arg5[%c0_135, %c0_136] : memref<128x128xf32, #tpu.memory_space<vmem>>, vector<128x128xf32>
    %cst_137 = arith.constant dense<0.000000e+00> : vector<8x128xf32>
    %214 = tpu.matmul %212, %213, %cst_137 {dimension_numbers = #tpu.dot_dimension_numbers<[1], [0], [0], [1], [0, 0, 1, 1], [], []>} : vector<8x128xf32>, vector<128x128xf32>, vector<8x128xf32> -> vector<8x128xf32>
    %c0_138 = arith.constant 0 : index
    %c0_139 = arith.constant 0 : index
    %215 = vector.load %arg6[%c0_138, %c0_139] : memref<1x128xf32, #tpu.memory_space<vmem>>, vector<1x128xf32>
    %216 = vector.broadcast %215 : vector<1x128xf32> to vector<8x128xf32>
    %217 = arith.addf %214, %216 : vector<8x128xf32>
    %cst_140 = arith.constant 0.000000e+00 : f32
    %218 = vector.broadcast %cst_140 : f32 to vector<8x128xf32>
    %219 = arith.maximumf %217, %218 : vector<8x128xf32>
    %c0_141 = arith.constant 0 : index
    %c0_142 = arith.constant 0 : index
    %220 = vector.load %arg7[%c0_141, %c0_142] : memref<128x128xf32, #tpu.memory_space<vmem>>, vector<128x128xf32>
    %cst_143 = arith.constant dense<0.000000e+00> : vector<8x128xf32>
    %221 = tpu.matmul %219, %220, %cst_143 {dimension_numbers = #tpu.dot_dimension_numbers<[1], [0], [0], [1], [0, 0, 1, 1], [], []>} : vector<8x128xf32>, vector<128x128xf32>, vector<8x128xf32> -> vector<8x128xf32>
    %c0_144 = arith.constant 0 : index
    %c0_145 = arith.constant 0 : index
    %222 = vector.load %arg8[%c0_144, %c0_145] : memref<1x128xf32, #tpu.memory_space<vmem>>, vector<1x128xf32>
    %223 = vector.broadcast %222 : vector<1x128xf32> to vector<8x128xf32>
    %224 = arith.addf %221, %223 : vector<8x128xf32>
    %cst_146 = arith.constant 0.000000e+00 : f32
    %225 = vector.broadcast %cst_146 : f32 to vector<8x128xf32>
    %226 = arith.maximumf %224, %225 : vector<8x128xf32>
    %c0_147 = arith.constant 0 : index
    %c0_148 = arith.constant 0 : index
    %227 = vector.load %arg9[%c0_147, %c0_148] : memref<128x128xf32, #tpu.memory_space<vmem>>, vector<128x128xf32>
    %cst_149 = arith.constant dense<0.000000e+00> : vector<8x128xf32>
    %228 = tpu.matmul %226, %227, %cst_149 {dimension_numbers = #tpu.dot_dimension_numbers<[1], [0], [0], [1], [0, 0, 1, 1], [], []>} : vector<8x128xf32>, vector<128x128xf32>, vector<8x128xf32> -> vector<8x128xf32>
    %c0_150 = arith.constant 0 : index
    %c0_151 = arith.constant 0 : index
    %229 = vector.load %arg10[%c0_150, %c0_151] : memref<1x128xf32, #tpu.memory_space<vmem>>, vector<1x128xf32>
    %230 = vector.broadcast %229 : vector<1x128xf32> to vector<8x128xf32>
    %231 = arith.addf %228, %230 : vector<8x128xf32>
    %232 = arith.mulf %205, %231 : vector<8x128xf32>
    %cst_152 = arith.constant dense<0.000000e+00> : vector<8xf32>
    %233 = vector.multi_reduction <add>, %232, %cst_152 [1] : vector<8x128xf32> to vector<8xf32>
    %234 = vector.shape_cast %233 : vector<8xf32> to vector<8x1xf32>
    %235 = vector.broadcast %234 : vector<8x1xf32> to vector<8x128xf32>
    %236 = arith.subf %231, %235 : vector<8x128xf32>
    %237 = arith.mulf %205, %236 : vector<8x128xf32>
    %238 = vector.broadcast %0 : f32 to vector<8x128xf32>
    %239 = arith.mulf %238, %237 : vector<8x128xf32>
    %240 = vector.broadcast %167 : f32 to vector<8x128xf32>
    %241 = arith.mulf %240, %239 : vector<8x128xf32>
    %242 = arith.addf %160, %241 : vector<8x128xf32>
    %c0_153 = arith.constant 0 : index
    %c0_154 = arith.constant 0 : index
    %243 = vector.load %arg3[%c0_153, %c0_154] : memref<128x128xf32, #tpu.memory_space<vmem>>, vector<128x128xf32>
    %cst_155 = arith.constant dense<0.000000e+00> : vector<8x128xf32>
    %244 = tpu.matmul %242, %243, %cst_155 {dimension_numbers = #tpu.dot_dimension_numbers<[1], [0], [0], [1], [0, 0, 1, 1], [], []>} : vector<8x128xf32>, vector<128x128xf32>, vector<8x128xf32> -> vector<8x128xf32>
    %c0_156 = arith.constant 0 : index
    %c0_157 = arith.constant 0 : index
    %245 = vector.load %arg4[%c0_156, %c0_157] : memref<1x128xf32, #tpu.memory_space<vmem>>, vector<1x128xf32>
    %246 = vector.broadcast %245 : vector<1x128xf32> to vector<8x128xf32>
    %247 = arith.addf %244, %246 : vector<8x128xf32>
    %cst_158 = arith.constant 0.000000e+00 : f32
    %248 = vector.broadcast %cst_158 : f32 to vector<8x128xf32>
    %249 = arith.maximumf %247, %248 : vector<8x128xf32>
    %c0_159 = arith.constant 0 : index
    %c0_160 = arith.constant 0 : index
    %250 = vector.load %arg5[%c0_159, %c0_160] : memref<128x128xf32, #tpu.memory_space<vmem>>, vector<128x128xf32>
    %cst_161 = arith.constant dense<0.000000e+00> : vector<8x128xf32>
    %251 = tpu.matmul %249, %250, %cst_161 {dimension_numbers = #tpu.dot_dimension_numbers<[1], [0], [0], [1], [0, 0, 1, 1], [], []>} : vector<8x128xf32>, vector<128x128xf32>, vector<8x128xf32> -> vector<8x128xf32>
    %c0_162 = arith.constant 0 : index
    %c0_163 = arith.constant 0 : index
    %252 = vector.load %arg6[%c0_162, %c0_163] : memref<1x128xf32, #tpu.memory_space<vmem>>, vector<1x128xf32>
    %253 = vector.broadcast %252 : vector<1x128xf32> to vector<8x128xf32>
    %254 = arith.addf %251, %253 : vector<8x128xf32>
    %cst_164 = arith.constant 0.000000e+00 : f32
    %255 = vector.broadcast %cst_164 : f32 to vector<8x128xf32>
    %256 = arith.maximumf %254, %255 : vector<8x128xf32>
    %c0_165 = arith.constant 0 : index
    %c0_166 = arith.constant 0 : index
    %257 = vector.load %arg7[%c0_165, %c0_166] : memref<128x128xf32, #tpu.memory_space<vmem>>, vector<128x128xf32>
    %cst_167 = arith.constant dense<0.000000e+00> : vector<8x128xf32>
    %258 = tpu.matmul %256, %257, %cst_167 {dimension_numbers = #tpu.dot_dimension_numbers<[1], [0], [0], [1], [0, 0, 1, 1], [], []>} : vector<8x128xf32>, vector<128x128xf32>, vector<8x128xf32> -> vector<8x128xf32>
    %c0_168 = arith.constant 0 : index
    %c0_169 = arith.constant 0 : index
    %259 = vector.load %arg8[%c0_168, %c0_169] : memref<1x128xf32, #tpu.memory_space<vmem>>, vector<1x128xf32>
    %260 = vector.broadcast %259 : vector<1x128xf32> to vector<8x128xf32>
    %261 = arith.addf %258, %260 : vector<8x128xf32>
    %cst_170 = arith.constant 0.000000e+00 : f32
    %262 = vector.broadcast %cst_170 : f32 to vector<8x128xf32>
    %263 = arith.maximumf %261, %262 : vector<8x128xf32>
    %c0_171 = arith.constant 0 : index
    %c0_172 = arith.constant 0 : index
    %264 = vector.load %arg9[%c0_171, %c0_172] : memref<128x128xf32, #tpu.memory_space<vmem>>, vector<128x128xf32>
    %cst_173 = arith.constant dense<0.000000e+00> : vector<8x128xf32>
    %265 = tpu.matmul %263, %264, %cst_173 {dimension_numbers = #tpu.dot_dimension_numbers<[1], [0], [0], [1], [0, 0, 1, 1], [], []>} : vector<8x128xf32>, vector<128x128xf32>, vector<8x128xf32> -> vector<8x128xf32>
    %c0_174 = arith.constant 0 : index
    %c0_175 = arith.constant 0 : index
    %266 = vector.load %arg10[%c0_174, %c0_175] : memref<1x128xf32, #tpu.memory_space<vmem>>, vector<1x128xf32>
    %267 = vector.broadcast %266 : vector<1x128xf32> to vector<8x128xf32>
    %268 = arith.addf %265, %267 : vector<8x128xf32>
    %269 = arith.mulf %242, %268 : vector<8x128xf32>
    %cst_176 = arith.constant dense<0.000000e+00> : vector<8xf32>
    %270 = vector.multi_reduction <add>, %269, %cst_176 [1] : vector<8x128xf32> to vector<8xf32>
    %271 = vector.shape_cast %270 : vector<8xf32> to vector<8x1xf32>
    %272 = vector.broadcast %271 : vector<8x1xf32> to vector<8x128xf32>
    %273 = arith.subf %268, %272 : vector<8x128xf32>
    %274 = arith.mulf %242, %273 : vector<8x128xf32>
    %275 = vector.broadcast %0 : f32 to vector<8x128xf32>
    %276 = arith.mulf %275, %274 : vector<8x128xf32>
    %277 = vector.broadcast %166 : f32 to vector<8x128xf32>
    %278 = arith.mulf %277, %276 : vector<8x128xf32>
    %279 = arith.addf %160, %278 : vector<8x128xf32>
    %c0_177 = arith.constant 0 : index
    %c0_178 = arith.constant 0 : index
    %280 = vector.load %arg3[%c0_177, %c0_178] : memref<128x128xf32, #tpu.memory_space<vmem>>, vector<128x128xf32>
    %cst_179 = arith.constant dense<0.000000e+00> : vector<8x128xf32>
    %281 = tpu.matmul %279, %280, %cst_179 {dimension_numbers = #tpu.dot_dimension_numbers<[1], [0], [0], [1], [0, 0, 1, 1], [], []>} : vector<8x128xf32>, vector<128x128xf32>, vector<8x128xf32> -> vector<8x128xf32>
    %c0_180 = arith.constant 0 : index
    %c0_181 = arith.constant 0 : index
    %282 = vector.load %arg4[%c0_180, %c0_181] : memref<1x128xf32, #tpu.memory_space<vmem>>, vector<1x128xf32>
    %283 = vector.broadcast %282 : vector<1x128xf32> to vector<8x128xf32>
    %284 = arith.addf %281, %283 : vector<8x128xf32>
    %cst_182 = arith.constant 0.000000e+00 : f32
    %285 = vector.broadcast %cst_182 : f32 to vector<8x128xf32>
    %286 = arith.maximumf %284, %285 : vector<8x128xf32>
    %c0_183 = arith.constant 0 : index
    %c0_184 = arith.constant 0 : index
    %287 = vector.load %arg5[%c0_183, %c0_184] : memref<128x128xf32, #tpu.memory_space<vmem>>, vector<128x128xf32>
    %cst_185 = arith.constant dense<0.000000e+00> : vector<8x128xf32>
    %288 = tpu.matmul %286, %287, %cst_185 {dimension_numbers = #tpu.dot_dimension_numbers<[1], [0], [0], [1], [0, 0, 1, 1], [], []>} : vector<8x128xf32>, vector<128x128xf32>, vector<8x128xf32> -> vector<8x128xf32>
    %c0_186 = arith.constant 0 : index
    %c0_187 = arith.constant 0 : index
    %289 = vector.load %arg6[%c0_186, %c0_187] : memref<1x128xf32, #tpu.memory_space<vmem>>, vector<1x128xf32>
    %290 = vector.broadcast %289 : vector<1x128xf32> to vector<8x128xf32>
    %291 = arith.addf %288, %290 : vector<8x128xf32>
    %cst_188 = arith.constant 0.000000e+00 : f32
    %292 = vector.broadcast %cst_188 : f32 to vector<8x128xf32>
    %293 = arith.maximumf %291, %292 : vector<8x128xf32>
    %c0_189 = arith.constant 0 : index
    %c0_190 = arith.constant 0 : index
    %294 = vector.load %arg7[%c0_189, %c0_190] : memref<128x128xf32, #tpu.memory_space<vmem>>, vector<128x128xf32>
    %cst_191 = arith.constant dense<0.000000e+00> : vector<8x128xf32>
    %295 = tpu.matmul %293, %294, %cst_191 {dimension_numbers = #tpu.dot_dimension_numbers<[1], [0], [0], [1], [0, 0, 1, 1], [], []>} : vector<8x128xf32>, vector<128x128xf32>, vector<8x128xf32> -> vector<8x128xf32>
    %c0_192 = arith.constant 0 : index
    %c0_193 = arith.constant 0 : index
    %296 = vector.load %arg8[%c0_192, %c0_193] : memref<1x128xf32, #tpu.memory_space<vmem>>, vector<1x128xf32>
    %297 = vector.broadcast %296 : vector<1x128xf32> to vector<8x128xf32>
    %298 = arith.addf %295, %297 : vector<8x128xf32>
    %cst_194 = arith.constant 0.000000e+00 : f32
    %299 = vector.broadcast %cst_194 : f32 to vector<8x128xf32>
    %300 = arith.maximumf %298, %299 : vector<8x128xf32>
    %c0_195 = arith.constant 0 : index
    %c0_196 = arith.constant 0 : index
    %301 = vector.load %arg9[%c0_195, %c0_196] : memref<128x128xf32, #tpu.memory_space<vmem>>, vector<128x128xf32>
    %cst_197 = arith.constant dense<0.000000e+00> : vector<8x128xf32>
    %302 = tpu.matmul %300, %301, %cst_197 {dimension_numbers = #tpu.dot_dimension_numbers<[1], [0], [0], [1], [0, 0, 1, 1], [], []>} : vector<8x128xf32>, vector<128x128xf32>, vector<8x128xf32> -> vector<8x128xf32>
    %c0_198 = arith.constant 0 : index
    %c0_199 = arith.constant 0 : index
    %303 = vector.load %arg10[%c0_198, %c0_199] : memref<1x128xf32, #tpu.memory_space<vmem>>, vector<1x128xf32>
    %304 = vector.broadcast %303 : vector<1x128xf32> to vector<8x128xf32>
    %305 = arith.addf %302, %304 : vector<8x128xf32>
    %306 = arith.mulf %279, %305 : vector<8x128xf32>
    %cst_200 = arith.constant dense<0.000000e+00> : vector<8xf32>
    %307 = vector.multi_reduction <add>, %306, %cst_200 [1] : vector<8x128xf32> to vector<8xf32>
    %308 = vector.shape_cast %307 : vector<8xf32> to vector<8x1xf32>
    %309 = vector.broadcast %308 : vector<8x1xf32> to vector<8x128xf32>
    %310 = arith.subf %305, %309 : vector<8x128xf32>
    %311 = arith.mulf %279, %310 : vector<8x128xf32>
    %312 = vector.broadcast %0 : f32 to vector<8x128xf32>
    %313 = arith.mulf %312, %311 : vector<8x128xf32>
    %cst_201 = arith.constant 2.000000e+00 : f32
    %314 = vector.broadcast %cst_201 : f32 to vector<8x128xf32>
    %315 = arith.mulf %314, %239 : vector<8x128xf32>
    %316 = arith.addf %202, %315 : vector<8x128xf32>
    %cst_202 = arith.constant 2.000000e+00 : f32
    %317 = vector.broadcast %cst_202 : f32 to vector<8x128xf32>
    %318 = arith.mulf %317, %276 : vector<8x128xf32>
    %319 = arith.addf %316, %318 : vector<8x128xf32>
    %320 = arith.addf %319, %313 : vector<8x128xf32>
    %321 = vector.broadcast %168 : f32 to vector<8x128xf32>
    %322 = arith.mulf %321, %320 : vector<8x128xf32>
    %323 = arith.addf %160, %322 : vector<8x128xf32>
    %324 = arith.index_cast %c1_i32 : i32 to index
    %c0_203 = arith.constant 0 : index
    %c0_204 = arith.constant 0 : index
    %325 = vector.load %arg11[%324, %c0_203, %c0_204] : memref<4x8x128xf32, #tpu.memory_space<vmem>>, vector<1x8x128xf32>
    %326 = vector.shape_cast %325 : vector<1x8x128xf32> to vector<8x128xf32>
    %327 = vector.shape_cast %323 : vector<8x128xf32> to vector<1x8x128xf32>
    tpu.vector_store %arg11[%324, %c0_203, %c0_204], %327 {strides = array<i32>} : memref<4x8x128xf32, #tpu.memory_space<vmem>>, vector<1x8x128xf32>,
    %c2_i32 = arith.constant 2 : i32
    %328 = arith.index_cast %c2_i32 : i32 to index
    %329 = memref.load %arg0[%328] : memref<4xf32, #tpu.memory_space<smem>>
    %cst_205 = arith.constant 5.000000e-01 : f32
    %330 = arith.mulf %cst_205, %329 : f32
    %cst_206 = arith.constant 0.166666672 : f32
    %331 = arith.mulf %329, %cst_206 : f32
    %c0_207 = arith.constant 0 : index
    %c0_208 = arith.constant 0 : index
    %332 = vector.load %arg3[%c0_207, %c0_208] : memref<128x128xf32, #tpu.memory_space<vmem>>, vector<128x128xf32>
    %cst_209 = arith.constant dense<0.000000e+00> : vector<8x128xf32>
    %333 = tpu.matmul %323, %332, %cst_209 {dimension_numbers = #tpu.dot_dimension_numbers<[1], [0], [0], [1], [0, 0, 1, 1], [], []>} : vector<8x128xf32>, vector<128x128xf32>, vector<8x128xf32> -> vector<8x128xf32>
    %c0_210 = arith.constant 0 : index
    %c0_211 = arith.constant 0 : index
    %334 = vector.load %arg4[%c0_210, %c0_211] : memref<1x128xf32, #tpu.memory_space<vmem>>, vector<1x128xf32>
    %335 = vector.broadcast %334 : vector<1x128xf32> to vector<8x128xf32>
    %336 = arith.addf %333, %335 : vector<8x128xf32>
    %cst_212 = arith.constant 0.000000e+00 : f32
    %337 = vector.broadcast %cst_212 : f32 to vector<8x128xf32>
    %338 = arith.maximumf %336, %337 : vector<8x128xf32>
    %c0_213 = arith.constant 0 : index
    %c0_214 = arith.constant 0 : index
    %339 = vector.load %arg5[%c0_213, %c0_214] : memref<128x128xf32, #tpu.memory_space<vmem>>, vector<128x128xf32>
    %cst_215 = arith.constant dense<0.000000e+00> : vector<8x128xf32>
    %340 = tpu.matmul %338, %339, %cst_215 {dimension_numbers = #tpu.dot_dimension_numbers<[1], [0], [0], [1], [0, 0, 1, 1], [], []>} : vector<8x128xf32>, vector<128x128xf32>, vector<8x128xf32> -> vector<8x128xf32>
    %c0_216 = arith.constant 0 : index
    %c0_217 = arith.constant 0 : index
    %341 = vector.load %arg6[%c0_216, %c0_217] : memref<1x128xf32, #tpu.memory_space<vmem>>, vector<1x128xf32>
    %342 = vector.broadcast %341 : vector<1x128xf32> to vector<8x128xf32>
    %343 = arith.addf %340, %342 : vector<8x128xf32>
    %cst_218 = arith.constant 0.000000e+00 : f32
    %344 = vector.broadcast %cst_218 : f32 to vector<8x128xf32>
    %345 = arith.maximumf %343, %344 : vector<8x128xf32>
    %c0_219 = arith.constant 0 : index
    %c0_220 = arith.constant 0 : index
    %346 = vector.load %arg7[%c0_219, %c0_220] : memref<128x128xf32, #tpu.memory_space<vmem>>, vector<128x128xf32>
    %cst_221 = arith.constant dense<0.000000e+00> : vector<8x128xf32>
    %347 = tpu.matmul %345, %346, %cst_221 {dimension_numbers = #tpu.dot_dimension_numbers<[1], [0], [0], [1], [0, 0, 1, 1], [], []>} : vector<8x128xf32>, vector<128x128xf32>, vector<8x128xf32> -> vector<8x128xf32>
    %c0_222 = arith.constant 0 : index
    %c0_223 = arith.constant 0 : index
    %348 = vector.load %arg8[%c0_222, %c0_223] : memref<1x128xf32, #tpu.memory_space<vmem>>, vector<1x128xf32>
    %349 = vector.broadcast %348 : vector<1x128xf32> to vector<8x128xf32>
    %350 = arith.addf %347, %349 : vector<8x128xf32>
    %cst_224 = arith.constant 0.000000e+00 : f32
    %351 = vector.broadcast %cst_224 : f32 to vector<8x128xf32>
    %352 = arith.maximumf %350, %351 : vector<8x128xf32>
    %c0_225 = arith.constant 0 : index
    %c0_226 = arith.constant 0 : index
    %353 = vector.load %arg9[%c0_225, %c0_226] : memref<128x128xf32, #tpu.memory_space<vmem>>, vector<128x128xf32>
    %cst_227 = arith.constant dense<0.000000e+00> : vector<8x128xf32>
    %354 = tpu.matmul %352, %353, %cst_227 {dimension_numbers = #tpu.dot_dimension_numbers<[1], [0], [0], [1], [0, 0, 1, 1], [], []>} : vector<8x128xf32>, vector<128x128xf32>, vector<8x128xf32> -> vector<8x128xf32>
    %c0_228 = arith.constant 0 : index
    %c0_229 = arith.constant 0 : index
    %355 = vector.load %arg10[%c0_228, %c0_229] : memref<1x128xf32, #tpu.memory_space<vmem>>, vector<1x128xf32>
    %356 = vector.broadcast %355 : vector<1x128xf32> to vector<8x128xf32>
    %357 = arith.addf %354, %356 : vector<8x128xf32>
    %358 = arith.mulf %323, %357 : vector<8x128xf32>
    %cst_230 = arith.constant dense<0.000000e+00> : vector<8xf32>
    %359 = vector.multi_reduction <add>, %358, %cst_230 [1] : vector<8x128xf32> to vector<8xf32>
    %360 = vector.shape_cast %359 : vector<8xf32> to vector<8x1xf32>
    %361 = vector.broadcast %360 : vector<8x1xf32> to vector<8x128xf32>
    %362 = arith.subf %357, %361 : vector<8x128xf32>
    %363 = arith.mulf %323, %362 : vector<8x128xf32>
    %364 = vector.broadcast %0 : f32 to vector<8x128xf32>
    %365 = arith.mulf %364, %363 : vector<8x128xf32>
    %366 = vector.broadcast %330 : f32 to vector<8x128xf32>
    %367 = arith.mulf %366, %365 : vector<8x128xf32>
    %368 = arith.addf %323, %367 : vector<8x128xf32>
    %c0_231 = arith.constant 0 : index
    %c0_232 = arith.constant 0 : index
    %369 = vector.load %arg3[%c0_231, %c0_232] : memref<128x128xf32, #tpu.memory_space<vmem>>, vector<128x128xf32>
    %cst_233 = arith.constant dense<0.000000e+00> : vector<8x128xf32>
    %370 = tpu.matmul %368, %369, %cst_233 {dimension_numbers = #tpu.dot_dimension_numbers<[1], [0], [0], [1], [0, 0, 1, 1], [], []>} : vector<8x128xf32>, vector<128x128xf32>, vector<8x128xf32> -> vector<8x128xf32>
    %c0_234 = arith.constant 0 : index
    %c0_235 = arith.constant 0 : index
    %371 = vector.load %arg4[%c0_234, %c0_235] : memref<1x128xf32, #tpu.memory_space<vmem>>, vector<1x128xf32>
    %372 = vector.broadcast %371 : vector<1x128xf32> to vector<8x128xf32>
    %373 = arith.addf %370, %372 : vector<8x128xf32>
    %cst_236 = arith.constant 0.000000e+00 : f32
    %374 = vector.broadcast %cst_236 : f32 to vector<8x128xf32>
    %375 = arith.maximumf %373, %374 : vector<8x128xf32>
    %c0_237 = arith.constant 0 : index
    %c0_238 = arith.constant 0 : index
    %376 = vector.load %arg5[%c0_237, %c0_238] : memref<128x128xf32, #tpu.memory_space<vmem>>, vector<128x128xf32>
    %cst_239 = arith.constant dense<0.000000e+00> : vector<8x128xf32>
    %377 = tpu.matmul %375, %376, %cst_239 {dimension_numbers = #tpu.dot_dimension_numbers<[1], [0], [0], [1], [0, 0, 1, 1], [], []>} : vector<8x128xf32>, vector<128x128xf32>, vector<8x128xf32> -> vector<8x128xf32>
    %c0_240 = arith.constant 0 : index
    %c0_241 = arith.constant 0 : index
    %378 = vector.load %arg6[%c0_240, %c0_241] : memref<1x128xf32, #tpu.memory_space<vmem>>, vector<1x128xf32>
    %379 = vector.broadcast %378 : vector<1x128xf32> to vector<8x128xf32>
    %380 = arith.addf %377, %379 : vector<8x128xf32>
    %cst_242 = arith.constant 0.000000e+00 : f32
    %381 = vector.broadcast %cst_242 : f32 to vector<8x128xf32>
    %382 = arith.maximumf %380, %381 : vector<8x128xf32>
    %c0_243 = arith.constant 0 : index
    %c0_244 = arith.constant 0 : index
    %383 = vector.load %arg7[%c0_243, %c0_244] : memref<128x128xf32, #tpu.memory_space<vmem>>, vector<128x128xf32>
    %cst_245 = arith.constant dense<0.000000e+00> : vector<8x128xf32>
    %384 = tpu.matmul %382, %383, %cst_245 {dimension_numbers = #tpu.dot_dimension_numbers<[1], [0], [0], [1], [0, 0, 1, 1], [], []>} : vector<8x128xf32>, vector<128x128xf32>, vector<8x128xf32> -> vector<8x128xf32>
    %c0_246 = arith.constant 0 : index
    %c0_247 = arith.constant 0 : index
    %385 = vector.load %arg8[%c0_246, %c0_247] : memref<1x128xf32, #tpu.memory_space<vmem>>, vector<1x128xf32>
    %386 = vector.broadcast %385 : vector<1x128xf32> to vector<8x128xf32>
    %387 = arith.addf %384, %386 : vector<8x128xf32>
    %cst_248 = arith.constant 0.000000e+00 : f32
    %388 = vector.broadcast %cst_248 : f32 to vector<8x128xf32>
    %389 = arith.maximumf %387, %388 : vector<8x128xf32>
    %c0_249 = arith.constant 0 : index
    %c0_250 = arith.constant 0 : index
    %390 = vector.load %arg9[%c0_249, %c0_250] : memref<128x128xf32, #tpu.memory_space<vmem>>, vector<128x128xf32>
    %cst_251 = arith.constant dense<0.000000e+00> : vector<8x128xf32>
    %391 = tpu.matmul %389, %390, %cst_251 {dimension_numbers = #tpu.dot_dimension_numbers<[1], [0], [0], [1], [0, 0, 1, 1], [], []>} : vector<8x128xf32>, vector<128x128xf32>, vector<8x128xf32> -> vector<8x128xf32>
    %c0_252 = arith.constant 0 : index
    %c0_253 = arith.constant 0 : index
    %392 = vector.load %arg10[%c0_252, %c0_253] : memref<1x128xf32, #tpu.memory_space<vmem>>, vector<1x128xf32>
    %393 = vector.broadcast %392 : vector<1x128xf32> to vector<8x128xf32>
    %394 = arith.addf %391, %393 : vector<8x128xf32>
    %395 = arith.mulf %368, %394 : vector<8x128xf32>
    %cst_254 = arith.constant dense<0.000000e+00> : vector<8xf32>
    %396 = vector.multi_reduction <add>, %395, %cst_254 [1] : vector<8x128xf32> to vector<8xf32>
    %397 = vector.shape_cast %396 : vector<8xf32> to vector<8x1xf32>
    %398 = vector.broadcast %397 : vector<8x1xf32> to vector<8x128xf32>
    %399 = arith.subf %394, %398 : vector<8x128xf32>
    %400 = arith.mulf %368, %399 : vector<8x128xf32>
    %401 = vector.broadcast %0 : f32 to vector<8x128xf32>
    %402 = arith.mulf %401, %400 : vector<8x128xf32>
    %403 = vector.broadcast %330 : f32 to vector<8x128xf32>
    %404 = arith.mulf %403, %402 : vector<8x128xf32>
    %405 = arith.addf %323, %404 : vector<8x128xf32>
    %c0_255 = arith.constant 0 : index
    %c0_256 = arith.constant 0 : index
    %406 = vector.load %arg3[%c0_255, %c0_256] : memref<128x128xf32, #tpu.memory_space<vmem>>, vector<128x128xf32>
    %cst_257 = arith.constant dense<0.000000e+00> : vector<8x128xf32>
    %407 = tpu.matmul %405, %406, %cst_257 {dimension_numbers = #tpu.dot_dimension_numbers<[1], [0], [0], [1], [0, 0, 1, 1], [], []>} : vector<8x128xf32>, vector<128x128xf32>, vector<8x128xf32> -> vector<8x128xf32>
    %c0_258 = arith.constant 0 : index
    %c0_259 = arith.constant 0 : index
    %408 = vector.load %arg4[%c0_258, %c0_259] : memref<1x128xf32, #tpu.memory_space<vmem>>, vector<1x128xf32>
    %409 = vector.broadcast %408 : vector<1x128xf32> to vector<8x128xf32>
    %410 = arith.addf %407, %409 : vector<8x128xf32>
    %cst_260 = arith.constant 0.000000e+00 : f32
    %411 = vector.broadcast %cst_260 : f32 to vector<8x128xf32>
    %412 = arith.maximumf %410, %411 : vector<8x128xf32>
    %c0_261 = arith.constant 0 : index
    %c0_262 = arith.constant 0 : index
    %413 = vector.load %arg5[%c0_261, %c0_262] : memref<128x128xf32, #tpu.memory_space<vmem>>, vector<128x128xf32>
    %cst_263 = arith.constant dense<0.000000e+00> : vector<8x128xf32>
    %414 = tpu.matmul %412, %413, %cst_263 {dimension_numbers = #tpu.dot_dimension_numbers<[1], [0], [0], [1], [0, 0, 1, 1], [], []>} : vector<8x128xf32>, vector<128x128xf32>, vector<8x128xf32> -> vector<8x128xf32>
    %c0_264 = arith.constant 0 : index
    %c0_265 = arith.constant 0 : index
    %415 = vector.load %arg6[%c0_264, %c0_265] : memref<1x128xf32, #tpu.memory_space<vmem>>, vector<1x128xf32>
    %416 = vector.broadcast %415 : vector<1x128xf32> to vector<8x128xf32>
    %417 = arith.addf %414, %416 : vector<8x128xf32>
    %cst_266 = arith.constant 0.000000e+00 : f32
    %418 = vector.broadcast %cst_266 : f32 to vector<8x128xf32>
    %419 = arith.maximumf %417, %418 : vector<8x128xf32>
    %c0_267 = arith.constant 0 : index
    %c0_268 = arith.constant 0 : index
    %420 = vector.load %arg7[%c0_267, %c0_268] : memref<128x128xf32, #tpu.memory_space<vmem>>, vector<128x128xf32>
    %cst_269 = arith.constant dense<0.000000e+00> : vector<8x128xf32>
    %421 = tpu.matmul %419, %420, %cst_269 {dimension_numbers = #tpu.dot_dimension_numbers<[1], [0], [0], [1], [0, 0, 1, 1], [], []>} : vector<8x128xf32>, vector<128x128xf32>, vector<8x128xf32> -> vector<8x128xf32>
    %c0_270 = arith.constant 0 : index
    %c0_271 = arith.constant 0 : index
    %422 = vector.load %arg8[%c0_270, %c0_271] : memref<1x128xf32, #tpu.memory_space<vmem>>, vector<1x128xf32>
    %423 = vector.broadcast %422 : vector<1x128xf32> to vector<8x128xf32>
    %424 = arith.addf %421, %423 : vector<8x128xf32>
    %cst_272 = arith.constant 0.000000e+00 : f32
    %425 = vector.broadcast %cst_272 : f32 to vector<8x128xf32>
    %426 = arith.maximumf %424, %425 : vector<8x128xf32>
    %c0_273 = arith.constant 0 : index
    %c0_274 = arith.constant 0 : index
    %427 = vector.load %arg9[%c0_273, %c0_274] : memref<128x128xf32, #tpu.memory_space<vmem>>, vector<128x128xf32>
    %cst_275 = arith.constant dense<0.000000e+00> : vector<8x128xf32>
    %428 = tpu.matmul %426, %427, %cst_275 {dimension_numbers = #tpu.dot_dimension_numbers<[1], [0], [0], [1], [0, 0, 1, 1], [], []>} : vector<8x128xf32>, vector<128x128xf32>, vector<8x128xf32> -> vector<8x128xf32>
    %c0_276 = arith.constant 0 : index
    %c0_277 = arith.constant 0 : index
    %429 = vector.load %arg10[%c0_276, %c0_277] : memref<1x128xf32, #tpu.memory_space<vmem>>, vector<1x128xf32>
    %430 = vector.broadcast %429 : vector<1x128xf32> to vector<8x128xf32>
    %431 = arith.addf %428, %430 : vector<8x128xf32>
    %432 = arith.mulf %405, %431 : vector<8x128xf32>
    %cst_278 = arith.constant dense<0.000000e+00> : vector<8xf32>
    %433 = vector.multi_reduction <add>, %432, %cst_278 [1] : vector<8x128xf32> to vector<8xf32>
    %434 = vector.shape_cast %433 : vector<8xf32> to vector<8x1xf32>
    %435 = vector.broadcast %434 : vector<8x1xf32> to vector<8x128xf32>
    %436 = arith.subf %431, %435 : vector<8x128xf32>
    %437 = arith.mulf %405, %436 : vector<8x128xf32>
    %438 = vector.broadcast %0 : f32 to vector<8x128xf32>
    %439 = arith.mulf %438, %437 : vector<8x128xf32>
    %440 = vector.broadcast %329 : f32 to vector<8x128xf32>
    %441 = arith.mulf %440, %439 : vector<8x128xf32>
    %442 = arith.addf %323, %441 : vector<8x128xf32>
    %c0_279 = arith.constant 0 : index
    %c0_280 = arith.constant 0 : index
    %443 = vector.load %arg3[%c0_279, %c0_280] : memref<128x128xf32, #tpu.memory_space<vmem>>, vector<128x128xf32>
    %cst_281 = arith.constant dense<0.000000e+00> : vector<8x128xf32>
    %444 = tpu.matmul %442, %443, %cst_281 {dimension_numbers = #tpu.dot_dimension_numbers<[1], [0], [0], [1], [0, 0, 1, 1], [], []>} : vector<8x128xf32>, vector<128x128xf32>, vector<8x128xf32> -> vector<8x128xf32>
    %c0_282 = arith.constant 0 : index
    %c0_283 = arith.constant 0 : index
    %445 = vector.load %arg4[%c0_282, %c0_283] : memref<1x128xf32, #tpu.memory_space<vmem>>, vector<1x128xf32>
    %446 = vector.broadcast %445 : vector<1x128xf32> to vector<8x128xf32>
    %447 = arith.addf %444, %446 : vector<8x128xf32>
    %cst_284 = arith.constant 0.000000e+00 : f32
    %448 = vector.broadcast %cst_284 : f32 to vector<8x128xf32>
    %449 = arith.maximumf %447, %448 : vector<8x128xf32>
    %c0_285 = arith.constant 0 : index
    %c0_286 = arith.constant 0 : index
    %450 = vector.load %arg5[%c0_285, %c0_286] : memref<128x128xf32, #tpu.memory_space<vmem>>, vector<128x128xf32>
    %cst_287 = arith.constant dense<0.000000e+00> : vector<8x128xf32>
    %451 = tpu.matmul %449, %450, %cst_287 {dimension_numbers = #tpu.dot_dimension_numbers<[1], [0], [0], [1], [0, 0, 1, 1], [], []>} : vector<8x128xf32>, vector<128x128xf32>, vector<8x128xf32> -> vector<8x128xf32>
    %c0_288 = arith.constant 0 : index
    %c0_289 = arith.constant 0 : index
    %452 = vector.load %arg6[%c0_288, %c0_289] : memref<1x128xf32, #tpu.memory_space<vmem>>, vector<1x128xf32>
    %453 = vector.broadcast %452 : vector<1x128xf32> to vector<8x128xf32>
    %454 = arith.addf %451, %453 : vector<8x128xf32>
    %cst_290 = arith.constant 0.000000e+00 : f32
    %455 = vector.broadcast %cst_290 : f32 to vector<8x128xf32>
    %456 = arith.maximumf %454, %455 : vector<8x128xf32>
    %c0_291 = arith.constant 0 : index
    %c0_292 = arith.constant 0 : index
    %457 = vector.load %arg7[%c0_291, %c0_292] : memref<128x128xf32, #tpu.memory_space<vmem>>, vector<128x128xf32>
    %cst_293 = arith.constant dense<0.000000e+00> : vector<8x128xf32>
    %458 = tpu.matmul %456, %457, %cst_293 {dimension_numbers = #tpu.dot_dimension_numbers<[1], [0], [0], [1], [0, 0, 1, 1], [], []>} : vector<8x128xf32>, vector<128x128xf32>, vector<8x128xf32> -> vector<8x128xf32>
    %c0_294 = arith.constant 0 : index
    %c0_295 = arith.constant 0 : index
    %459 = vector.load %arg8[%c0_294, %c0_295] : memref<1x128xf32, #tpu.memory_space<vmem>>, vector<1x128xf32>
    %460 = vector.broadcast %459 : vector<1x128xf32> to vector<8x128xf32>
    %461 = arith.addf %458, %460 : vector<8x128xf32>
    %cst_296 = arith.constant 0.000000e+00 : f32
    %462 = vector.broadcast %cst_296 : f32 to vector<8x128xf32>
    %463 = arith.maximumf %461, %462 : vector<8x128xf32>
    %c0_297 = arith.constant 0 : index
    %c0_298 = arith.constant 0 : index
    %464 = vector.load %arg9[%c0_297, %c0_298] : memref<128x128xf32, #tpu.memory_space<vmem>>, vector<128x128xf32>
    %cst_299 = arith.constant dense<0.000000e+00> : vector<8x128xf32>
    %465 = tpu.matmul %463, %464, %cst_299 {dimension_numbers = #tpu.dot_dimension_numbers<[1], [0], [0], [1], [0, 0, 1, 1], [], []>} : vector<8x128xf32>, vector<128x128xf32>, vector<8x128xf32> -> vector<8x128xf32>
    %c0_300 = arith.constant 0 : index
    %c0_301 = arith.constant 0 : index
    %466 = vector.load %arg10[%c0_300, %c0_301] : memref<1x128xf32, #tpu.memory_space<vmem>>, vector<1x128xf32>
    %467 = vector.broadcast %466 : vector<1x128xf32> to vector<8x128xf32>
    %468 = arith.addf %465, %467 : vector<8x128xf32>
    %469 = arith.mulf %442, %468 : vector<8x128xf32>
    %cst_302 = arith.constant dense<0.000000e+00> : vector<8xf32>
    %470 = vector.multi_reduction <add>, %469, %cst_302 [1] : vector<8x128xf32> to vector<8xf32>
    %471 = vector.shape_cast %470 : vector<8xf32> to vector<8x1xf32>
    %472 = vector.broadcast %471 : vector<8x1xf32> to vector<8x128xf32>
    %473 = arith.subf %468, %472 : vector<8x128xf32>
    %474 = arith.mulf %442, %473 : vector<8x128xf32>
    %475 = vector.broadcast %0 : f32 to vector<8x128xf32>
    %476 = arith.mulf %475, %474 : vector<8x128xf32>
    %cst_303 = arith.constant 2.000000e+00 : f32
    %477 = vector.broadcast %cst_303 : f32 to vector<8x128xf32>
    %478 = arith.mulf %477, %402 : vector<8x128xf32>
    %479 = arith.addf %365, %478 : vector<8x128xf32>
    %cst_304 = arith.constant 2.000000e+00 : f32
    %480 = vector.broadcast %cst_304 : f32 to vector<8x128xf32>
    %481 = arith.mulf %480, %439 : vector<8x128xf32>
    %482 = arith.addf %479, %481 : vector<8x128xf32>
    %483 = arith.addf %482, %476 : vector<8x128xf32>
    %484 = vector.broadcast %331 : f32 to vector<8x128xf32>
    %485 = arith.mulf %484, %483 : vector<8x128xf32>
    %486 = arith.addf %323, %485 : vector<8x128xf32>
    %487 = arith.index_cast %c2_i32 : i32 to index
    %c0_305 = arith.constant 0 : index
    %c0_306 = arith.constant 0 : index
    %488 = vector.load %arg11[%487, %c0_305, %c0_306] : memref<4x8x128xf32, #tpu.memory_space<vmem>>, vector<1x8x128xf32>
    %489 = vector.shape_cast %488 : vector<1x8x128xf32> to vector<8x128xf32>
    %490 = vector.shape_cast %486 : vector<8x128xf32> to vector<1x8x128xf32>
    tpu.vector_store %arg11[%487, %c0_305, %c0_306], %490 {strides = array<i32>} : memref<4x8x128xf32, #tpu.memory_space<vmem>>, vector<1x8x128xf32>,
    %c3_i32 = arith.constant 3 : i32
    %491 = arith.index_cast %c3_i32 : i32 to index
    %492 = memref.load %arg0[%491] : memref<4xf32, #tpu.memory_space<smem>>
    %cst_307 = arith.constant 5.000000e-01 : f32
    %493 = arith.mulf %cst_307, %492 : f32
    %cst_308 = arith.constant 0.166666672 : f32
    %494 = arith.mulf %492, %cst_308 : f32
    %c0_309 = arith.constant 0 : index
    %c0_310 = arith.constant 0 : index
    %495 = vector.load %arg3[%c0_309, %c0_310] : memref<128x128xf32, #tpu.memory_space<vmem>>, vector<128x128xf32>
    %cst_311 = arith.constant dense<0.000000e+00> : vector<8x128xf32>
    %496 = tpu.matmul %486, %495, %cst_311 {dimension_numbers = #tpu.dot_dimension_numbers<[1], [0], [0], [1], [0, 0, 1, 1], [], []>} : vector<8x128xf32>, vector<128x128xf32>, vector<8x128xf32> -> vector<8x128xf32>
    %c0_312 = arith.constant 0 : index
    %c0_313 = arith.constant 0 : index
    %497 = vector.load %arg4[%c0_312, %c0_313] : memref<1x128xf32, #tpu.memory_space<vmem>>, vector<1x128xf32>
    %498 = vector.broadcast %497 : vector<1x128xf32> to vector<8x128xf32>
    %499 = arith.addf %496, %498 : vector<8x128xf32>
    %cst_314 = arith.constant 0.000000e+00 : f32
    %500 = vector.broadcast %cst_314 : f32 to vector<8x128xf32>
    %501 = arith.maximumf %499, %500 : vector<8x128xf32>
    %c0_315 = arith.constant 0 : index
    %c0_316 = arith.constant 0 : index
    %502 = vector.load %arg5[%c0_315, %c0_316] : memref<128x128xf32, #tpu.memory_space<vmem>>, vector<128x128xf32>
    %cst_317 = arith.constant dense<0.000000e+00> : vector<8x128xf32>
    %503 = tpu.matmul %501, %502, %cst_317 {dimension_numbers = #tpu.dot_dimension_numbers<[1], [0], [0], [1], [0, 0, 1, 1], [], []>} : vector<8x128xf32>, vector<128x128xf32>, vector<8x128xf32> -> vector<8x128xf32>
    %c0_318 = arith.constant 0 : index
    %c0_319 = arith.constant 0 : index
    %504 = vector.load %arg6[%c0_318, %c0_319] : memref<1x128xf32, #tpu.memory_space<vmem>>, vector<1x128xf32>
    %505 = vector.broadcast %504 : vector<1x128xf32> to vector<8x128xf32>
    %506 = arith.addf %503, %505 : vector<8x128xf32>
    %cst_320 = arith.constant 0.000000e+00 : f32
    %507 = vector.broadcast %cst_320 : f32 to vector<8x128xf32>
    %508 = arith.maximumf %506, %507 : vector<8x128xf32>
    %c0_321 = arith.constant 0 : index
    %c0_322 = arith.constant 0 : index
    %509 = vector.load %arg7[%c0_321, %c0_322] : memref<128x128xf32, #tpu.memory_space<vmem>>, vector<128x128xf32>
    %cst_323 = arith.constant dense<0.000000e+00> : vector<8x128xf32>
    %510 = tpu.matmul %508, %509, %cst_323 {dimension_numbers = #tpu.dot_dimension_numbers<[1], [0], [0], [1], [0, 0, 1, 1], [], []>} : vector<8x128xf32>, vector<128x128xf32>, vector<8x128xf32> -> vector<8x128xf32>
    %c0_324 = arith.constant 0 : index
    %c0_325 = arith.constant 0 : index
    %511 = vector.load %arg8[%c0_324, %c0_325] : memref<1x128xf32, #tpu.memory_space<vmem>>, vector<1x128xf32>
    %512 = vector.broadcast %511 : vector<1x128xf32> to vector<8x128xf32>
    %513 = arith.addf %510, %512 : vector<8x128xf32>
    %cst_326 = arith.constant 0.000000e+00 : f32
    %514 = vector.broadcast %cst_326 : f32 to vector<8x128xf32>
    %515 = arith.maximumf %513, %514 : vector<8x128xf32>
    %c0_327 = arith.constant 0 : index
    %c0_328 = arith.constant 0 : index
    %516 = vector.load %arg9[%c0_327, %c0_328] : memref<128x128xf32, #tpu.memory_space<vmem>>, vector<128x128xf32>
    %cst_329 = arith.constant dense<0.000000e+00> : vector<8x128xf32>
    %517 = tpu.matmul %515, %516, %cst_329 {dimension_numbers = #tpu.dot_dimension_numbers<[1], [0], [0], [1], [0, 0, 1, 1], [], []>} : vector<8x128xf32>, vector<128x128xf32>, vector<8x128xf32> -> vector<8x128xf32>
    %c0_330 = arith.constant 0 : index
    %c0_331 = arith.constant 0 : index
    %518 = vector.load %arg10[%c0_330, %c0_331] : memref<1x128xf32, #tpu.memory_space<vmem>>, vector<1x128xf32>
    %519 = vector.broadcast %518 : vector<1x128xf32> to vector<8x128xf32>
    %520 = arith.addf %517, %519 : vector<8x128xf32>
    %521 = arith.mulf %486, %520 : vector<8x128xf32>
    %cst_332 = arith.constant dense<0.000000e+00> : vector<8xf32>
    %522 = vector.multi_reduction <add>, %521, %cst_332 [1] : vector<8x128xf32> to vector<8xf32>
    %523 = vector.shape_cast %522 : vector<8xf32> to vector<8x1xf32>
    %524 = vector.broadcast %523 : vector<8x1xf32> to vector<8x128xf32>
    %525 = arith.subf %520, %524 : vector<8x128xf32>
    %526 = arith.mulf %486, %525 : vector<8x128xf32>
    %527 = vector.broadcast %0 : f32 to vector<8x128xf32>
    %528 = arith.mulf %527, %526 : vector<8x128xf32>
    %529 = vector.broadcast %493 : f32 to vector<8x128xf32>
    %530 = arith.mulf %529, %528 : vector<8x128xf32>
    %531 = arith.addf %486, %530 : vector<8x128xf32>
    %c0_333 = arith.constant 0 : index
    %c0_334 = arith.constant 0 : index
    %532 = vector.load %arg3[%c0_333, %c0_334] : memref<128x128xf32, #tpu.memory_space<vmem>>, vector<128x128xf32>
    %cst_335 = arith.constant dense<0.000000e+00> : vector<8x128xf32>
    %533 = tpu.matmul %531, %532, %cst_335 {dimension_numbers = #tpu.dot_dimension_numbers<[1], [0], [0], [1], [0, 0, 1, 1], [], []>} : vector<8x128xf32>, vector<128x128xf32>, vector<8x128xf32> -> vector<8x128xf32>
    %c0_336 = arith.constant 0 : index
    %c0_337 = arith.constant 0 : index
    %534 = vector.load %arg4[%c0_336, %c0_337] : memref<1x128xf32, #tpu.memory_space<vmem>>, vector<1x128xf32>
    %535 = vector.broadcast %534 : vector<1x128xf32> to vector<8x128xf32>
    %536 = arith.addf %533, %535 : vector<8x128xf32>
    %cst_338 = arith.constant 0.000000e+00 : f32
    %537 = vector.broadcast %cst_338 : f32 to vector<8x128xf32>
    %538 = arith.maximumf %536, %537 : vector<8x128xf32>
    %c0_339 = arith.constant 0 : index
    %c0_340 = arith.constant 0 : index
    %539 = vector.load %arg5[%c0_339, %c0_340] : memref<128x128xf32, #tpu.memory_space<vmem>>, vector<128x128xf32>
    %cst_341 = arith.constant dense<0.000000e+00> : vector<8x128xf32>
    %540 = tpu.matmul %538, %539, %cst_341 {dimension_numbers = #tpu.dot_dimension_numbers<[1], [0], [0], [1], [0, 0, 1, 1], [], []>} : vector<8x128xf32>, vector<128x128xf32>, vector<8x128xf32> -> vector<8x128xf32>
    %c0_342 = arith.constant 0 : index
    %c0_343 = arith.constant 0 : index
    %541 = vector.load %arg6[%c0_342, %c0_343] : memref<1x128xf32, #tpu.memory_space<vmem>>, vector<1x128xf32>
    %542 = vector.broadcast %541 : vector<1x128xf32> to vector<8x128xf32>
    %543 = arith.addf %540, %542 : vector<8x128xf32>
    %cst_344 = arith.constant 0.000000e+00 : f32
    %544 = vector.broadcast %cst_344 : f32 to vector<8x128xf32>
    %545 = arith.maximumf %543, %544 : vector<8x128xf32>
    %c0_345 = arith.constant 0 : index
    %c0_346 = arith.constant 0 : index
    %546 = vector.load %arg7[%c0_345, %c0_346] : memref<128x128xf32, #tpu.memory_space<vmem>>, vector<128x128xf32>
    %cst_347 = arith.constant dense<0.000000e+00> : vector<8x128xf32>
    %547 = tpu.matmul %545, %546, %cst_347 {dimension_numbers = #tpu.dot_dimension_numbers<[1], [0], [0], [1], [0, 0, 1, 1], [], []>} : vector<8x128xf32>, vector<128x128xf32>, vector<8x128xf32> -> vector<8x128xf32>
    %c0_348 = arith.constant 0 : index
    %c0_349 = arith.constant 0 : index
    %548 = vector.load %arg8[%c0_348, %c0_349] : memref<1x128xf32, #tpu.memory_space<vmem>>, vector<1x128xf32>
    %549 = vector.broadcast %548 : vector<1x128xf32> to vector<8x128xf32>
    %550 = arith.addf %547, %549 : vector<8x128xf32>
    %cst_350 = arith.constant 0.000000e+00 : f32
    %551 = vector.broadcast %cst_350 : f32 to vector<8x128xf32>
    %552 = arith.maximumf %550, %551 : vector<8x128xf32>
    %c0_351 = arith.constant 0 : index
    %c0_352 = arith.constant 0 : index
    %553 = vector.load %arg9[%c0_351, %c0_352] : memref<128x128xf32, #tpu.memory_space<vmem>>, vector<128x128xf32>
    %cst_353 = arith.constant dense<0.000000e+00> : vector<8x128xf32>
    %554 = tpu.matmul %552, %553, %cst_353 {dimension_numbers = #tpu.dot_dimension_numbers<[1], [0], [0], [1], [0, 0, 1, 1], [], []>} : vector<8x128xf32>, vector<128x128xf32>, vector<8x128xf32> -> vector<8x128xf32>
    %c0_354 = arith.constant 0 : index
    %c0_355 = arith.constant 0 : index
    %555 = vector.load %arg10[%c0_354, %c0_355] : memref<1x128xf32, #tpu.memory_space<vmem>>, vector<1x128xf32>
    %556 = vector.broadcast %555 : vector<1x128xf32> to vector<8x128xf32>
    %557 = arith.addf %554, %556 : vector<8x128xf32>
    %558 = arith.mulf %531, %557 : vector<8x128xf32>
    %cst_356 = arith.constant dense<0.000000e+00> : vector<8xf32>
    %559 = vector.multi_reduction <add>, %558, %cst_356 [1] : vector<8x128xf32> to vector<8xf32>
    %560 = vector.shape_cast %559 : vector<8xf32> to vector<8x1xf32>
    %561 = vector.broadcast %560 : vector<8x1xf32> to vector<8x128xf32>
    %562 = arith.subf %557, %561 : vector<8x128xf32>
    %563 = arith.mulf %531, %562 : vector<8x128xf32>
    %564 = vector.broadcast %0 : f32 to vector<8x128xf32>
    %565 = arith.mulf %564, %563 : vector<8x128xf32>
    %566 = vector.broadcast %493 : f32 to vector<8x128xf32>
    %567 = arith.mulf %566, %565 : vector<8x128xf32>
    %568 = arith.addf %486, %567 : vector<8x128xf32>
    %c0_357 = arith.constant 0 : index
    %c0_358 = arith.constant 0 : index
    %569 = vector.load %arg3[%c0_357, %c0_358] : memref<128x128xf32, #tpu.memory_space<vmem>>, vector<128x128xf32>
    %cst_359 = arith.constant dense<0.000000e+00> : vector<8x128xf32>
    %570 = tpu.matmul %568, %569, %cst_359 {dimension_numbers = #tpu.dot_dimension_numbers<[1], [0], [0], [1], [0, 0, 1, 1], [], []>} : vector<8x128xf32>, vector<128x128xf32>, vector<8x128xf32> -> vector<8x128xf32>
    %c0_360 = arith.constant 0 : index
    %c0_361 = arith.constant 0 : index
    %571 = vector.load %arg4[%c0_360, %c0_361] : memref<1x128xf32, #tpu.memory_space<vmem>>, vector<1x128xf32>
    %572 = vector.broadcast %571 : vector<1x128xf32> to vector<8x128xf32>
    %573 = arith.addf %570, %572 : vector<8x128xf32>
    %cst_362 = arith.constant 0.000000e+00 : f32
    %574 = vector.broadcast %cst_362 : f32 to vector<8x128xf32>
    %575 = arith.maximumf %573, %574 : vector<8x128xf32>
    %c0_363 = arith.constant 0 : index
    %c0_364 = arith.constant 0 : index
    %576 = vector.load %arg5[%c0_363, %c0_364] : memref<128x128xf32, #tpu.memory_space<vmem>>, vector<128x128xf32>
    %cst_365 = arith.constant dense<0.000000e+00> : vector<8x128xf32>
    %577 = tpu.matmul %575, %576, %cst_365 {dimension_numbers = #tpu.dot_dimension_numbers<[1], [0], [0], [1], [0, 0, 1, 1], [], []>} : vector<8x128xf32>, vector<128x128xf32>, vector<8x128xf32> -> vector<8x128xf32>
    %c0_366 = arith.constant 0 : index
    %c0_367 = arith.constant 0 : index
    %578 = vector.load %arg6[%c0_366, %c0_367] : memref<1x128xf32, #tpu.memory_space<vmem>>, vector<1x128xf32>
    %579 = vector.broadcast %578 : vector<1x128xf32> to vector<8x128xf32>
    %580 = arith.addf %577, %579 : vector<8x128xf32>
    %cst_368 = arith.constant 0.000000e+00 : f32
    %581 = vector.broadcast %cst_368 : f32 to vector<8x128xf32>
    %582 = arith.maximumf %580, %581 : vector<8x128xf32>
    %c0_369 = arith.constant 0 : index
    %c0_370 = arith.constant 0 : index
    %583 = vector.load %arg7[%c0_369, %c0_370] : memref<128x128xf32, #tpu.memory_space<vmem>>, vector<128x128xf32>
    %cst_371 = arith.constant dense<0.000000e+00> : vector<8x128xf32>
    %584 = tpu.matmul %582, %583, %cst_371 {dimension_numbers = #tpu.dot_dimension_numbers<[1], [0], [0], [1], [0, 0, 1, 1], [], []>} : vector<8x128xf32>, vector<128x128xf32>, vector<8x128xf32> -> vector<8x128xf32>
    %c0_372 = arith.constant 0 : index
    %c0_373 = arith.constant 0 : index
    %585 = vector.load %arg8[%c0_372, %c0_373] : memref<1x128xf32, #tpu.memory_space<vmem>>, vector<1x128xf32>
    %586 = vector.broadcast %585 : vector<1x128xf32> to vector<8x128xf32>
    %587 = arith.addf %584, %586 : vector<8x128xf32>
    %cst_374 = arith.constant 0.000000e+00 : f32
    %588 = vector.broadcast %cst_374 : f32 to vector<8x128xf32>
    %589 = arith.maximumf %587, %588 : vector<8x128xf32>
    %c0_375 = arith.constant 0 : index
    %c0_376 = arith.constant 0 : index
    %590 = vector.load %arg9[%c0_375, %c0_376] : memref<128x128xf32, #tpu.memory_space<vmem>>, vector<128x128xf32>
    %cst_377 = arith.constant dense<0.000000e+00> : vector<8x128xf32>
    %591 = tpu.matmul %589, %590, %cst_377 {dimension_numbers = #tpu.dot_dimension_numbers<[1], [0], [0], [1], [0, 0, 1, 1], [], []>} : vector<8x128xf32>, vector<128x128xf32>, vector<8x128xf32> -> vector<8x128xf32>
    %c0_378 = arith.constant 0 : index
    %c0_379 = arith.constant 0 : index
    %592 = vector.load %arg10[%c0_378, %c0_379] : memref<1x128xf32, #tpu.memory_space<vmem>>, vector<1x128xf32>
    %593 = vector.broadcast %592 : vector<1x128xf32> to vector<8x128xf32>
    %594 = arith.addf %591, %593 : vector<8x128xf32>
    %595 = arith.mulf %568, %594 : vector<8x128xf32>
    %cst_380 = arith.constant dense<0.000000e+00> : vector<8xf32>
    %596 = vector.multi_reduction <add>, %595, %cst_380 [1] : vector<8x128xf32> to vector<8xf32>
    %597 = vector.shape_cast %596 : vector<8xf32> to vector<8x1xf32>
    %598 = vector.broadcast %597 : vector<8x1xf32> to vector<8x128xf32>
    %599 = arith.subf %594, %598 : vector<8x128xf32>
    %600 = arith.mulf %568, %599 : vector<8x128xf32>
    %601 = vector.broadcast %0 : f32 to vector<8x128xf32>
    %602 = arith.mulf %601, %600 : vector<8x128xf32>
    %603 = vector.broadcast %492 : f32 to vector<8x128xf32>
    %604 = arith.mulf %603, %602 : vector<8x128xf32>
    %605 = arith.addf %486, %604 : vector<8x128xf32>
    %c0_381 = arith.constant 0 : index
    %c0_382 = arith.constant 0 : index
    %606 = vector.load %arg3[%c0_381, %c0_382] : memref<128x128xf32, #tpu.memory_space<vmem>>, vector<128x128xf32>
    %cst_383 = arith.constant dense<0.000000e+00> : vector<8x128xf32>
    %607 = tpu.matmul %605, %606, %cst_383 {dimension_numbers = #tpu.dot_dimension_numbers<[1], [0], [0], [1], [0, 0, 1, 1], [], []>} : vector<8x128xf32>, vector<128x128xf32>, vector<8x128xf32> -> vector<8x128xf32>
    %c0_384 = arith.constant 0 : index
    %c0_385 = arith.constant 0 : index
    %608 = vector.load %arg4[%c0_384, %c0_385] : memref<1x128xf32, #tpu.memory_space<vmem>>, vector<1x128xf32>
    %609 = vector.broadcast %608 : vector<1x128xf32> to vector<8x128xf32>
    %610 = arith.addf %607, %609 : vector<8x128xf32>
    %cst_386 = arith.constant 0.000000e+00 : f32
    %611 = vector.broadcast %cst_386 : f32 to vector<8x128xf32>
    %612 = arith.maximumf %610, %611 : vector<8x128xf32>
    %c0_387 = arith.constant 0 : index
    %c0_388 = arith.constant 0 : index
    %613 = vector.load %arg5[%c0_387, %c0_388] : memref<128x128xf32, #tpu.memory_space<vmem>>, vector<128x128xf32>
    %cst_389 = arith.constant dense<0.000000e+00> : vector<8x128xf32>
    %614 = tpu.matmul %612, %613, %cst_389 {dimension_numbers = #tpu.dot_dimension_numbers<[1], [0], [0], [1], [0, 0, 1, 1], [], []>} : vector<8x128xf32>, vector<128x128xf32>, vector<8x128xf32> -> vector<8x128xf32>
    %c0_390 = arith.constant 0 : index
    %c0_391 = arith.constant 0 : index
    %615 = vector.load %arg6[%c0_390, %c0_391] : memref<1x128xf32, #tpu.memory_space<vmem>>, vector<1x128xf32>
    %616 = vector.broadcast %615 : vector<1x128xf32> to vector<8x128xf32>
    %617 = arith.addf %614, %616 : vector<8x128xf32>
    %cst_392 = arith.constant 0.000000e+00 : f32
    %618 = vector.broadcast %cst_392 : f32 to vector<8x128xf32>
    %619 = arith.maximumf %617, %618 : vector<8x128xf32>
    %c0_393 = arith.constant 0 : index
    %c0_394 = arith.constant 0 : index
    %620 = vector.load %arg7[%c0_393, %c0_394] : memref<128x128xf32, #tpu.memory_space<vmem>>, vector<128x128xf32>
    %cst_395 = arith.constant dense<0.000000e+00> : vector<8x128xf32>
    %621 = tpu.matmul %619, %620, %cst_395 {dimension_numbers = #tpu.dot_dimension_numbers<[1], [0], [0], [1], [0, 0, 1, 1], [], []>} : vector<8x128xf32>, vector<128x128xf32>, vector<8x128xf32> -> vector<8x128xf32>
    %c0_396 = arith.constant 0 : index
    %c0_397 = arith.constant 0 : index
    %622 = vector.load %arg8[%c0_396, %c0_397] : memref<1x128xf32, #tpu.memory_space<vmem>>, vector<1x128xf32>
    %623 = vector.broadcast %622 : vector<1x128xf32> to vector<8x128xf32>
    %624 = arith.addf %621, %623 : vector<8x128xf32>
    %cst_398 = arith.constant 0.000000e+00 : f32
    %625 = vector.broadcast %cst_398 : f32 to vector<8x128xf32>
    %626 = arith.maximumf %624, %625 : vector<8x128xf32>
    %c0_399 = arith.constant 0 : index
    %c0_400 = arith.constant 0 : index
    %627 = vector.load %arg9[%c0_399, %c0_400] : memref<128x128xf32, #tpu.memory_space<vmem>>, vector<128x128xf32>
    %cst_401 = arith.constant dense<0.000000e+00> : vector<8x128xf32>
    %628 = tpu.matmul %626, %627, %cst_401 {dimension_numbers = #tpu.dot_dimension_numbers<[1], [0], [0], [1], [0, 0, 1, 1], [], []>} : vector<8x128xf32>, vector<128x128xf32>, vector<8x128xf32> -> vector<8x128xf32>
    %c0_402 = arith.constant 0 : index
    %c0_403 = arith.constant 0 : index
    %629 = vector.load %arg10[%c0_402, %c0_403] : memref<1x128xf32, #tpu.memory_space<vmem>>, vector<1x128xf32>
    %630 = vector.broadcast %629 : vector<1x128xf32> to vector<8x128xf32>
    %631 = arith.addf %628, %630 : vector<8x128xf32>
    %632 = arith.mulf %605, %631 : vector<8x128xf32>
    %cst_404 = arith.constant dense<0.000000e+00> : vector<8xf32>
    %633 = vector.multi_reduction <add>, %632, %cst_404 [1] : vector<8x128xf32> to vector<8xf32>
    %634 = vector.shape_cast %633 : vector<8xf32> to vector<8x1xf32>
    %635 = vector.broadcast %634 : vector<8x1xf32> to vector<8x128xf32>
    %636 = arith.subf %631, %635 : vector<8x128xf32>
    %637 = arith.mulf %605, %636 : vector<8x128xf32>
    %638 = vector.broadcast %0 : f32 to vector<8x128xf32>
    %639 = arith.mulf %638, %637 : vector<8x128xf32>
    %cst_405 = arith.constant 2.000000e+00 : f32
    %640 = vector.broadcast %cst_405 : f32 to vector<8x128xf32>
    %641 = arith.mulf %640, %565 : vector<8x128xf32>
    %642 = arith.addf %528, %641 : vector<8x128xf32>
    %cst_406 = arith.constant 2.000000e+00 : f32
    %643 = vector.broadcast %cst_406 : f32 to vector<8x128xf32>
    %644 = arith.mulf %643, %602 : vector<8x128xf32>
    %645 = arith.addf %642, %644 : vector<8x128xf32>
    %646 = arith.addf %645, %639 : vector<8x128xf32>
    %647 = vector.broadcast %494 : f32 to vector<8x128xf32>
    %648 = arith.mulf %647, %646 : vector<8x128xf32>
    %649 = arith.addf %486, %648 : vector<8x128xf32>
    %650 = arith.index_cast %c3_i32 : i32 to index
    %c0_407 = arith.constant 0 : index
    %c0_408 = arith.constant 0 : index
    %651 = vector.load %arg11[%650, %c0_407, %c0_408] : memref<4x8x128xf32, #tpu.memory_space<vmem>>, vector<1x8x128xf32>
    %652 = vector.shape_cast %651 : vector<1x8x128xf32> to vector<8x128xf32>
    %653 = vector.shape_cast %649 : vector<8x128xf32> to vector<1x8x128xf32>
    tpu.vector_store %arg11[%650, %c0_407, %c0_408], %653 {strides = array<i32>} : memref<4x8x128xf32, #tpu.memory_space<vmem>>, vector<1x8x128xf32>,
    %c4_i32 = arith.constant 4 : i32
    return
  }
}

</mosaic_0001>

<bundles_post_ra>
// kernel: tpu_custom_call.1
= control target key start
LH: loop header
LB: loop body
LE: loop exit
PB: predicated region body
PF: predicated region fallthrough
CT: control target
= control target key end

     0   :  { %17 = vsyncpa [#allocation6], 0  ;;  %s12052_s0 = inlined_call_operand.vmem [shape: f32[4], index: 0, kind: input, shape index: {}]   ;;  %s12053_s1 = inlined_call_operand.<no memory space> [shape: f32[1], index: 1, kind: input, shape index: {}]   ;;  %s12054_s2 = inlined_call_operand.hbm [shape: f32[8,128], index: 2, kind: input, shape index: {}]   ;;  %s12055_s3 = inlined_call_operand.hbm [shape: f32[128,128], index: 3, kind: input, shape index: {}]   ;;  %s12056_s4 = inlined_call_operand.vmem [shape: f32[1,128], index: 4, kind: input, shape index: {}]   ;;  %s12057_s5 = inlined_call_operand.hbm [shape: f32[128,128], index: 5, kind: input, shape index: {}]   ;;  %s12058_s6 = inlined_call_operand.vmem [shape: f32[1,128], index: 6, kind: input, shape index: {}]   ;;  %s12059_s7 = inlined_call_operand.hbm [shape: f32[128,128], index: 7, kind: input, shape index: {}]   ;;  %s12060_s8 = inlined_call_operand.vmem [shape: f32[1,128], index: 8, kind: input, shape index: {}]   ;;  %s12061_s9 = inlined_call_operand.hbm [shape: f32[128,128], index: 9, kind: input, shape index: {}]   ;;  %s12062_s10 = inlined_call_operand.vmem [shape: f32[1,128], index: 10, kind: input, shape index: {}]   ;;  %s12063_s11 = inlined_call_operand.hbm [shape: f32[4,8,128], index: 11, kind: output, shape index: {}]  }
   0x1   :  { %18 = vsyncpa [#allocation4], 0 }
   0x2   :  { %19 = vsyncpa [#allocation9], 0 }
   0x3   :  { %20 = vsyncpa [#allocation12], 0 }
   0x4   :  { %21 = vsyncpa [#allocation5], 0  ;;  %s10274_s17 = smov [#allocation8]   ;;  %s10120_s21 = scalar_lea.hbm %s12055_s3, 2048 }
   0x5   :  { %s49_s18 = sshll.u32 %s10274_s17, 4  ;;  %p10121_p0 = scmp.ne.s32.totalorder %s12055_s3, %s10120_s21  ;;  %s50_s18 = int_to_ptr.vmem [resolvable:$true] %s49_s18 }
   0x6   :  { %p10124_p1 = scmp.lt.u32.totalorder %s10120_s21, %s12055_s3 }
   0x8   :  { %p10126_p2 = pnand %p10124_p1, %p10121_p0 }
   0xa   :  { %10129 = shalt.err (!%p10126_p2)
}
   0xb   :  { %s10130_s26 = scalar_lea.vmem %s50_s18, 2048  ;;  %p10135_p4 = scmp.lt.s32.totalorder %s50_s18, %s50_s18 }
   0xc   :  { %p10131_p3 = scmp.ne.s32.totalorder %s50_s18, %s10130_s26  ;;  %p10136_p5 = scmp.lt.s32.totalorder %s10130_s26, %s10130_s26 }
   0xe   :  { %p10137_p6 = por %p10136_p5, %p10135_p4 }
  0x10   :  { %p10138_p7 = pnand %p10137_p6, %p10131_p3 }
  0x12   :  { %10141 = shalt.err (!%p10138_p7)
}
  0x13   :  { %s10275_s27 = smov 128   ;;  %s10276_s28 = smov 8  }
  0x14   :  { %55 = dma.hbm_to_vmem [thread:$0]  %s12055_s3, 2048, %s50_s18, [#allocation9], %s10275_s27, %s10275_s27, %s10276_s28  }
  0x15   :  { %s10277_s12 = smov [#allocation11]   ;;  %s28_s16 = sshll.u32 %s12052_s0, 4  ;;  %s29_s16 = int_to_ptr.vmem [resolvable:$true] %s28_s16 }
  0x16   :  { %s77_s13 = sshll.u32 %s10277_s12, 4  ;;  %s10142_s20 = scalar_lea.hbm %s12059_s7, 2048  ;;  %s78_s13 = int_to_ptr.vmem [resolvable:$true] %s77_s13 }
  0x17   :  { %p10143_p8 = scmp.ne.s32.totalorder %s12059_s7, %s10142_s20  ;;  %p10146_p9 = scmp.lt.u32.totalorder %s10142_s20, %s12059_s7 }
  0x19   :  { %p10148_p10 = pnand %p10146_p9, %p10143_p8 }
  0x1b   :  { %10151 = shalt.err (!%p10148_p10)
}
  0x1c   :  { %s10152_s3 = scalar_lea.vmem %s78_s13, 2048  ;;  %p10157_p12 = scmp.lt.s32.totalorder %s78_s13, %s78_s13 }
  0x1d   :  { %p10153_p11 = scmp.ne.s32.totalorder %s78_s13, %s10152_s3  ;;  %p10158_p13 = scmp.lt.s32.totalorder %s10152_s3, %s10152_s3 }
  0x1f   :  { %p10159_p0 = por %p10158_p13, %p10157_p12 }
  0x21   :  { %p10160_p1 = pnand %p10159_p0, %p10153_p11 }
  0x23   :  { %10163 = shalt.err (!%p10160_p1)
}
  0x24   :  { %83 = dma.hbm_to_vmem [thread:$0]  %s12059_s7, 2048, %s78_s13, [#allocation12], %s10275_s27, %s10275_s27, %s10276_s28  }
  0x25   :  { %s10164_s25 = scalar_lea.vmem %s29_s16, 16  ;;  %p10169_p3 = scmp.lt.s32.totalorder %s29_s16, %s29_s16 }
  0x26   :  { %p10165_p2 = scmp.ne.s32.totalorder %s29_s16, %s10164_s25  ;;  %p10170_p4 = scmp.lt.s32.totalorder %s10164_s25, %s10164_s25 }
  0x28   :  { %p10171_p5 = por %p10170_p4, %p10169_p3 }
  0x2a   :  { %p10172_p6 = pnand %p10171_p5, %p10165_p2 }
  0x2c   :  { %10175 = shalt.err (!%p10172_p6)
}
  0x2d   :  { %s10278_s26 = smov [#allocation3]   ;;  %s10279_s29 = smov [#allocation7]  }
  0x2e   :  { %31 = dma.vmem_to_smem %s29_s16, 16, %s10278_s26, [#allocation6]  }
  0x2f   :  { %s40_s30 = sshll.u32 %s10279_s29, 4  ;;  %s10280_s12 = smov [#allocation10]   ;;  %s41_s30 = int_to_ptr.vmem [resolvable:$true] %s40_s30 }
  0x30   :  { %s63_s14 = sshll.u32 %s10280_s12, 4  ;;  %s10176_s19 = scalar_lea.hbm %s12054_s2, 128  ;;  %s64_s14 = int_to_ptr.vmem [resolvable:$true] %s63_s14 }
  0x31   :  { %p10177_p7 = scmp.ne.s32.totalorder %s12054_s2, %s10176_s19  ;;  %p10180_p8 = scmp.lt.u32.totalorder %s10176_s19, %s12054_s2 }
  0x33   :  { %p10182_p9 = pnand %p10180_p8, %p10177_p7 }
  0x35   :  { %10185 = shalt.err (!%p10182_p9)
}
  0x36   :  { %s10186_s16 = scalar_lea.vmem %s41_s30, 128  ;;  %p10191_p11 = scmp.lt.s32.totalorder %s41_s30, %s41_s30 }
  0x37   :  { %p10187_p10 = scmp.ne.s32.totalorder %s41_s30, %s10186_s16  ;;  %p10192_p12 = scmp.lt.s32.totalorder %s10186_s16, %s10186_s16 }
  0x39   :  { %p10193_p13 = por %p10192_p12, %p10191_p11 }
  0x3b   :  { %p10194_p0 = pnand %p10193_p13, %p10187_p10 }
  0x3d   :  { %10197 = shalt.err (!%p10194_p0)
}
  0x3e   :  { %43 = dma.hbm_to_vmem [thread:$0]  %s12054_s2, 128, %s41_s30, [#allocation4]  }
  0x3f   :  { %s10198_s0 = scalar_lea.hbm %s12057_s5, 2048 }
  0x40   :  { %p10199_p1 = scmp.ne.s32.totalorder %s12057_s5, %s10198_s0  ;;  %p10202_p2 = scmp.lt.u32.totalorder %s10198_s0, %s12057_s5 }
  0x42   :  { %p10204_p3 = pnand %p10202_p2, %p10199_p1 }
  0x44   :  { %10207 = shalt.err (!%p10204_p3)
}
  0x45   :  { %s10208_s12 = scalar_lea.vmem %s64_s14, 2048  ;;  %p10213_p5 = scmp.lt.s32.totalorder %s64_s14, %s64_s14 }
  0x46   :  { %p10209_p4 = scmp.ne.s32.totalorder %s64_s14, %s10208_s12  ;;  %p10214_p6 = scmp.lt.s32.totalorder %s10208_s12, %s10208_s12 }
  0x48   :  { %p10215_p7 = por %p10214_p6, %p10213_p5 }
  0x4a   :  { %p10216_p8 = pnand %p10215_p7, %p10209_p4 }
  0x4c   :  { %10219 = shalt.err (!%p10216_p8)
}
  0x4d   :  { %69 = dma.hbm_to_vmem [thread:$0]  %s12057_s5, 2048, %s64_s14, [#allocation9], %s10275_s27, %s10275_s27, %s10276_s28  }
  0x4e   :  { %s10281_s15 = smov [#allocation13]   ;;  %s10220_s7 = scalar_lea.hbm %s12061_s9, 2048 }
  0x4f   :  { %s91_s17 = sshll.u32 %s10281_s15, 4  ;;  %p10221_p9 = scmp.ne.s32.totalorder %s12061_s9, %s10220_s7  ;;  %s92_s17 = int_to_ptr.vmem [resolvable:$true] %s91_s17 }
  0x50   :  { %p10224_p10 = scmp.lt.u32.totalorder %s10220_s7, %s12061_s9 }
  0x52   :  { %p10226_p11 = pnand %p10224_p10, %p10221_p9 }
  0x54   :  { %10229 = shalt.err (!%p10226_p11)
}
  0x55   :  { %s10230_s23 = scalar_lea.vmem %s92_s17, 2048  ;;  %p10235_p13 = scmp.lt.s32.totalorder %s92_s17, %s92_s17 }
  0x56   :  { %p10231_p12 = scmp.ne.s32.totalorder %s92_s17, %s10230_s23  ;;  %p10236_p0 = scmp.lt.s32.totalorder %s10230_s23, %s10230_s23 }
  0x58   :  { %p10237_p1 = por %p10236_p0, %p10235_p13 }
  0x5a   :  { %p10238_p2 = pnand %p10237_p1, %p10231_p12 }
  0x5c   :  { %10241 = shalt.err (!%p10238_p2)
}
  0x5d   :  { %97 = dma.hbm_to_vmem [thread:$0]  %s12061_s9, 2048, %s92_s17, [#allocation12], %s10275_s27, %s10275_s27, %s10276_s28  }
  0x5e   :  { %10264 = dma.done.wait [#allocation6], 16  }
  0x5f   :  { %10265 = vsyncadd [#allocation6], 4294967280 }
  0x60   :  { %10266 = dma.done.wait [#allocation4], 128  }
  0x61   :  { %10267 = vsyncadd [#allocation4], 4294967168 }
  0x62   :  { %10268 = dma.done.wait [#allocation9], 4096  }
  0x63   :  { %10269 = vsyncadd [#allocation9], 4294963200 }
  0x64   :  { %10270 = dma.done.wait [#allocation12], 4096  }
  0x65   :  { %10271 = vsyncadd [#allocation12], 4294963200 }
  0x66   :  { %118 = sfence }
  0x67   :  { %v124_v0 = vld [vmem:[#allocation8] sm:$0xff]  ;;  %v125_v1 = vld [vmem:[#allocation8 + $0x8] sm:$0xff]  ;;  %v126_v2 = vld [vmem:[#allocation8 + $0x10] sm:$0xff]  ;;  %v10282_v3 = vmov 0.0|0.0   ;;  %vm10283_vm0 = vmmov 0   ;;  %v10284_v6 = vmov 0.0  }
  0x68   :  { %8564 = vmatprep.subr.bf16.mxu0 %v10282_v3  ;;  %v10422_v4 = vpack.c.bf16 %v125_v1, %v124_v0  ;;  %v127_v5 = vld [vmem:[#allocation8 + $0x18] sm:$0xff]  ;;  %6356 = vmatprep.mubr.msk.f32.mxu0 %vm10283_vm0, %v10284_v6  ;;  %v128_v8 = vld [vmem:[#allocation8 + $0x20] sm:$0xff]  ;;  %v129_v9 = vld [vmem:[#allocation8 + $0x28] sm:$0xff]  ;;  %s10623_s12 = sld [smem:[#allocation3]]  ;;  %s10981_s17 = sld [smem:[#allocation3 + $0x1]] }
  0x69   :  { %8588 = vmatprep.subr.bf16.mxu1 %v10282_v3  ;;  %6391 = vmatprep.mubr.msk.f32.mxu1 %vm10283_vm0, %v10284_v6  ;;  %v10430_v7 = vpack.c.bf16 %v127_v5, %v126_v2  ;;  %v218_v10 = vld [vmem:[#allocation10] sm:$0xff]  ;;  %v219_v11 = vld [vmem:[#allocation10 + $0x8] sm:$0xff]  ;;  %v220_v12 = vld [vmem:[#allocation10 + $0x10] sm:$0xff]  ;;  %v10434_v14 = vpack.c.bf16 %v129_v9, %v128_v8  ;;  %s11791_s15 = sld [smem:[#allocation3 + $0x3]]  ;;  %s10285_s21 = smov [#allocation14]  }
  0x6a   :  { %8566 = vmatpush3.bf16.msra.mxu0 %v10422_v4  ;;  %v221_v13 = vld [vmem:[#allocation10 + $0x18] sm:$0xff]  ;;  %v10436_v15 = vpack.c.bf16 %v219_v11, %v218_v10  ;;  %v130_v16 = vld [vmem:[#allocation8 + $0x30] sm:$0xff]  ;;  %v222_v19 = vld [vmem:[#allocation10 + $0x20] sm:$0xff]  ;;  %s5202_s16 = sshll.u32 %s10285_s21, 4  ;;  %s5203_s16 = int_to_ptr.vmem [resolvable:$true] %s5202_s16 }
  0x6b   :  { %8567 = vmatprep.subr.bf16.mxu0 %v10282_v3  ;;  %v131_v17 = vld [vmem:[#allocation8 + $0x38] sm:$0xff]  ;;  %v10440_v18 = vpack.c.bf16 %v221_v13, %v220_v12  ;;  %v223_v20 = vld [vmem:[#allocation10 + $0x28] sm:$0xff]  ;;  %v132_v22 = vld [vmem:[#allocation8 + $0x40] sm:$0xff]  ;;  %s10242_s22 = scalar_lea.vmem %s5203_s16, 512  ;;  %p10247_p4 = scmp.lt.s32.totalorder %s5203_s16, %s5203_s16 }
  0x6c   :  { %8590 = vmatpush3.bf16.msra.mxu1 %v10436_v15  ;;  %v10444_v21 = vpack.c.bf16 %v131_v17, %v130_v16  ;;  %v133_v23 = vld [vmem:[#allocation8 + $0x48] sm:$0xff]  ;;  %v10448_v24 = vpack.c.bf16 %v223_v20, %v222_v19  ;;  %v224_v25 = vld [vmem:[#allocation10 + $0x30] sm:$0xff]  ;;  %v225_v26 = vld [vmem:[#allocation10 + $0x38] sm:$0xff]  ;;  %p10243_p3 = scmp.ne.s32.totalorder %s5203_s16, %s10242_s22  ;;  %p10248_p5 = scmp.lt.s32.totalorder %s10242_s22, %s10242_s22 }
  0x6d   :  { %8591 = vmatprep.subr.bf16.mxu1 %v10282_v3  ;;  %v10452_v27 = vpack.c.bf16 %v133_v23, %v132_v22  ;;  %v134_v28 = vld [vmem:[#allocation8 + $0x50] sm:$0xff]  ;;  %v135_v29 = vld [vmem:[#allocation8 + $0x58] sm:$0xff]  ;;  %v10456_v30 = vpack.c.bf16 %v225_v26, %v224_v25  ;;  %v226_v31 = vld [vmem:[#allocation10 + $0x40] sm:$0xff] }
  0x6e   :  { %8569 = vmatpush3.bf16.msra.mxu0 %v10430_v7  ;;  %v227_v32 = vld [vmem:[#allocation10 + $0x48] sm:$0xff]  ;;  %v10460_v33 = vpack.c.bf16 %v135_v29, %v134_v28  ;;  %v136_v34 = vld [vmem:[#allocation8 + $0x60] sm:$0xff]  ;;  %v228_v37 = vld [vmem:[#allocation10 + $0x50] sm:$0xff]  ;;  %s122_s2 = smul.f32 0.5, %s10623_s12  ;;  %p10249_p6 = por %p10248_p5, %p10247_p4 }
  0x6f   :  { %8570 = vmatprep.subr.bf16.mxu0 %v10282_v3  ;;  %v137_v35 = vld [vmem:[#allocation8 + $0x68] sm:$0xff]  ;;  %v10464_v36 = vpack.c.bf16 %v227_v32, %v226_v31  ;;  %v229_v38 = vld [vmem:[#allocation10 + $0x58] sm:$0xff]  ;;  %v138_v40 = vld [vmem:[#allocation8 + $0x70] sm:$0xff]  ;;  %s1391_s19 = smul.f32 0.5, %s10981_s17 }
  0x70   :  { %8593 = vmatpush3.bf16.msra.mxu1 %v10440_v18  ;;  %v10468_v39 = vpack.c.bf16 %v137_v35, %v136_v34  ;;  %v139_v41 = vld [vmem:[#allocation8 + $0x78] sm:$0xff]  ;;  %v10472_v42 = vpack.c.bf16 %v229_v38, %v228_v37  ;;  %v230_v43 = vld [vmem:[#allocation10 + $0x60] sm:$0xff]  ;;  %v231_v44 = vld [vmem:[#allocation10 + $0x68] sm:$0xff]  ;;  %s1392_s14 = smul.f32 0.16666667, %s10981_s17  ;;  %p10250_p7 = pnand %p10249_p6, %p10243_p3 }
  0x71   :  { %8594 = vmatprep.subr.bf16.mxu1 %v10282_v3  ;;  %v10476_v45 = vpack.c.bf16 %v139_v41, %v138_v40  ;;  %v10480_v46 = vpack.c.bf16 %v231_v44, %v230_v43  ;;  %v10484_v47 = vld [vmem:[#allocation7] sm:$0xff]  ;;  %v232_v48 = vld [vmem:[#allocation10 + $0x70] sm:$0xff]  ;;  %v312_v51 = vld [vmem:[#allocation11] sm:$0xff] }
  0x72   :  { %8572 = vmatpush3.bf16.msra.mxu0 %v10434_v14  ;;  %v233_v49 = vld [vmem:[#allocation10 + $0x78] sm:$0xff]  ;;  %v313_v52 = vld [vmem:[#allocation11 + $0x8] sm:$0xff]  ;;  %v314_v53 = vld [vmem:[#allocation11 + $0x10] sm:$0xff] }
  0x73   :  { %8573 = vmatprep.subr.bf16.mxu0 %v10282_v3  ;;  %v10492_v50 = vpack.c.bf16 %v233_v49, %v232_v48  ;;  %v10496_v54 = vpack.c.bf16 %v313_v52, %v312_v51  ;;  %v315_v55 = vld [vmem:[#allocation11 + $0x18] sm:$0xff]  ;;  %v316_v57 = vld [vmem:[#allocation11 + $0x20] sm:$0xff]  ;;  %v317_v58 = vld [vmem:[#allocation11 + $0x28] sm:$0xff] }
  0x74   :  { %8596 = vmatpush3.bf16.msra.mxu1 %v10448_v24  ;;  %v10499_v56 = vpack.c.bf16 %v315_v55, %v314_v53  ;;  %v10503_v59 = vpack.c.bf16 %v317_v58, %v316_v57  ;;  %v318_v60 = vld [vmem:[#allocation11 + $0x30] sm:$0xff]  ;;  %v319_v61 = vld [vmem:[#allocation11 + $0x38] sm:$0xff]  ;;  %v320_v63 = vld [vmem:[#allocation11 + $0x40] sm:$0xff] }
  0x75   :  { %8597 = vmatprep.subr.bf16.mxu1 %v10282_v3  ;;  %v10507_v62 = vpack.c.bf16 %v319_v61, %v318_v60  ;;  %v321_v0 = vld [vmem:[#allocation11 + $0x48] sm:$0xff]  ;;  %v322_v2 = vld [vmem:[#allocation11 + $0x50] sm:$0xff]  ;;  %v323_v5 = vld [vmem:[#allocation11 + $0x58] sm:$0xff] }
  0x76   :  { %8575 = vmatpush3.bf16.msra.mxu0 %v10444_v21  ;;  %v10511_v1 = vpack.c.bf16 %v321_v0, %v320_v63  ;;  %v10515_v8 = vpack.c.bf16 %v323_v5, %v322_v2  ;;  %v324_v9 = vld [vmem:[#allocation11 + $0x60] sm:$0xff]  ;;  %v325_v10 = vld [vmem:[#allocation11 + $0x68] sm:$0xff]  ;;  %v10527_v12 = vld [vmem:[%s12056_s4] ss:$0 sm:$0xff] }
  0x77   :  { %8576 = vmatprep.subr.bf16.mxu0 %v10282_v3  ;;  %v10519_v11 = vpack.c.bf16 %v325_v10, %v324_v9  ;;  %v326_v20 = vld [vmem:[#allocation11 + $0x70] sm:$0xff]  ;;  %v327_v22 = vld [vmem:[#allocation11 + $0x78] sm:$0xff]  ;;  %v406_v25 = vld [vmem:[#allocation13] sm:$0xff] }
  0x78   :  { %8599 = vmatpush3.bf16.msra.mxu1 %v10456_v30  ;;  %v10532_v23 = vpack.c.bf16 %v327_v22, %v326_v20  ;;  %v407_v26 = vld [vmem:[#allocation13 + $0x8] sm:$0xff]  ;;  %v408_v28 = vld [vmem:[#allocation13 + $0x10] sm:$0xff]  ;;  %v409_v31 = vld [vmem:[#allocation13 + $0x18] sm:$0xff] }
  0x79   :  { %8600 = vmatprep.subr.bf16.mxu1 %v10282_v3  ;;  %v10536_v29 = vpack.c.bf16 %v407_v26, %v406_v25  ;;  %v10539_v32 = vpack.c.bf16 %v409_v31, %v408_v28  ;;  %v410_v34 = vld [vmem:[#allocation13 + $0x20] sm:$0xff]  ;;  %v411_v35 = vld [vmem:[#allocation13 + $0x28] sm:$0xff]  ;;  %v412_v38 = vld [vmem:[#allocation13 + $0x30] sm:$0xff] }
  0x7a   :  { %8578 = vmatpush3.bf16.msra.mxu0 %v10452_v27  ;;  %v10543_v37 = vpack.c.bf16 %v411_v35, %v410_v34  ;;  %v413_v40 = vld [vmem:[#allocation13 + $0x38] sm:$0xff]  ;;  %v414_v43 = vld [vmem:[#allocation13 + $0x40] sm:$0xff]  ;;  %v415_v44 = vld [vmem:[#allocation13 + $0x48] sm:$0xff]  ;;  %v10629_v35 = vstv %s12053_s1  ;;  %s123_s1 = smul.f32 0.16666667, %s10623_s12 }
  0x7b   :  { %8579 = vmatprep.subr.bf16.mxu0 %v10282_v3  ;;  %v10547_v41 = vpack.c.bf16 %v413_v40, %v412_v38  ;;  %v10551_v48 = vpack.c.bf16 %v415_v44, %v414_v43  ;;  %v416_v49 = vld [vmem:[#allocation13 + $0x50] sm:$0xff]  ;;  %v417_v51 = vld [vmem:[#allocation13 + $0x58] sm:$0xff]  ;;  %v418_v53 = vld [vmem:[#allocation13 + $0x60] sm:$0xff]  ;;  %v10632_v40 = vstv %s122_s2 }
  0x7c   :  { %8602 = vmatpush3.bf16.msra.mxu1 %v10464_v36  ;;  %v10555_v52 = vpack.c.bf16 %v417_v51, %v416_v49  ;;  %v419_v55 = vld [vmem:[#allocation13 + $0x68] sm:$0xff]  ;;  %v10567_v58 = vld [vmem:[%s12058_s6] ss:$0 sm:$0xff]  ;;  %v420_v2 = vld [vmem:[#allocation13 + $0x70] sm:$0xff] }
  0x7d   :  { %8603 = vmatprep.subr.bf16.mxu1 %v10282_v3  ;;  %v10559_v57 = vpack.c.bf16 %v419_v55, %v418_v53  ;;  %v421_v5 = vld [vmem:[#allocation13 + $0x78] sm:$0xff] }
  0x7e   :  { %8581 = vmatpush3.bf16.msra.mxu0 %v10460_v33  ;;  %v10588_v9 = vpack.c.bf16 %v421_v5, %v420_v2  ;;  %v10595_v10 = vld [vmem:[%s12060_s8] ss:$0 sm:$0xff] }
  0x7f   :  { %8582 = vmatprep.subr.bf16.mxu0 %v10282_v3  ;;  %v10619_v20 = vld [vmem:[%s12062_s10] ss:$0 sm:$0xff] }
  0x80   :  { %8605 = vmatpush3.bf16.msra.mxu1 %v10472_v42 }
  0x81   :  { %8606 = vmatprep.subr.bf16.mxu1 %v10282_v3 }
  0x82   :  { %8584 = vmatpush3.bf16.msra.mxu0 %v10468_v39 }
  0x83   :  { %8585 = vmatprep.subr.bf16.mxu0 %v10282_v3 }
  0x84   :  { %8608 = vmatpush3.bf16.msra.mxu1 %v10480_v46 }
  0x85   :  { %8609 = vmatprep.subr.bf16.mxu1 %v10282_v3 }
  0x86   :  { %8587 = vmatpush3.bf16.msra.mxu0 %v10476_v45 }
  0x87   :  { %8612 = vmatprep.subr.bf16.mxu0 %v10282_v3 }
  0x88   :  { %8611 = vmatpush3.bf16.msra.mxu1 %v10492_v50 }
  0x89   :  { %6357 = vmatmul.mubr.f32.vlgmr.msra.gmra.mrb[0].mxu0 %v10484_v47  ;;  %8636 = vmatprep.subr.bf16.mxu1 %v10282_v3 }
  0x8a   :  { %6426 = vmatprep.mubr.msk.f32.mxu0 %vm10283_vm0, %v10284_v6  ;;  %8614 = vmatpush3.bf16.msra.mxu0 %v10496_v54 }
  0x8b   :  { %8615 = vmatprep.subr.bf16.mxu0 %v10282_v3 }
  0x8e   :  { %8617 = vmatpush3.bf16.msra.mxu0 %v10499_v56 }
  0x8f   :  { %8618 = vmatprep.subr.bf16.mxu0 %v10282_v3 }
  0x92   :  { %8620 = vmatpush3.bf16.msra.mxu0 %v10503_v59 }
  0x93   :  { %8621 = vmatprep.subr.bf16.mxu0 %v10282_v3 }
  0x96   :  { %8623 = vmatpush3.bf16.msra.mxu0 %v10507_v62 }
  0x97   :  { %8624 = vmatprep.subr.bf16.mxu0 %v10282_v3 }
  0x9a   :  { %8626 = vmatpush3.bf16.msra.mxu0 %v10511_v1 }
  0x9b   :  { %8627 = vmatprep.subr.bf16.mxu0 %v10282_v3 }
  0x9e   :  { %8629 = vmatpush3.bf16.msra.mxu0 %v10515_v8 }
  0x9f   :  { %8630 = vmatprep.subr.bf16.mxu0 %v10282_v3 }
  0xa2   :  { %8632 = vmatpush3.bf16.msra.mxu0 %v10519_v11 }
  0xa3   :  { %8633 = vmatprep.subr.bf16.mxu0 %v10282_v3 }
  0xa6   :  { %8635 = vmatpush3.bf16.msra.mxu0 %v10532_v23 }
  0xa7   :  { %8660 = vmatprep.subr.bf16.mxu0 %v10282_v3 }
 0x15c   :  { %v213_v13 = vpop.f32.mrb[0].mxu0 }
 0x15d   :  { %v214_v16 = vadd.f32 %v10527_v12, %v213_v13  ;;  %v6358_v17 = vpop.f32.mrb[1].mxu0 }
 0x15f   :  { %v217_v19 = vmax.f32 %v214_v16, 0.0 }
 0x161   :  { %6392 = vmatmul.mubr.f32.vlgmr.msra.gmra.mrb[0].mxu1 %v217_v19 }
 0x162   :  { %6461 = vmatprep.mubr.msk.f32.mxu1 %vm10283_vm0, %v10284_v6  ;;  %8638 = vmatpush3.bf16.msra.mxu1 %v10536_v29 }
 0x163   :  { %8639 = vmatprep.subr.bf16.mxu1 %v10282_v3 }
 0x166   :  { %8641 = vmatpush3.bf16.msra.mxu1 %v10539_v32 }
 0x167   :  { %8642 = vmatprep.subr.bf16.mxu1 %v10282_v3 }
 0x16a   :  { %8644 = vmatpush3.bf16.msra.mxu1 %v10543_v37 }
 0x16b   :  { %8645 = vmatprep.subr.bf16.mxu1 %v10282_v3 }
 0x16e   :  { %8647 = vmatpush3.bf16.msra.mxu1 %v10547_v41 }
 0x16f   :  { %8648 = vmatprep.subr.bf16.mxu1 %v10282_v3 }
 0x172   :  { %8650 = vmatpush3.bf16.msra.mxu1 %v10551_v48 }
 0x173   :  { %8651 = vmatprep.subr.bf16.mxu1 %v10282_v3 }
 0x176   :  { %8653 = vmatpush3.bf16.msra.mxu1 %v10555_v52 }
 0x177   :  { %8654 = vmatprep.subr.bf16.mxu1 %v10282_v3 }
 0x17a   :  { %8656 = vmatpush3.bf16.msra.mxu1 %v10559_v57 }
 0x17b   :  { %8657 = vmatprep.subr.bf16.mxu1 %v10282_v3 }
 0x17e   :  { %8659 = vmatpush3.bf16.msra.mxu1 %v10588_v9 }
 0x17f   :  { %8684 = vmatprep.subr.bf16.mxu1 %v10282_v3 }
 0x234   :  { %v307_v60 = vpop.f32.mrb[0].mxu1 }
 0x235   :  { %v308_v61 = vadd.f32 %v10567_v58, %v307_v60  ;;  %v6393_v63 = vpop.f32.mrb[1].mxu1 }
 0x237   :  { %v311_v0 = vmax.f32 %v308_v61, 0.0 }
 0x239   :  { %6427 = vmatmul.mubr.f32.vlgmr.msra.gmra.mrb[2].mxu0 %v311_v0 }
 0x23a   :  { %8662 = vmatpush3.bf16.msra.mxu0 %v10422_v4  ;;  %6496 = vmatprep.mubr.msk.f32.mxu0 %vm10283_vm0, %v10284_v6 }
 0x23b   :  { %8663 = vmatprep.subr.bf16.mxu0 %v10282_v3 }
 0x23e   :  { %8665 = vmatpush3.bf16.msra.mxu0 %v10430_v7 }
 0x23f   :  { %8666 = vmatprep.subr.bf16.mxu0 %v10282_v3 }
 0x242   :  { %8668 = vmatpush3.bf16.msra.mxu0 %v10434_v14 }
 0x243   :  { %8669 = vmatprep.subr.bf16.mxu0 %v10282_v3 }
 0x246   :  { %8671 = vmatpush3.bf16.msra.mxu0 %v10444_v21 }
 0x247   :  { %8672 = vmatprep.subr.bf16.mxu0 %v10282_v3 }
 0x24a   :  { %8674 = vmatpush3.bf16.msra.mxu0 %v10452_v27 }
 0x24b   :  { %8675 = vmatprep.subr.bf16.mxu0 %v10282_v3 }
 0x24e   :  { %8677 = vmatpush3.bf16.msra.mxu0 %v10460_v33 }
 0x24f   :  { %8678 = vmatprep.subr.bf16.mxu0 %v10282_v3 }
 0x252   :  { %8680 = vmatpush3.bf16.msra.mxu0 %v10468_v39 }
 0x253   :  { %8681 = vmatprep.subr.bf16.mxu0 %v10282_v3 }
 0x256   :  { %8683 = vmatpush3.bf16.msra.mxu0 %v10476_v45 }
 0x257   :  { %8708 = vmatprep.subr.bf16.mxu0 %v10282_v3 }
 0x30c   :  { %v401_v13 = vpop.f32.mrb[2].mxu0 }
 0x30d   :  { %v402_v16 = vadd.f32 %v10595_v10, %v401_v13  ;;  %v6428_v17 = vpop.f32.mrb[3].mxu0 }
 0x30f   :  { %v405_v19 = vmax.f32 %v402_v16, 0.0 }
 0x311   :  { %6462 = vmatmul.mubr.f32.vlgmr.msra.gmra.mrb[2].mxu1 %v405_v19 }
 0x312   :  { %8686 = vmatpush3.bf16.msra.mxu1 %v10436_v15  ;;  %6531 = vmatprep.mubr.msk.f32.mxu1 %vm10283_vm0, %v10284_v6 }
 0x313   :  { %8687 = vmatprep.subr.bf16.mxu1 %v10282_v3 }
 0x316   :  { %8689 = vmatpush3.bf16.msra.mxu1 %v10440_v18 }
 0x317   :  { %8690 = vmatprep.subr.bf16.mxu1 %v10282_v3 }
 0x31a   :  { %8692 = vmatpush3.bf16.msra.mxu1 %v10448_v24 }
 0x31b   :  { %8693 = vmatprep.subr.bf16.mxu1 %v10282_v3 }
 0x31e   :  { %8695 = vmatpush3.bf16.msra.mxu1 %v10456_v30 }
 0x31f   :  { %8696 = vmatprep.subr.bf16.mxu1 %v10282_v3 }
 0x322   :  { %8698 = vmatpush3.bf16.msra.mxu1 %v10464_v36 }
 0x323   :  { %8699 = vmatprep.subr.bf16.mxu1 %v10282_v3 }
 0x326   :  { %8701 = vmatpush3.bf16.msra.mxu1 %v10472_v42 }
 0x327   :  { %8702 = vmatprep.subr.bf16.mxu1 %v10282_v3 }
 0x32a   :  { %8704 = vmatpush3.bf16.msra.mxu1 %v10480_v46 }
 0x32b   :  { %8705 = vmatprep.subr.bf16.mxu1 %v10282_v3 }
 0x32e   :  { %8707 = vmatpush3.bf16.msra.mxu1 %v10492_v50 }
 0x32f   :  { %8732 = vmatprep.subr.bf16.mxu1 %v10282_v3 }
 0x3e4   :  { %v495_v22 = vpop.f32.mrb[2].mxu1 }
 0x3e5   :  { %v496_v25 = vadd.f32 %v10619_v20, %v495_v22  ;;  %v6463_v26 = vpop.f32.mrb[3].mxu1 }
 0x3e7   :  { %v499_v28 = vmul.f32 %v496_v25, %v10484_v47 }
 0x3e9   :  { %500 = vadd.xlane.f32.xlu0 %v499_v28 }
 0x476   :  { %v501_v31 = vpop.xlane.xlu0 %500 }
 0x477   :  { %v502_v34 = vsub.f32 %v496_v25, %v501_v31 }
 0x479   :  { %v503_v38 = vmul.f32 %v502_v34, %v10484_v47 }
 0x47b   :  { %v10635_v43 = vmul.f32 %v10629_v35, %v503_v38 }
 0x47d   :  { %v507_v44 = vmul.f32 %v10632_v40, %v10635_v43 }
 0x47f   :  { %v10640_v49 = vadd.f32 %v507_v44, %v10484_v47 }
 0x481   :  { %6497 = vmatmul.mubr.f32.vlgmr.msra.gmra.mrb[4].mxu0 %v10640_v49 }
 0x482   :  { %8710 = vmatpush3.bf16.msra.mxu0 %v10496_v54  ;;  %6566 = vmatprep.mubr.msk.f32.mxu0 %vm10283_vm0, %v10284_v6 }
 0x483   :  { %8711 = vmatprep.subr.bf16.mxu0 %v10282_v3 }
 0x486   :  { %8713 = vmatpush3.bf16.msra.mxu0 %v10499_v56 }
 0x487   :  { %8714 = vmatprep.subr.bf16.mxu0 %v10282_v3 }
 0x48a   :  { %8716 = vmatpush3.bf16.msra.mxu0 %v10503_v59 }
 0x48b   :  { %8717 = vmatprep.subr.bf16.mxu0 %v10282_v3 }
 0x48e   :  { %8719 = vmatpush3.bf16.msra.mxu0 %v10507_v62 }
 0x48f   :  { %8720 = vmatprep.subr.bf16.mxu0 %v10282_v3 }
 0x492   :  { %8722 = vmatpush3.bf16.msra.mxu0 %v10511_v1 }
 0x493   :  { %8723 = vmatprep.subr.bf16.mxu0 %v10282_v3 }
 0x496   :  { %8725 = vmatpush3.bf16.msra.mxu0 %v10515_v8 }
 0x497   :  { %8726 = vmatprep.subr.bf16.mxu0 %v10282_v3 }
 0x49a   :  { %8728 = vmatpush3.bf16.msra.mxu0 %v10519_v11 }
 0x49b   :  { %8729 = vmatprep.subr.bf16.mxu0 %v10282_v3 }
 0x49e   :  { %8731 = vmatpush3.bf16.msra.mxu0 %v10532_v23 }
 0x49f   :  { %8756 = vmatprep.subr.bf16.mxu0 %v10282_v3 }
 0x554   :  { %v575_v51 = vpop.f32.mrb[4].mxu0 }
 0x555   :  { %v576_v53 = vadd.f32 %v10527_v12, %v575_v51  ;;  %v6498_v55 = vpop.f32.mrb[5].mxu0 }
 0x557   :  { %v579_v60 = vmax.f32 %v576_v53, 0.0 }
 0x559   :  { %6532 = vmatmul.mubr.f32.vlgmr.msra.gmra.mrb[4].mxu1 %v579_v60 }
 0x55a   :  { %8734 = vmatpush3.bf16.msra.mxu1 %v10536_v29  ;;  %6601 = vmatprep.mubr.msk.f32.mxu1 %vm10283_vm0, %v10284_v6 }
 0x55b   :  { %8735 = vmatprep.subr.bf16.mxu1 %v10282_v3 }
 0x55e   :  { %8737 = vmatpush3.bf16.msra.mxu1 %v10539_v32 }
 0x55f   :  { %8738 = vmatprep.subr.bf16.mxu1 %v10282_v3 }
 0x562   :  { %8740 = vmatpush3.bf16.msra.mxu1 %v10543_v37 }
 0x563   :  { %8741 = vmatprep.subr.bf16.mxu1 %v10282_v3 }
 0x566   :  { %8743 = vmatpush3.bf16.msra.mxu1 %v10547_v41 }
 0x567   :  { %8744 = vmatprep.subr.bf16.mxu1 %v10282_v3 }
 0x56a   :  { %8746 = vmatpush3.bf16.msra.mxu1 %v10551_v48 }
 0x56b   :  { %8747 = vmatprep.subr.bf16.mxu1 %v10282_v3 }
 0x56e   :  { %8749 = vmatpush3.bf16.msra.mxu1 %v10555_v52 }
 0x56f   :  { %8750 = vmatprep.subr.bf16.mxu1 %v10282_v3 }
 0x572   :  { %8752 = vmatpush3.bf16.msra.mxu1 %v10559_v57 }
 0x573   :  { %8753 = vmatprep.subr.bf16.mxu1 %v10282_v3 }
 0x576   :  { %8755 = vmatpush3.bf16.msra.mxu1 %v10588_v9 }
 0x577   :  { %8780 = vmatprep.subr.bf16.mxu1 %v10282_v3 }
 0x62c   :  { %v646_v61 = vpop.f32.mrb[4].mxu1 }
 0x62d   :  { %v647_v63 = vadd.f32 %v10567_v58, %v646_v61  ;;  %v6533_v0 = vpop.f32.mrb[5].mxu1 }
 0x62f   :  { %v650_v2 = vmax.f32 %v647_v63, 0.0 }
 0x631   :  { %6567 = vmatmul.mubr.f32.vlgmr.msra.gmra.mrb[6].mxu0 %v650_v2 }
 0x632   :  { %8758 = vmatpush3.bf16.msra.mxu0 %v10422_v4  ;;  %6636 = vmatprep.mubr.msk.f32.mxu0 %vm10283_vm0, %v10284_v6 }
 0x633   :  { %8759 = vmatprep.subr.bf16.mxu0 %v10282_v3 }
 0x636   :  { %8761 = vmatpush3.bf16.msra.mxu0 %v10430_v7 }
 0x637   :  { %8762 = vmatprep.subr.bf16.mxu0 %v10282_v3 }
 0x63a   :  { %8764 = vmatpush3.bf16.msra.mxu0 %v10434_v14 }
 0x63b   :  { %8765 = vmatprep.subr.bf16.mxu0 %v10282_v3 }
 0x63e   :  { %8767 = vmatpush3.bf16.msra.mxu0 %v10444_v21 }
 0x63f   :  { %8768 = vmatprep.subr.bf16.mxu0 %v10282_v3 }
 0x642   :  { %8770 = vmatpush3.bf16.msra.mxu0 %v10452_v27 }
 0x643   :  { %8771 = vmatprep.subr.bf16.mxu0 %v10282_v3 }
 0x646   :  { %8773 = vmatpush3.bf16.msra.mxu0 %v10460_v33 }
 0x647   :  { %8774 = vmatprep.subr.bf16.mxu0 %v10282_v3 }
 0x64a   :  { %8776 = vmatpush3.bf16.msra.mxu0 %v10468_v39 }
 0x64b   :  { %8777 = vmatprep.subr.bf16.mxu0 %v10282_v3 }
 0x64e   :  { %8779 = vmatpush3.bf16.msra.mxu0 %v10476_v45 }
 0x64f   :  { %8804 = vmatprep.subr.bf16.mxu0 %v10282_v3 }
 0x704   :  { %v717_v5 = vpop.f32.mrb[6].mxu0 }
 0x705   :  { %v718_v13 = vadd.f32 %v10595_v10, %v717_v5  ;;  %v6568_v16 = vpop.f32.mrb[7].mxu0 }
 0x707   :  { %v721_v17 = vmax.f32 %v718_v13, 0.0 }
 0x709   :  { %6602 = vmatmul.mubr.f32.vlgmr.msra.gmra.mrb[6].mxu1 %v721_v17 }
 0x70a   :  { %8782 = vmatpush3.bf16.msra.mxu1 %v10436_v15  ;;  %6671 = vmatprep.mubr.msk.f32.mxu1 %vm10283_vm0, %v10284_v6 }
 0x70b   :  { %8783 = vmatprep.subr.bf16.mxu1 %v10282_v3 }
 0x70e   :  { %8785 = vmatpush3.bf16.msra.mxu1 %v10440_v18 }
 0x70f   :  { %8786 = vmatprep.subr.bf16.mxu1 %v10282_v3 }
 0x712   :  { %8788 = vmatpush3.bf16.msra.mxu1 %v10448_v24 }
 0x713   :  { %8789 = vmatprep.subr.bf16.mxu1 %v10282_v3 }
 0x716   :  { %8791 = vmatpush3.bf16.msra.mxu1 %v10456_v30 }
 0x717   :  { %8792 = vmatprep.subr.bf16.mxu1 %v10282_v3 }
 0x71a   :  { %8794 = vmatpush3.bf16.msra.mxu1 %v10464_v36 }
 0x71b   :  { %8795 = vmatprep.subr.bf16.mxu1 %v10282_v3 }
 0x71e   :  { %8797 = vmatpush3.bf16.msra.mxu1 %v10472_v42 }
 0x71f   :  { %8798 = vmatprep.subr.bf16.mxu1 %v10282_v3 }
 0x722   :  { %8800 = vmatpush3.bf16.msra.mxu1 %v10480_v46 }
 0x723   :  { %8801 = vmatprep.subr.bf16.mxu1 %v10282_v3 }
 0x726   :  { %8803 = vmatpush3.bf16.msra.mxu1 %v10492_v50 }
 0x727   :  { %8828 = vmatprep.subr.bf16.mxu1 %v10282_v3 }
 0x7dc   :  { %v788_v19 = vpop.f32.mrb[6].mxu1 }
 0x7dd   :  { %v789_v22 = vadd.f32 %v10619_v20, %v788_v19  ;;  %v6603_v25 = vpop.f32.mrb[7].mxu1 }
 0x7df   :  { %v792_v26 = vmul.f32 %v789_v22, %v10640_v49 }
 0x7e1   :  { %793 = vadd.xlane.f32.xlu0 %v792_v26 }
 0x86e   :  { %v794_v28 = vpop.xlane.xlu0 %793 }
 0x86f   :  { %v795_v31 = vsub.f32 %v789_v22, %v794_v28 }
 0x871   :  { %v796_v34 = vmul.f32 %v795_v31, %v10640_v49 }
 0x873   :  { %v10722_v38 = vmul.f32 %v796_v34, %v10629_v35 }
 0x875   :  { %v798_v44 = vmul.f32 %v10722_v38, %v10632_v40  ;;  %v1381_v31 = vmul.f32 2.0, %v10722_v38 }
 0x877   :  { %v10727_v51 = vadd.f32 %v798_v44, %v10484_v47  ;;  %v1089_v44 = vstv %s10623_s12  ;;  %s11438_s12 = sld [smem:[#allocation3 + $0x2]] }
 0x879   :  { %6637 = vmatmul.mubr.f32.vlgmr.msra.gmra.mrb[8].mxu0 %v10727_v51 }
 0x87a   :  { %8806 = vmatpush3.bf16.msra.mxu0 %v10496_v54  ;;  %6706 = vmatprep.mubr.msk.f32.mxu0 %vm10283_vm0, %v10284_v6 }
 0x87b   :  { %8807 = vmatprep.subr.bf16.mxu0 %v10282_v3 }
 0x87d   :  { %s2660_s2 = smul.f32 0.5, %s11438_s12 }
 0x87e   :  { %8809 = vmatpush3.bf16.msra.mxu0 %v10499_v56  ;;  %s2661_s30 = smul.f32 0.16666667, %s11438_s12 }
 0x87f   :  { %8810 = vmatprep.subr.bf16.mxu0 %v10282_v3 }
 0x882   :  { %8812 = vmatpush3.bf16.msra.mxu0 %v10503_v59 }
 0x883   :  { %8813 = vmatprep.subr.bf16.mxu0 %v10282_v3 }
 0x886   :  { %8815 = vmatpush3.bf16.msra.mxu0 %v10507_v62 }
 0x887   :  { %8816 = vmatprep.subr.bf16.mxu0 %v10282_v3 }
 0x88a   :  { %8818 = vmatpush3.bf16.msra.mxu0 %v10511_v1 }
 0x88b   :  { %8819 = vmatprep.subr.bf16.mxu0 %v10282_v3 }
 0x88e   :  { %8821 = vmatpush3.bf16.msra.mxu0 %v10515_v8 }
 0x88f   :  { %8822 = vmatprep.subr.bf16.mxu0 %v10282_v3 }
 0x892   :  { %8824 = vmatpush3.bf16.msra.mxu0 %v10519_v11 }
 0x893   :  { %8825 = vmatprep.subr.bf16.mxu0 %v10282_v3 }
 0x896   :  { %8827 = vmatpush3.bf16.msra.mxu0 %v10532_v23 }
 0x897   :  { %8852 = vmatprep.subr.bf16.mxu0 %v10282_v3 }
 0x94c   :  { %v866_v40 = vpop.f32.mrb[8].mxu0 }
 0x94d   :  { %v867_v49 = vadd.f32 %v10527_v12, %v866_v40  ;;  %v6638_v53 = vpop.f32.mrb[9].mxu0 }
 0x94f   :  { %v870_v55 = vmax.f32 %v867_v49, 0.0  ;;  %v1382_v49 = vadd.f32 %v1381_v31, %v10635_v43 }
 0x951   :  { %6672 = vmatmul.mubr.f32.vlgmr.msra.gmra.mrb[8].mxu1 %v870_v55 }
 0x952   :  { %8830 = vmatpush3.bf16.msra.mxu1 %v10536_v29  ;;  %6741 = vmatprep.mubr.msk.f32.mxu1 %vm10283_vm0, %v10284_v6 }
 0x953   :  { %8831 = vmatprep.subr.bf16.mxu1 %v10282_v3 }
 0x956   :  { %8833 = vmatpush3.bf16.msra.mxu1 %v10539_v32 }
 0x957   :  { %8834 = vmatprep.subr.bf16.mxu1 %v10282_v3 }
 0x95a   :  { %8836 = vmatpush3.bf16.msra.mxu1 %v10543_v37 }
 0x95b   :  { %8837 = vmatprep.subr.bf16.mxu1 %v10282_v3 }
 0x95e   :  { %8839 = vmatpush3.bf16.msra.mxu1 %v10547_v41 }
 0x95f   :  { %8840 = vmatprep.subr.bf16.mxu1 %v10282_v3 }
 0x962   :  { %8842 = vmatpush3.bf16.msra.mxu1 %v10551_v48 }
 0x963   :  { %8843 = vmatprep.subr.bf16.mxu1 %v10282_v3 }
 0x966   :  { %8845 = vmatpush3.bf16.msra.mxu1 %v10555_v52 }
 0x967   :  { %8846 = vmatprep.subr.bf16.mxu1 %v10282_v3 }
 0x96a   :  { %8848 = vmatpush3.bf16.msra.mxu1 %v10559_v57 }
 0x96b   :  { %8849 = vmatprep.subr.bf16.mxu1 %v10282_v3 }
 0x96e   :  { %8851 = vmatpush3.bf16.msra.mxu1 %v10588_v9 }
 0x96f   :  { %8876 = vmatprep.subr.bf16.mxu1 %v10282_v3 }
 0xa24   :  { %v937_v60 = vpop.f32.mrb[8].mxu1 }
 0xa25   :  { %v938_v61 = vadd.f32 %v10567_v58, %v937_v60  ;;  %v6673_v63 = vpop.f32.mrb[9].mxu1 }
 0xa27   :  { %v941_v0 = vmax.f32 %v938_v61, 0.0 }
 0xa29   :  { %6707 = vmatmul.mubr.f32.vlgmr.msra.gmra.mrb[10].mxu0 %v941_v0 }
 0xa2a   :  { %8854 = vmatpush3.bf16.msra.mxu0 %v10422_v4  ;;  %6776 = vmatprep.mubr.msk.f32.mxu0 %vm10283_vm0, %v10284_v6 }
 0xa2b   :  { %8855 = vmatprep.subr.bf16.mxu0 %v10282_v3 }
 0xa2e   :  { %8857 = vmatpush3.bf16.msra.mxu0 %v10430_v7 }
 0xa2f   :  { %8858 = vmatprep.subr.bf16.mxu0 %v10282_v3 }
 0xa32   :  { %8860 = vmatpush3.bf16.msra.mxu0 %v10434_v14 }
 0xa33   :  { %8861 = vmatprep.subr.bf16.mxu0 %v10282_v3 }
 0xa36   :  { %8863 = vmatpush3.bf16.msra.mxu0 %v10444_v21 }
 0xa37   :  { %8864 = vmatprep.subr.bf16.mxu0 %v10282_v3 }
 0xa3a   :  { %8866 = vmatpush3.bf16.msra.mxu0 %v10452_v27 }
 0xa3b   :  { %8867 = vmatprep.subr.bf16.mxu0 %v10282_v3 }
 0xa3e   :  { %8869 = vmatpush3.bf16.msra.mxu0 %v10460_v33 }
 0xa3f   :  { %8870 = vmatprep.subr.bf16.mxu0 %v10282_v3 }
 0xa42   :  { %8872 = vmatpush3.bf16.msra.mxu0 %v10468_v39 }
 0xa43   :  { %8873 = vmatprep.subr.bf16.mxu0 %v10282_v3 }
 0xa46   :  { %8875 = vmatpush3.bf16.msra.mxu0 %v10476_v45 }
 0xa47   :  { %8900 = vmatprep.subr.bf16.mxu0 %v10282_v3 }
 0xafc   :  { %v1008_v2 = vpop.f32.mrb[10].mxu0 }
 0xafd   :  { %v1009_v5 = vadd.f32 %v10595_v10, %v1008_v2  ;;  %v6708_v13 = vpop.f32.mrb[11].mxu0 }
 0xaff   :  { %v1012_v16 = vmax.f32 %v1009_v5, 0.0 }
 0xb01   :  { %6742 = vmatmul.mubr.f32.vlgmr.msra.gmra.mrb[10].mxu1 %v1012_v16 }
 0xb02   :  { %8878 = vmatpush3.bf16.msra.mxu1 %v10436_v15  ;;  %6811 = vmatprep.mubr.msk.f32.mxu1 %vm10283_vm0, %v10284_v6 }
 0xb03   :  { %8879 = vmatprep.subr.bf16.mxu1 %v10282_v3 }
 0xb06   :  { %8881 = vmatpush3.bf16.msra.mxu1 %v10440_v18 }
 0xb07   :  { %8882 = vmatprep.subr.bf16.mxu1 %v10282_v3 }
 0xb0a   :  { %8884 = vmatpush3.bf16.msra.mxu1 %v10448_v24 }
 0xb0b   :  { %8885 = vmatprep.subr.bf16.mxu1 %v10282_v3 }
 0xb0e   :  { %8887 = vmatpush3.bf16.msra.mxu1 %v10456_v30 }
 0xb0f   :  { %8888 = vmatprep.subr.bf16.mxu1 %v10282_v3 }
 0xb12   :  { %8890 = vmatpush3.bf16.msra.mxu1 %v10464_v36 }
 0xb13   :  { %8891 = vmatprep.subr.bf16.mxu1 %v10282_v3 }
 0xb16   :  { %8893 = vmatpush3.bf16.msra.mxu1 %v10472_v42 }
 0xb17   :  { %8894 = vmatprep.subr.bf16.mxu1 %v10282_v3 }
 0xb1a   :  { %8896 = vmatpush3.bf16.msra.mxu1 %v10480_v46 }
 0xb1b   :  { %8897 = vmatprep.subr.bf16.mxu1 %v10282_v3 }
 0xb1e   :  { %8899 = vmatpush3.bf16.msra.mxu1 %v10492_v50 }
 0xb1f   :  { %8924 = vmatprep.subr.bf16.mxu1 %v10282_v3 }
 0xbd4   :  { %v1079_v17 = vpop.f32.mrb[10].mxu1 }
 0xbd5   :  { %v1080_v19 = vadd.f32 %v10619_v20, %v1079_v17  ;;  %v6743_v22 = vpop.f32.mrb[11].mxu1 }
 0xbd7   :  { %v1083_v25 = vmul.f32 %v1080_v19, %v10727_v51 }
 0xbd9   :  { %1084 = vadd.xlane.f32.xlu1 %v1083_v25 }
 0xc66   :  { %v1085_v26 = vpop.xlane.xlu1 %1084 }
 0xc67   :  { %v1086_v28 = vsub.f32 %v1080_v19, %v1085_v26 }
 0xc69   :  { %v1087_v34 = vmul.f32 %v1086_v28, %v10727_v51 }
 0xc6b   :  { %v1088_v40 = vmul.f32 %v1087_v34, %v10629_v35 }
 0xc6d   :  { %v1090_v53 = vmul.f32 %v1089_v44, %v1088_v40  ;;  %v1383_v55 = vmul.f32 2.0, %v1088_v40 }
 0xc6f   :  { %v10813_v60 = vadd.f32 %v1090_v53, %v10484_v47  ;;  %v10815_v61 = vadd.f32 %v1383_v55, %v1382_v49  ;;  %v1386_v53 = vstv %s123_s1  ;;  %s3929_s1 = smul.f32 0.5, %s11791_s15 }
 0xc71   :  { %6777 = vmatmul.mubr.f32.vlgmr.msra.gmra.mrb[12].mxu0 %v10813_v60 }
 0xc72   :  { %8902 = vmatpush3.bf16.msra.mxu0 %v10496_v54  ;;  %6846 = vmatprep.mubr.msk.f32.mxu0 %vm10283_vm0, %v10284_v6 }
 0xc73   :  { %8903 = vmatprep.subr.bf16.mxu0 %v10282_v3 }
 0xc76   :  { %8905 = vmatpush3.bf16.msra.mxu0 %v10499_v56 }
 0xc77   :  { %8906 = vmatprep.subr.bf16.mxu0 %v10282_v3 }
 0xc7a   :  { %8908 = vmatpush3.bf16.msra.mxu0 %v10503_v59 }
 0xc7b   :  { %8909 = vmatprep.subr.bf16.mxu0 %v10282_v3 }
 0xc7e   :  { %8911 = vmatpush3.bf16.msra.mxu0 %v10507_v62 }
 0xc7f   :  { %8912 = vmatprep.subr.bf16.mxu0 %v10282_v3 }
 0xc82   :  { %8914 = vmatpush3.bf16.msra.mxu0 %v10511_v1 }
 0xc83   :  { %8915 = vmatprep.subr.bf16.mxu0 %v10282_v3 }
 0xc86   :  { %8917 = vmatpush3.bf16.msra.mxu0 %v10515_v8 }
 0xc87   :  { %8918 = vmatprep.subr.bf16.mxu0 %v10282_v3 }
 0xc8a   :  { %8920 = vmatpush3.bf16.msra.mxu0 %v10519_v11 }
 0xc8b   :  { %8921 = vmatprep.subr.bf16.mxu0 %v10282_v3 }
 0xc8e   :  { %8923 = vmatpush3.bf16.msra.mxu0 %v10532_v23 }
 0xc8f   :  { %8948 = vmatprep.subr.bf16.mxu0 %v10282_v3 }
 0xd44   :  { %v1158_v43 = vpop.f32.mrb[12].mxu0 }
 0xd45   :  { %v1159_v38 = vadd.f32 %v10527_v12, %v1158_v43  ;;  %v6778_v51 = vpop.f32.mrb[13].mxu0 }
 0xd47   :  { %v1162_v63 = vmax.f32 %v1159_v38, 0.0 }
 0xd49   :  { %6812 = vmatmul.mubr.f32.vlgmr.msra.gmra.mrb[12].mxu1 %v1162_v63 }
 0xd4a   :  { %8926 = vmatpush3.bf16.msra.mxu1 %v10536_v29  ;;  %6881 = vmatprep.mubr.msk.f32.mxu1 %vm10283_vm0, %v10284_v6 }
 0xd4b   :  { %8927 = vmatprep.subr.bf16.mxu1 %v10282_v3 }
 0xd4e   :  { %8929 = vmatpush3.bf16.msra.mxu1 %v10539_v32 }
 0xd4f   :  { %8930 = vmatprep.subr.bf16.mxu1 %v10282_v3 }
 0xd52   :  { %8932 = vmatpush3.bf16.msra.mxu1 %v10543_v37 }
 0xd53   :  { %8933 = vmatprep.subr.bf16.mxu1 %v10282_v3 }
 0xd56   :  { %8935 = vmatpush3.bf16.msra.mxu1 %v10547_v41 }
 0xd57   :  { %8936 = vmatprep.subr.bf16.mxu1 %v10282_v3 }
 0xd5a   :  { %8938 = vmatpush3.bf16.msra.mxu1 %v10551_v48 }
 0xd5b   :  { %8939 = vmatprep.subr.bf16.mxu1 %v10282_v3 }
 0xd5e   :  { %8941 = vmatpush3.bf16.msra.mxu1 %v10555_v52 }
 0xd5f   :  { %8942 = vmatprep.subr.bf16.mxu1 %v10282_v3 }
 0xd62   :  { %8944 = vmatpush3.bf16.msra.mxu1 %v10559_v57 }
 0xd63   :  { %8945 = vmatprep.subr.bf16.mxu1 %v10282_v3 }
 0xd66   :  { %8947 = vmatpush3.bf16.msra.mxu1 %v10588_v9 }
 0xd67   :  { %8972 = vmatprep.subr.bf16.mxu1 %v10282_v3 }
 0xe1c   :  { %v1229_v0 = vpop.f32.mrb[12].mxu1 }
 0xe1d   :  { %v1230_v2 = vadd.f32 %v10567_v58, %v1229_v0  ;;  %v6813_v5 = vpop.f32.mrb[13].mxu1 }
 0xe1f   :  { %v1233_v13 = vmax.f32 %v1230_v2, 0.0 }
 0xe21   :  { %6847 = vmatmul.mubr.f32.vlgmr.msra.gmra.mrb[14].mxu0 %v1233_v13 }
 0xe22   :  { %8950 = vmatpush3.bf16.msra.mxu0 %v10422_v4  ;;  %6916 = vmatprep.mubr.msk.f32.mxu0 %vm10283_vm0, %v10284_v6 }
 0xe23   :  { %8951 = vmatprep.subr.bf16.mxu0 %v10282_v3 }
 0xe26   :  { %8953 = vmatpush3.bf16.msra.mxu0 %v10430_v7 }
 0xe27   :  { %8954 = vmatprep.subr.bf16.mxu0 %v10282_v3 }
 0xe2a   :  { %8956 = vmatpush3.bf16.msra.mxu0 %v10434_v14 }
 0xe2b   :  { %8957 = vmatprep.subr.bf16.mxu0 %v10282_v3 }
 0xe2e   :  { %8959 = vmatpush3.bf16.msra.mxu0 %v10444_v21 }
 0xe2f   :  { %8960 = vmatprep.subr.bf16.mxu0 %v10282_v3 }
 0xe32   :  { %8962 = vmatpush3.bf16.msra.mxu0 %v10452_v27 }
 0xe33   :  { %8963 = vmatprep.subr.bf16.mxu0 %v10282_v3 }
 0xe36   :  { %8965 = vmatpush3.bf16.msra.mxu0 %v10460_v33 }
 0xe37   :  { %8966 = vmatprep.subr.bf16.mxu0 %v10282_v3 }
 0xe3a   :  { %8968 = vmatpush3.bf16.msra.mxu0 %v10468_v39 }
 0xe3b   :  { %8969 = vmatprep.subr.bf16.mxu0 %v10282_v3 }
 0xe3e   :  { %8971 = vmatpush3.bf16.msra.mxu0 %v10476_v45 }
 0xe3f   :  { %8996 = vmatprep.subr.bf16.mxu0 %v10282_v3 }
 0xef4   :  { %v1300_v16 = vpop.f32.mrb[14].mxu0 }
 0xef5   :  { %v1301_v17 = vadd.f32 %v10595_v10, %v1300_v16  ;;  %v6848_v19 = vpop.f32.mrb[15].mxu0 }
 0xef7   :  { %v1304_v22 = vmax.f32 %v1301_v17, 0.0 }
 0xef9   :  { %6882 = vmatmul.mubr.f32.vlgmr.msra.gmra.mrb[14].mxu1 %v1304_v22 }
 0xefa   :  { %8974 = vmatpush3.bf16.msra.mxu1 %v10436_v15  ;;  %6951 = vmatprep.mubr.msk.f32.mxu1 %vm10283_vm0, %v10284_v6 }
 0xefb   :  { %8975 = vmatprep.subr.bf16.mxu1 %v10282_v3 }
 0xefe   :  { %8977 = vmatpush3.bf16.msra.mxu1 %v10440_v18 }
 0xeff   :  { %8978 = vmatprep.subr.bf16.mxu1 %v10282_v3 }
 0xf02   :  { %8980 = vmatpush3.bf16.msra.mxu1 %v10448_v24 }
 0xf03   :  { %8981 = vmatprep.subr.bf16.mxu1 %v10282_v3 }
 0xf06   :  { %8983 = vmatpush3.bf16.msra.mxu1 %v10456_v30 }
 0xf07   :  { %8984 = vmatprep.subr.bf16.mxu1 %v10282_v3 }
 0xf0a   :  { %8986 = vmatpush3.bf16.msra.mxu1 %v10464_v36 }
 0xf0b   :  { %8987 = vmatprep.subr.bf16.mxu1 %v10282_v3 }
 0xf0e   :  { %8989 = vmatpush3.bf16.msra.mxu1 %v10472_v42 }
 0xf0f   :  { %8990 = vmatprep.subr.bf16.mxu1 %v10282_v3 }
 0xf12   :  { %8992 = vmatpush3.bf16.msra.mxu1 %v10480_v46 }
 0xf13   :  { %8993 = vmatprep.subr.bf16.mxu1 %v10282_v3 }
 0xf16   :  { %8995 = vmatpush3.bf16.msra.mxu1 %v10492_v50 }
 0xf17   :  { %9020 = vmatprep.subr.bf16.mxu1 %v10282_v3 }
 0xfcc   :  { %v1371_v25 = vpop.f32.mrb[14].mxu1 }
 0xfcd   :  { %v1372_v26 = vadd.f32 %v10619_v20, %v1371_v25  ;;  %v6883_v28 = vpop.f32.mrb[15].mxu1 }
 0xfcf   :  { %v1375_v31 = vmul.f32 %v1372_v26, %v10813_v60 }
 0xfd1   :  { %1376 = vadd.xlane.f32.xlu1 %v1375_v31 }
0x105e   :  { %v1377_v34 = vpop.xlane.xlu1 %1376 }
0x105f   :  { %v1378_v44 = vsub.f32 %v1372_v26, %v1377_v34 }
0x1061   :  { %v1379_v40 = vmul.f32 %v1378_v44, %v10813_v60  ;;  %v10985_v44 = vstv %s1391_s19 }
0x1063   :  { %v1380_v49 = vmul.f32 %v1379_v40, %v10629_v35 }
0x1065   :  { %v1385_v55 = vadd.f32 %v10815_v61, %v1380_v49 }
0x1067   :  { %v1387_v43 = vmul.f32 %v1386_v53, %v1385_v55 }
0x1069   :  { %v10900_v38 = vadd.f32 %v1387_v43, %v10484_v47  ;;  %v11017_v43 = vld [vmem:[%s12056_s4] ss:$0 sm:$0xff] }
0x106b   :  { %1389 = vst [vmem:[#allocation14] sm:$0xff] %v10900_v38  ;;  %6917 = vmatmul.mubr.f32.vlgmr.msra.gmra.mrb[16].mxu0 %v10900_v38 }
0x106c   :  { %8998 = vmatpush3.bf16.msra.mxu0 %v10496_v54  ;;  %6986 = vmatprep.mubr.msk.f32.mxu0 %vm10283_vm0, %v10284_v6 }
0x106d   :  { %8999 = vmatprep.subr.bf16.mxu0 %v10282_v3 }
0x1070   :  { %9001 = vmatpush3.bf16.msra.mxu0 %v10499_v56 }
0x1071   :  { %9002 = vmatprep.subr.bf16.mxu0 %v10282_v3 }
0x1074   :  { %9004 = vmatpush3.bf16.msra.mxu0 %v10503_v59 }
0x1075   :  { %9005 = vmatprep.subr.bf16.mxu0 %v10282_v3 }
0x1078   :  { %9007 = vmatpush3.bf16.msra.mxu0 %v10507_v62 }
0x1079   :  { %9008 = vmatprep.subr.bf16.mxu0 %v10282_v3 }
0x107c   :  { %9010 = vmatpush3.bf16.msra.mxu0 %v10511_v1 }
0x107d   :  { %9011 = vmatprep.subr.bf16.mxu0 %v10282_v3 }
0x1080   :  { %9013 = vmatpush3.bf16.msra.mxu0 %v10515_v8 }
0x1081   :  { %9014 = vmatprep.subr.bf16.mxu0 %v10282_v3 }
0x1084   :  { %9016 = vmatpush3.bf16.msra.mxu0 %v10519_v11 }
0x1085   :  { %9017 = vmatprep.subr.bf16.mxu0 %v10282_v3 }
0x1088   :  { %9019 = vmatpush3.bf16.msra.mxu0 %v10532_v23 }
0x1089   :  { %9044 = vmatprep.subr.bf16.mxu0 %v10282_v3 }
0x113e   :  { %v1482_v47 = vpop.f32.mrb[16].mxu0 }
0x113f   :  { %v1483_v60 = vadd.f32 %v10527_v12, %v1482_v47  ;;  %v6918_v61 = vpop.f32.mrb[17].mxu0 }
0x1141   :  { %v1486_v51 = vmax.f32 %v1483_v60, 0.0 }
0x1143   :  { %6952 = vmatmul.mubr.f32.vlgmr.msra.gmra.mrb[16].mxu1 %v1486_v51 }
0x1144   :  { %9022 = vmatpush3.bf16.msra.mxu1 %v10536_v29  ;;  %7021 = vmatprep.mubr.msk.f32.mxu1 %vm10283_vm0, %v10284_v6 }
0x1145   :  { %9023 = vmatprep.subr.bf16.mxu1 %v10282_v3 }
0x1148   :  { %9025 = vmatpush3.bf16.msra.mxu1 %v10539_v32 }
0x1149   :  { %9026 = vmatprep.subr.bf16.mxu1 %v10282_v3 }
0x114c   :  { %9028 = vmatpush3.bf16.msra.mxu1 %v10543_v37 }
0x114d   :  { %9029 = vmatprep.subr.bf16.mxu1 %v10282_v3 }
0x1150   :  { %9031 = vmatpush3.bf16.msra.mxu1 %v10547_v41 }
0x1151   :  { %9032 = vmatprep.subr.bf16.mxu1 %v10282_v3 }
0x1154   :  { %9034 = vmatpush3.bf16.msra.mxu1 %v10551_v48 }
0x1155   :  { %9035 = vmatprep.subr.bf16.mxu1 %v10282_v3 }
0x1158   :  { %9037 = vmatpush3.bf16.msra.mxu1 %v10555_v52 }
0x1159   :  { %9038 = vmatprep.subr.bf16.mxu1 %v10282_v3 }
0x115c   :  { %9040 = vmatpush3.bf16.msra.mxu1 %v10559_v57 }
0x115d   :  { %9041 = vmatprep.subr.bf16.mxu1 %v10282_v3 }
0x1160   :  { %9043 = vmatpush3.bf16.msra.mxu1 %v10588_v9 }
0x1161   :  { %9068 = vmatprep.subr.bf16.mxu1 %v10282_v3 }
0x1216   :  { %v1576_v12 = vpop.f32.mrb[16].mxu1 }
0x1217   :  { %v1577_v63 = vadd.f32 %v10567_v58, %v1576_v12  ;;  %v6953_v0 = vpop.f32.mrb[17].mxu1 }
0x1219   :  { %v1580_v2 = vmax.f32 %v1577_v63, 0.0 }
0x121b   :  { %6987 = vmatmul.mubr.f32.vlgmr.msra.gmra.mrb[18].mxu0 %v1580_v2 }
0x121c   :  { %9046 = vmatpush3.bf16.msra.mxu0 %v10422_v4  ;;  %7056 = vmatprep.mubr.msk.f32.mxu0 %vm10283_vm0, %v10284_v6 }
0x121d   :  { %9047 = vmatprep.subr.bf16.mxu0 %v10282_v3 }
0x1220   :  { %9049 = vmatpush3.bf16.msra.mxu0 %v10430_v7 }
0x1221   :  { %9050 = vmatprep.subr.bf16.mxu0 %v10282_v3 }
0x1224   :  { %9052 = vmatpush3.bf16.msra.mxu0 %v10434_v14 }
0x1225   :  { %9053 = vmatprep.subr.bf16.mxu0 %v10282_v3 }
0x1228   :  { %9055 = vmatpush3.bf16.msra.mxu0 %v10444_v21 }
0x1229   :  { %9056 = vmatprep.subr.bf16.mxu0 %v10282_v3 }
0x122c   :  { %9058 = vmatpush3.bf16.msra.mxu0 %v10452_v27 }
0x122d   :  { %9059 = vmatprep.subr.bf16.mxu0 %v10282_v3 }
0x1230   :  { %9061 = vmatpush3.bf16.msra.mxu0 %v10460_v33 }
0x1231   :  { %9062 = vmatprep.subr.bf16.mxu0 %v10282_v3 }
0x1234   :  { %9064 = vmatpush3.bf16.msra.mxu0 %v10468_v39 }
0x1235   :  { %9065 = vmatprep.subr.bf16.mxu0 %v10282_v3 }
0x1238   :  { %9067 = vmatpush3.bf16.msra.mxu0 %v10476_v45 }
0x1239   :  { %9092 = vmatprep.subr.bf16.mxu0 %v10282_v3 }
0x12ee   :  { %v1670_v5 = vpop.f32.mrb[18].mxu0 }
0x12ef   :  { %v1671_v13 = vadd.f32 %v10595_v10, %v1670_v5  ;;  %v6988_v16 = vpop.f32.mrb[19].mxu0 }
0x12f1   :  { %v1674_v17 = vmax.f32 %v1671_v13, 0.0 }
0x12f3   :  { %7022 = vmatmul.mubr.f32.vlgmr.msra.gmra.mrb[18].mxu1 %v1674_v17 }
0x12f4   :  { %9070 = vmatpush3.bf16.msra.mxu1 %v10436_v15  ;;  %7091 = vmatprep.mubr.msk.f32.mxu1 %vm10283_vm0, %v10284_v6 }
0x12f5   :  { %9071 = vmatprep.subr.bf16.mxu1 %v10282_v3 }
0x12f8   :  { %9073 = vmatpush3.bf16.msra.mxu1 %v10440_v18 }
0x12f9   :  { %9074 = vmatprep.subr.bf16.mxu1 %v10282_v3 }
0x12fc   :  { %9076 = vmatpush3.bf16.msra.mxu1 %v10448_v24 }
0x12fd   :  { %9077 = vmatprep.subr.bf16.mxu1 %v10282_v3 }
0x1300   :  { %9079 = vmatpush3.bf16.msra.mxu1 %v10456_v30 }
0x1301   :  { %9080 = vmatprep.subr.bf16.mxu1 %v10282_v3 }
0x1304   :  { %9082 = vmatpush3.bf16.msra.mxu1 %v10464_v36 }
0x1305   :  { %9083 = vmatprep.subr.bf16.mxu1 %v10282_v3 }
0x1308   :  { %9085 = vmatpush3.bf16.msra.mxu1 %v10472_v42 }
0x1309   :  { %9086 = vmatprep.subr.bf16.mxu1 %v10282_v3 }
0x130c   :  { %9088 = vmatpush3.bf16.msra.mxu1 %v10480_v46 }
0x130d   :  { %9089 = vmatprep.subr.bf16.mxu1 %v10282_v3 }
0x1310   :  { %9091 = vmatpush3.bf16.msra.mxu1 %v10492_v50 }
0x1311   :  { %9116 = vmatprep.subr.bf16.mxu1 %v10282_v3 }
0x13c6   :  { %v1764_v19 = vpop.f32.mrb[18].mxu1 }
0x13c7   :  { %v1765_v22 = vadd.f32 %v10619_v20, %v1764_v19  ;;  %v7023_v25 = vpop.f32.mrb[19].mxu1 }
0x13c9   :  { %v1768_v26 = vmul.f32 %v1765_v22, %v10900_v38 }
0x13cb   :  { %1769 = vadd.xlane.f32.xlu0 %v1768_v26 }
0x1458   :  { %v1770_v28 = vpop.xlane.xlu0 %1769 }
0x1459   :  { %v1771_v31 = vsub.f32 %v1765_v22, %v1770_v28 }
0x145b   :  { %v1772_v34 = vmul.f32 %v1771_v31, %v10900_v38 }
0x145d   :  { %v10988_v40 = vmul.f32 %v1772_v34, %v10629_v35 }
0x145f   :  { %v1775_v49 = vmul.f32 %v10985_v44, %v10988_v40 }
0x1461   :  { %v10993_v53 = vadd.f32 %v1775_v49, %v10900_v38 }
0x1463   :  { %7057 = vmatmul.mubr.f32.vlgmr.msra.gmra.mrb[20].mxu0 %v10993_v53 }
0x1464   :  { %9094 = vmatpush3.bf16.msra.mxu0 %v10496_v54  ;;  %7126 = vmatprep.mubr.msk.f32.mxu0 %vm10283_vm0, %v10284_v6 }
0x1465   :  { %9095 = vmatprep.subr.bf16.mxu0 %v10282_v3 }
0x1468   :  { %9097 = vmatpush3.bf16.msra.mxu0 %v10499_v56 }
0x1469   :  { %9098 = vmatprep.subr.bf16.mxu0 %v10282_v3 }
0x146c   :  { %9100 = vmatpush3.bf16.msra.mxu0 %v10503_v59 }
0x146d   :  { %9101 = vmatprep.subr.bf16.mxu0 %v10282_v3 }
0x1470   :  { %9103 = vmatpush3.bf16.msra.mxu0 %v10507_v62 }
0x1471   :  { %9104 = vmatprep.subr.bf16.mxu0 %v10282_v3 }
0x1474   :  { %9106 = vmatpush3.bf16.msra.mxu0 %v10511_v1 }
0x1475   :  { %9107 = vmatprep.subr.bf16.mxu0 %v10282_v3 }
0x1478   :  { %9109 = vmatpush3.bf16.msra.mxu0 %v10515_v8 }
0x1479   :  { %9110 = vmatprep.subr.bf16.mxu0 %v10282_v3 }
0x147c   :  { %9112 = vmatpush3.bf16.msra.mxu0 %v10519_v11 }
0x147d   :  { %9113 = vmatprep.subr.bf16.mxu0 %v10282_v3 }
0x1480   :  { %9115 = vmatpush3.bf16.msra.mxu0 %v10532_v23 }
0x1481   :  { %9140 = vmatprep.subr.bf16.mxu0 %v10282_v3 }
0x1536   :  { %v1843_v55 = vpop.f32.mrb[20].mxu0 }
0x1537   :  { %v1844_v47 = vadd.f32 %v11017_v43, %v1843_v55  ;;  %v7058_v60 = vpop.f32.mrb[21].mxu0 }
0x1539   :  { %v1847_v61 = vmax.f32 %v1844_v47, 0.0  ;;  %v11128_v47 = vld [vmem:[%s12058_s6] ss:$0 sm:$0xff] }
0x153b   :  { %7092 = vmatmul.mubr.f32.vlgmr.msra.gmra.mrb[20].mxu1 %v1847_v61 }
0x153c   :  { %9118 = vmatpush3.bf16.msra.mxu1 %v10536_v29  ;;  %7161 = vmatprep.mubr.msk.f32.mxu1 %vm10283_vm0, %v10284_v6 }
0x153d   :  { %9119 = vmatprep.subr.bf16.mxu1 %v10282_v3 }
0x1540   :  { %9121 = vmatpush3.bf16.msra.mxu1 %v10539_v32 }
0x1541   :  { %9122 = vmatprep.subr.bf16.mxu1 %v10282_v3 }
0x1544   :  { %9124 = vmatpush3.bf16.msra.mxu1 %v10543_v37 }
0x1545   :  { %9125 = vmatprep.subr.bf16.mxu1 %v10282_v3 }
0x1548   :  { %9127 = vmatpush3.bf16.msra.mxu1 %v10547_v41 }
0x1549   :  { %9128 = vmatprep.subr.bf16.mxu1 %v10282_v3 }
0x154c   :  { %9130 = vmatpush3.bf16.msra.mxu1 %v10551_v48 }
0x154d   :  { %9131 = vmatprep.subr.bf16.mxu1 %v10282_v3 }
0x1550   :  { %9133 = vmatpush3.bf16.msra.mxu1 %v10555_v52 }
0x1551   :  { %9134 = vmatprep.subr.bf16.mxu1 %v10282_v3 }
0x1554   :  { %9136 = vmatpush3.bf16.msra.mxu1 %v10559_v57 }
0x1555   :  { %9137 = vmatprep.subr.bf16.mxu1 %v10282_v3 }
0x1558   :  { %9139 = vmatpush3.bf16.msra.mxu1 %v10588_v9 }
0x1559   :  { %9164 = vmatprep.subr.bf16.mxu1 %v10282_v3 }
0x160e   :  { %v1914_v51 = vpop.f32.mrb[20].mxu1 }
0x160f   :  { %v1915_v12 = vadd.f32 %v10567_v58, %v1914_v51  ;;  %v7093_v63 = vpop.f32.mrb[21].mxu1 }
0x1611   :  { %v1918_v0 = vmax.f32 %v1915_v12, 0.0 }
0x1613   :  { %7127 = vmatmul.mubr.f32.vlgmr.msra.gmra.mrb[22].mxu0 %v1918_v0 }
0x1614   :  { %9142 = vmatpush3.bf16.msra.mxu0 %v10422_v4  ;;  %7196 = vmatprep.mubr.msk.f32.mxu0 %vm10283_vm0, %v10284_v6 }
0x1615   :  { %9143 = vmatprep.subr.bf16.mxu0 %v10282_v3 }
0x1618   :  { %9145 = vmatpush3.bf16.msra.mxu0 %v10430_v7 }
0x1619   :  { %9146 = vmatprep.subr.bf16.mxu0 %v10282_v3 }
0x161c   :  { %9148 = vmatpush3.bf16.msra.mxu0 %v10434_v14 }
0x161d   :  { %9149 = vmatprep.subr.bf16.mxu0 %v10282_v3 }
0x1620   :  { %9151 = vmatpush3.bf16.msra.mxu0 %v10444_v21 }
0x1621   :  { %9152 = vmatprep.subr.bf16.mxu0 %v10282_v3 }
0x1624   :  { %9154 = vmatpush3.bf16.msra.mxu0 %v10452_v27 }
0x1625   :  { %9155 = vmatprep.subr.bf16.mxu0 %v10282_v3 }
0x1628   :  { %9157 = vmatpush3.bf16.msra.mxu0 %v10460_v33 }
0x1629   :  { %9158 = vmatprep.subr.bf16.mxu0 %v10282_v3 }
0x162c   :  { %9160 = vmatpush3.bf16.msra.mxu0 %v10468_v39 }
0x162d   :  { %9161 = vmatprep.subr.bf16.mxu0 %v10282_v3 }
0x1630   :  { %9163 = vmatpush3.bf16.msra.mxu0 %v10476_v45 }
0x1631   :  { %9188 = vmatprep.subr.bf16.mxu0 %v10282_v3 }
0x16e6   :  { %v1985_v58 = vpop.f32.mrb[22].mxu0 }
0x16e7   :  { %v1986_v2 = vadd.f32 %v10595_v10, %v1985_v58  ;;  %v7128_v5 = vpop.f32.mrb[23].mxu0 }
0x16e8   :  { %v2666_v5 = vld [vmem:[#allocation8 + $0x20] sm:$0xff] }
0x16e9   :  { %v1989_v13 = vmax.f32 %v1986_v2, 0.0 }
0x16eb   :  { %7162 = vmatmul.mubr.f32.vlgmr.msra.gmra.mrb[22].mxu1 %v1989_v13  ;;  %v2667_v13 = vld [vmem:[#allocation8 + $0x28] sm:$0xff] }
0x16ec   :  { %9166 = vmatpush3.bf16.msra.mxu1 %v10436_v15  ;;  %7231 = vmatprep.mubr.msk.f32.mxu1 %vm10283_vm0, %v10284_v6 }
0x16ed   :  { %9167 = vmatprep.subr.bf16.mxu1 %v10282_v3 }
0x16f0   :  { %9169 = vmatpush3.bf16.msra.mxu1 %v10440_v18 }
0x16f1   :  { %9170 = vmatprep.subr.bf16.mxu1 %v10282_v3 }
0x16f4   :  { %9172 = vmatpush3.bf16.msra.mxu1 %v10448_v24 }
0x16f5   :  { %9173 = vmatprep.subr.bf16.mxu1 %v10282_v3 }
0x16f8   :  { %9175 = vmatpush3.bf16.msra.mxu1 %v10456_v30 }
0x16f9   :  { %9176 = vmatprep.subr.bf16.mxu1 %v10282_v3 }
0x16fc   :  { %9178 = vmatpush3.bf16.msra.mxu1 %v10464_v36 }
0x16fd   :  { %9179 = vmatprep.subr.bf16.mxu1 %v10282_v3 }
0x1700   :  { %9181 = vmatpush3.bf16.msra.mxu1 %v10472_v42 }
0x1701   :  { %9182 = vmatprep.subr.bf16.mxu1 %v10282_v3 }
0x1704   :  { %9184 = vmatpush3.bf16.msra.mxu1 %v10480_v46 }
0x1705   :  { %9185 = vmatprep.subr.bf16.mxu1 %v10282_v3 }
0x1708   :  { %9187 = vmatpush3.bf16.msra.mxu1 %v10492_v50 }
0x1709   :  { %9212 = vmatprep.subr.bf16.mxu1 %v10282_v3 }
0x17be   :  { %v2056_v10 = vpop.f32.mrb[22].mxu1 }
0x17bf   :  { %v2057_v16 = vadd.f32 %v10619_v20, %v2056_v10  ;;  %v7163_v17 = vpop.f32.mrb[23].mxu1  ;;  %v11241_v10 = vpack.c.bf16 %v2667_v13, %v2666_v5  ;;  %v2854_v13 = vld [vmem:[#allocation11 + $0x20] sm:$0xff] }
0x17c0   :  { %v2669_v17 = vld [vmem:[#allocation8 + $0x38] sm:$0xff] }
0x17c1   :  { %v2060_v19 = vmul.f32 %v2057_v16, %v10993_v53 }
0x17c3   :  { %2061 = vadd.xlane.f32.xlu1 %v2060_v19 }
0x1850   :  { %v2062_v22 = vpop.xlane.xlu1 %2061 }
0x1851   :  { %v2063_v25 = vsub.f32 %v2057_v16, %v2062_v22  ;;  %v2668_v16 = vld [vmem:[#allocation8 + $0x30] sm:$0xff]  ;;  %v2670_v22 = vld [vmem:[#allocation8 + $0x40] sm:$0xff] }
0x1852   :  { %v11245_v19 = vpack.c.bf16 %v2669_v17, %v2668_v16  ;;  %v2855_v16 = vld [vmem:[#allocation11 + $0x28] sm:$0xff] }
0x1853   :  { %v2064_v26 = vmul.f32 %v2063_v25, %v10993_v53  ;;  %v2671_v25 = vld [vmem:[#allocation8 + $0x48] sm:$0xff]  ;;  %v11318_v17 = vpack.c.bf16 %v2855_v16, %v2854_v13 }
0x1854   :  { %v2957_v13 = vld [vmem:[#allocation13 + $0x68] sm:$0xff] }
0x1855   :  { %v11080_v28 = vmul.f32 %v2064_v26, %v10629_v35  ;;  %v11249_v26 = vpack.c.bf16 %v2671_v25, %v2670_v22  ;;  %v2856_v22 = vld [vmem:[#allocation11 + $0x30] sm:$0xff]  ;;  %v2857_v25 = vld [vmem:[#allocation11 + $0x38] sm:$0xff] }
0x1857   :  { %v2066_v31 = vmul.f32 %v11080_v28, %v10985_v44 }
0x1859   :  { %v11085_v34 = vadd.f32 %v2066_v31, %v10900_v38 }
0x185b   :  { %7197 = vmatmul.mubr.f32.vlgmr.msra.gmra.mrb[24].mxu0 %v11085_v34 }
0x185c   :  { %9190 = vmatpush3.bf16.msra.mxu0 %v10496_v54  ;;  %7266 = vmatprep.mubr.msk.f32.mxu0 %vm10283_vm0, %v10284_v6 }
0x185d   :  { %9191 = vmatprep.subr.bf16.mxu0 %v10282_v3 }
0x1860   :  { %9193 = vmatpush3.bf16.msra.mxu0 %v10499_v56 }
0x1861   :  { %9194 = vmatprep.subr.bf16.mxu0 %v10282_v3 }
0x1864   :  { %9196 = vmatpush3.bf16.msra.mxu0 %v10503_v59 }
0x1865   :  { %9197 = vmatprep.subr.bf16.mxu0 %v10282_v3 }
0x1868   :  { %9199 = vmatpush3.bf16.msra.mxu0 %v10507_v62 }
0x1869   :  { %9200 = vmatprep.subr.bf16.mxu0 %v10282_v3 }
0x186c   :  { %9202 = vmatpush3.bf16.msra.mxu0 %v10511_v1 }
0x186d   :  { %9203 = vmatprep.subr.bf16.mxu0 %v10282_v3 }
0x1870   :  { %9205 = vmatpush3.bf16.msra.mxu0 %v10515_v8 }
0x1871   :  { %9206 = vmatprep.subr.bf16.mxu0 %v10282_v3 }
0x1874   :  { %9208 = vmatpush3.bf16.msra.mxu0 %v10519_v11 }
0x1875   :  { %9209 = vmatprep.subr.bf16.mxu0 %v10282_v3 }
0x1878   :  { %9211 = vmatpush3.bf16.msra.mxu0 %v10532_v23 }
0x1879   :  { %9236 = vmatprep.subr.bf16.mxu0 %v10282_v3 }
0x192e   :  { %v2134_v20 = vpop.f32.mrb[24].mxu0 }
0x192f   :  { %v2135_v44 = vadd.f32 %v11017_v43, %v2134_v20  ;;  %v7198_v49 = vpop.f32.mrb[25].mxu0 }
0x1930   :  { %v2673_v49 = vld [vmem:[#allocation8 + $0x58] sm:$0xff] }
0x1931   :  { %v2138_v53 = vmax.f32 %v2135_v44, 0.0  ;;  %v2672_v44 = vld [vmem:[#allocation8 + $0x50] sm:$0xff] }
0x1933   :  { %7232 = vmatmul.mubr.f32.vlgmr.msra.gmra.mrb[24].mxu1 %v2138_v53  ;;  %v11256_v53 = vpack.c.bf16 %v2673_v49, %v2672_v44  ;;  %v2860_v44 = vld [vmem:[#allocation11 + $0x50] sm:$0xff]  ;;  %v2861_v49 = vld [vmem:[#allocation11 + $0x58] sm:$0xff] }
0x1934   :  { %9214 = vmatpush3.bf16.msra.mxu1 %v10536_v29  ;;  %7301 = vmatprep.mubr.msk.f32.mxu1 %vm10283_vm0, %v10284_v6 }
0x1935   :  { %9215 = vmatprep.subr.bf16.mxu1 %v10282_v3 }
0x1938   :  { %9217 = vmatpush3.bf16.msra.mxu1 %v10539_v32 }
0x1939   :  { %9218 = vmatprep.subr.bf16.mxu1 %v10282_v3 }
0x193c   :  { %9220 = vmatpush3.bf16.msra.mxu1 %v10543_v37 }
0x193d   :  { %9221 = vmatprep.subr.bf16.mxu1 %v10282_v3 }
0x1940   :  { %9223 = vmatpush3.bf16.msra.mxu1 %v10547_v41 }
0x1941   :  { %9224 = vmatprep.subr.bf16.mxu1 %v10282_v3 }
0x1944   :  { %9226 = vmatpush3.bf16.msra.mxu1 %v10551_v48 }
0x1945   :  { %9227 = vmatprep.subr.bf16.mxu1 %v10282_v3 }
0x1948   :  { %9229 = vmatpush3.bf16.msra.mxu1 %v10555_v52 }
0x1949   :  { %9230 = vmatprep.subr.bf16.mxu1 %v10282_v3 }
0x194c   :  { %9232 = vmatpush3.bf16.msra.mxu1 %v10559_v57 }
0x194d   :  { %9233 = vmatprep.subr.bf16.mxu1 %v10282_v3 }
0x1950   :  { %9235 = vmatpush3.bf16.msra.mxu1 %v10588_v9 }
0x1951   :  { %9260 = vmatprep.subr.bf16.mxu1 %v10282_v3 }
0x1a06   :  { %v2205_v55 = vpop.f32.mrb[24].mxu1 }
0x1a07   :  { %v2206_v60 = vadd.f32 %v11128_v47, %v2205_v55  ;;  %v7233_v61 = vpop.f32.mrb[25].mxu1  ;;  %v2674_v55 = vld [vmem:[#allocation8 + $0x60] sm:$0xff] }
0x1a08   :  { %v2676_v61 = vld [vmem:[#allocation8 + $0x70] sm:$0xff] }
0x1a09   :  { %v2209_v51 = vmax.f32 %v2206_v60, 0.0 }
0x1a0b   :  { %7267 = vmatmul.mubr.f32.vlgmr.msra.gmra.mrb[26].mxu0 %v2209_v51  ;;  %v2677_v51 = vld [vmem:[#allocation8 + $0x78] sm:$0xff] }
0x1a0c   :  { %9238 = vmatpush3.bf16.msra.mxu0 %v10422_v4  ;;  %7336 = vmatprep.mubr.msk.f32.mxu0 %vm10283_vm0, %v10284_v6 }
0x1a0d   :  { %9239 = vmatprep.subr.bf16.mxu0 %v10282_v3 }
0x1a10   :  { %9241 = vmatpush3.bf16.msra.mxu0 %v10430_v7  ;;  %v11152_v7 = vld [vmem:[%s12060_s8] ss:$0 sm:$0xff] }
0x1a11   :  { %9242 = vmatprep.subr.bf16.mxu0 %v10282_v3 }
0x1a14   :  { %9244 = vmatpush3.bf16.msra.mxu0 %v10434_v14 }
0x1a15   :  { %9245 = vmatprep.subr.bf16.mxu0 %v10282_v3 }
0x1a18   :  { %9247 = vmatpush3.bf16.msra.mxu0 %v10444_v21 }
0x1a19   :  { %9248 = vmatprep.subr.bf16.mxu0 %v10282_v3 }
0x1a1c   :  { %9250 = vmatpush3.bf16.msra.mxu0 %v10452_v27 }
0x1a1d   :  { %9251 = vmatprep.subr.bf16.mxu0 %v10282_v3 }
0x1a20   :  { %9253 = vmatpush3.bf16.msra.mxu0 %v10460_v33 }
0x1a21   :  { %9254 = vmatprep.subr.bf16.mxu0 %v10282_v3 }
0x1a24   :  { %9256 = vmatpush3.bf16.msra.mxu0 %v10468_v39 }
0x1a25   :  { %9257 = vmatprep.subr.bf16.mxu0 %v10282_v3 }
0x1a28   :  { %9259 = vmatpush3.bf16.msra.mxu0 %v10476_v45 }
0x1a29   :  { %9284 = vmatprep.subr.bf16.mxu0 %v10282_v3 }
0x1ade   :  { %v2276_v4 = vpop.f32.mrb[26].mxu0 }
0x1adf   :  { %v2277_v14 = vadd.f32 %v11152_v7, %v2276_v4  ;;  %v7268_v21 = vpop.f32.mrb[27].mxu0  ;;  %v11264_v4 = vpack.c.bf16 %v2677_v51, %v2676_v61  ;;  %v2863_v61 = vld [vmem:[#allocation11 + $0x68] sm:$0xff] }
0x1ae0   :  { %v2758_v21 = vld [vmem:[#allocation10 + $0x10] sm:$0xff] }
0x1ae1   :  { %v2280_v27 = vmax.f32 %v2277_v14, 0.0  ;;  %v2757_v14 = vld [vmem:[#allocation10 + $0x8] sm:$0xff] }
0x1ae3   :  { %7302 = vmatmul.mubr.f32.vlgmr.msra.gmra.mrb[26].mxu1 %v2280_v27 }
0x1ae4   :  { %9262 = vmatpush3.bf16.msra.mxu1 %v10436_v15  ;;  %7371 = vmatprep.mubr.msk.f32.mxu1 %vm10283_vm0, %v10284_v6 }
0x1ae5   :  { %9263 = vmatprep.subr.bf16.mxu1 %v10282_v3 }
0x1ae8   :  { %9265 = vmatpush3.bf16.msra.mxu1 %v10440_v18  ;;  %v11176_v18 = vld [vmem:[%s12062_s10] ss:$0 sm:$0xff] }
0x1ae9   :  { %9266 = vmatprep.subr.bf16.mxu1 %v10282_v3 }
0x1aec   :  { %9268 = vmatpush3.bf16.msra.mxu1 %v10448_v24 }
0x1aed   :  { %9269 = vmatprep.subr.bf16.mxu1 %v10282_v3 }
0x1af0   :  { %9271 = vmatpush3.bf16.msra.mxu1 %v10456_v30 }
0x1af1   :  { %9272 = vmatprep.subr.bf16.mxu1 %v10282_v3 }
0x1af4   :  { %9274 = vmatpush3.bf16.msra.mxu1 %v10464_v36 }
0x1af5   :  { %9275 = vmatprep.subr.bf16.mxu1 %v10282_v3 }
0x1af8   :  { %9277 = vmatpush3.bf16.msra.mxu1 %v10472_v42  ;;  %v2649_v42 = vmul.f32 2.0, %v11080_v28 }
0x1af9   :  { %9278 = vmatprep.subr.bf16.mxu1 %v10282_v3 }
0x1afa   :  { %v2650_v12 = vadd.f32 %v2649_v42, %v10988_v40  ;;  %v2665_v40 = vld [vmem:[#allocation8 + $0x18] sm:$0xff] }
0x1afc   :  { %9280 = vmatpush3.bf16.msra.mxu1 %v10480_v46  ;;  %v2357_v46 = vstv %s10981_s17 }
0x1afd   :  { %9281 = vmatprep.subr.bf16.mxu1 %v10282_v3 }
0x1b00   :  { %9283 = vmatpush3.bf16.msra.mxu1 %v10492_v50 }
0x1b01   :  { %9308 = vmatprep.subr.bf16.mxu1 %v10282_v3 }
0x1bb6   :  { %v2347_v15 = vpop.f32.mrb[26].mxu1 }
0x1bb7   :  { %v2348_v24 = vadd.f32 %v11176_v18, %v2347_v15  ;;  %v7303_v30 = vpop.f32.mrb[27].mxu1  ;;  %v2759_v15 = vld [vmem:[#allocation10 + $0x18] sm:$0xff] }
0x1bb8   :  { %v2761_v30 = vld [vmem:[#allocation10 + $0x28] sm:$0xff] }
0x1bb9   :  { %v2351_v33 = vmul.f32 %v2348_v24, %v11085_v34 }
0x1bbb   :  { %2352 = vadd.xlane.f32.xlu0 %v2351_v33 }
0x1c48   :  { %v2353_v36 = vpop.xlane.xlu0 %2352 }
0x1c49   :  { %v2354_v39 = vsub.f32 %v2348_v24, %v2353_v36  ;;  %v2760_v24 = vld [vmem:[#allocation10 + $0x20] sm:$0xff]  ;;  %v2762_v36 = vld [vmem:[#allocation10 + $0x30] sm:$0xff] }
0x1c4a   :  { %v11275_v33 = vpack.c.bf16 %v2761_v30, %v2760_v24  ;;  %v2864_v30 = vld [vmem:[#allocation11 + $0x70] sm:$0xff] }
0x1c4b   :  { %v2355_v45 = vmul.f32 %v2354_v39, %v11085_v34  ;;  %v2763_v39 = vld [vmem:[#allocation10 + $0x38] sm:$0xff] }
0x1c4c   :  { %v11279_v42 = vpack.c.bf16 %v2763_v39, %v2762_v36  ;;  %v2865_v36 = vld [vmem:[#allocation11 + $0x78] sm:$0xff] }
0x1c4d   :  { %v2356_v50 = vmul.f32 %v2355_v45, %v10629_v35  ;;  %v2764_v45 = vld [vmem:[#allocation10 + $0x40] sm:$0xff]  ;;  %v11347_v39 = vpack.c.bf16 %v2865_v36, %v2864_v30  ;;  %v11434_v36 = vld [vmem:[%s12062_s10] ss:$0 sm:$0xff] }
0x1c4f   :  { %v2358_v63 = vmul.f32 %v2357_v46, %v2356_v50  ;;  %v2651_v0 = vmul.f32 2.0, %v2356_v50  ;;  %v2765_v46 = vld [vmem:[#allocation10 + $0x48] sm:$0xff] }
0x1c50   :  { %v11283_v50 = vpack.c.bf16 %v2765_v46, %v2764_v45  ;;  %v2944_v45 = vld [vmem:[#allocation13] sm:$0xff]  ;;  %v2945_v46 = vld [vmem:[#allocation13 + $0x8] sm:$0xff] }
0x1c51   :  { %v11186_v58 = vadd.f32 %v2358_v63, %v10900_v38  ;;  %v11188_v2 = vadd.f32 %v2651_v0, %v2650_v12  ;;  %v2766_v12 = vld [vmem:[#allocation10 + $0x50] sm:$0xff]  ;;  %v2767_v63 = vld [vmem:[#allocation10 + $0x58] sm:$0xff] }
0x1c52   :  { %v11287_v0 = vpack.c.bf16 %v2767_v63, %v2766_v12  ;;  %v2946_v12 = vld [vmem:[#allocation13 + $0x10] sm:$0xff]  ;;  %v11351_v63 = vpack.c.bf16 %v2945_v46, %v2944_v45 }
0x1c53   :  { %7337 = vmatmul.mubr.f32.vlgmr.msra.gmra.mrb[28].mxu0 %v11186_v58 }
0x1c54   :  { %9286 = vmatpush3.bf16.msra.mxu0 %v10496_v54  ;;  %7406 = vmatprep.mubr.msk.f32.mxu0 %vm10283_vm0, %v10284_v6 }
0x1c55   :  { %9287 = vmatprep.subr.bf16.mxu0 %v10282_v3 }
0x1c58   :  { %9289 = vmatpush3.bf16.msra.mxu0 %v10499_v56 }
0x1c59   :  { %9290 = vmatprep.subr.bf16.mxu0 %v10282_v3 }
0x1c5c   :  { %9292 = vmatpush3.bf16.msra.mxu0 %v10503_v59 }
0x1c5d   :  { %9293 = vmatprep.subr.bf16.mxu0 %v10282_v3 }
0x1c60   :  { %9295 = vmatpush3.bf16.msra.mxu0 %v10507_v62 }
0x1c61   :  { %9296 = vmatprep.subr.bf16.mxu0 %v10282_v3 }
0x1c64   :  { %9298 = vmatpush3.bf16.msra.mxu0 %v10511_v1 }
0x1c65   :  { %9299 = vmatprep.subr.bf16.mxu0 %v10282_v3 }
0x1c68   :  { %9301 = vmatpush3.bf16.msra.mxu0 %v10515_v8 }
0x1c69   :  { %9302 = vmatprep.subr.bf16.mxu0 %v10282_v3 }
0x1c6c   :  { %9304 = vmatpush3.bf16.msra.mxu0 %v10519_v11 }
0x1c6d   :  { %9305 = vmatprep.subr.bf16.mxu0 %v10282_v3 }
0x1c70   :  { %9307 = vmatpush3.bf16.msra.mxu0 %v10532_v23 }
0x1c71   :  { %9332 = vmatprep.subr.bf16.mxu0 %v10282_v3 }
0x1d26   :  { %v2426_v54 = vpop.f32.mrb[28].mxu0 }
0x1d27   :  { %v2427_v56 = vadd.f32 %v11017_v43, %v2426_v54  ;;  %v7338_v59 = vpop.f32.mrb[29].mxu0  ;;  %v2768_v54 = vld [vmem:[#allocation10 + $0x60] sm:$0xff] }
0x1d29   :  { %v2430_v62 = vmax.f32 %v2427_v56, 0.0  ;;  %v2769_v56 = vld [vmem:[#allocation10 + $0x68] sm:$0xff] }
0x1d2a   :  { %v11291_v59 = vpack.c.bf16 %v2769_v56, %v2768_v54  ;;  %v2947_v54 = vld [vmem:[#allocation13 + $0x18] sm:$0xff] }
0x1d2b   :  { %7372 = vmatmul.mubr.f32.vlgmr.msra.gmra.mrb[28].mxu1 %v2430_v62  ;;  %v11354_v56 = vpack.c.bf16 %v2947_v54, %v2946_v12 }
0x1d2c   :  { %9310 = vmatpush3.bf16.msra.mxu1 %v10536_v29  ;;  %7441 = vmatprep.mubr.msk.f32.mxu1 %vm10283_vm0, %v10284_v6 }
0x1d2d   :  { %9311 = vmatprep.subr.bf16.mxu1 %v10282_v3 }
0x1d30   :  { %9313 = vmatpush3.bf16.msra.mxu1 %v10539_v32 }
0x1d31   :  { %9314 = vmatprep.subr.bf16.mxu1 %v10282_v3 }
0x1d34   :  { %9316 = vmatpush3.bf16.msra.mxu1 %v10543_v37 }
0x1d35   :  { %9317 = vmatprep.subr.bf16.mxu1 %v10282_v3 }
0x1d38   :  { %9319 = vmatpush3.bf16.msra.mxu1 %v10547_v41 }
0x1d39   :  { %9320 = vmatprep.subr.bf16.mxu1 %v10282_v3 }
0x1d3c   :  { %9322 = vmatpush3.bf16.msra.mxu1 %v10551_v48  ;;  %v2662_v48 = vld [vmem:[#allocation8] sm:$0xff] }
0x1d3d   :  { %9323 = vmatprep.subr.bf16.mxu1 %v10282_v3 }
0x1d40   :  { %9325 = vmatpush3.bf16.msra.mxu1 %v10555_v52  ;;  %v2663_v52 = vld [vmem:[#allocation8 + $0x8] sm:$0xff] }
0x1d41   :  { %9326 = vmatprep.subr.bf16.mxu1 %v10282_v3 }
0x1d44   :  { %9328 = vmatpush3.bf16.msra.mxu1 %v10559_v57  ;;  %v2664_v57 = vld [vmem:[#allocation8 + $0x10] sm:$0xff] }
0x1d45   :  { %9329 = vmatprep.subr.bf16.mxu1 %v10282_v3  ;;  %v11237_v43 = vpack.c.bf16 %v2665_v40, %v2664_v57  ;;  %v2852_v57 = vld [vmem:[#allocation11 + $0x10] sm:$0xff]  ;;  %v2853_v40 = vld [vmem:[#allocation11 + $0x18] sm:$0xff] }
0x1d46   :  { %v11314_v5 = vpack.c.bf16 %v2853_v40, %v2852_v57  ;;  %v2956_v40 = vld [vmem:[#allocation13 + $0x60] sm:$0xff] }
0x1d47   :  { %v11374_v16 = vpack.c.bf16 %v2957_v13, %v2956_v40 }
0x1d48   :  { %9331 = vmatpush3.bf16.msra.mxu1 %v10588_v9  ;;  %v11234_v9 = vpack.c.bf16 %v2663_v52, %v2662_v48  ;;  %v2771_v48 = vld [vmem:[#allocation10 + $0x78] sm:$0xff] }
0x1d49   :  { %9356 = vmatprep.subr.bf16.mxu1 %v10282_v3 }
0x1dfe   :  { %v2497_v1 = vpop.f32.mrb[28].mxu1 }
0x1dff   :  { %v2498_v8 = vadd.f32 %v11128_v47, %v2497_v1  ;;  %v7373_v11 = vpop.f32.mrb[29].mxu1  ;;  %v2675_v47 = vld [vmem:[#allocation8 + $0x68] sm:$0xff] }
0x1e00   :  { %v11260_v60 = vpack.c.bf16 %v2675_v47, %v2674_v55  ;;  %v11330_v55 = vpack.c.bf16 %v2861_v49, %v2860_v44  ;;  %v2862_v47 = vld [vmem:[#allocation11 + $0x60] sm:$0xff]  ;;  %v2958_v49 = vld [vmem:[#allocation13 + $0x70] sm:$0xff] }
0x1e01   :  { %v2501_v23 = vmax.f32 %v2498_v8, 0.0  ;;  %v11334_v51 = vpack.c.bf16 %v2863_v61, %v2862_v47  ;;  %v2959_v47 = vld [vmem:[#allocation13 + $0x78] sm:$0xff] }
0x1e02   :  { %v11403_v61 = vpack.c.bf16 %v2959_v47, %v2958_v49 }
0x1e03   :  { %7407 = vmatmul.mubr.f32.vlgmr.msra.gmra.mrb[30].mxu0 %v2501_v23  ;;  %v2654_v23 = vstv %s1392_s14 }
0x1e04   :  { %7476 = vmatprep.mubr.msk.f32.mxu0 %vm10283_vm0, %v10284_v6  ;;  %9334 = vmatpush3.bf16.msra.mxu0 %v11234_v9 }
0x1e05   :  { %9335 = vmatprep.subr.bf16.mxu0 %v10282_v3 }
0x1e08   :  { %9337 = vmatpush3.bf16.msra.mxu0 %v11237_v43 }
0x1e09   :  { %9338 = vmatprep.subr.bf16.mxu0 %v10282_v3 }
0x1e0c   :  { %9340 = vmatpush3.bf16.msra.mxu0 %v11241_v10 }
0x1e0d   :  { %9341 = vmatprep.subr.bf16.mxu0 %v10282_v3 }
0x1e10   :  { %9343 = vmatpush3.bf16.msra.mxu0 %v11245_v19 }
0x1e11   :  { %9344 = vmatprep.subr.bf16.mxu0 %v10282_v3 }
0x1e14   :  { %9346 = vmatpush3.bf16.msra.mxu0 %v11249_v26 }
0x1e15   :  { %9347 = vmatprep.subr.bf16.mxu0 %v10282_v3 }
0x1e18   :  { %9349 = vmatpush3.bf16.msra.mxu0 %v11256_v53 }
0x1e19   :  { %9350 = vmatprep.subr.bf16.mxu0 %v10282_v3 }
0x1e1c   :  { %9352 = vmatpush3.bf16.msra.mxu0 %v11260_v60 }
0x1e1d   :  { %9353 = vmatprep.subr.bf16.mxu0 %v10282_v3 }
0x1e20   :  { %9355 = vmatpush3.bf16.msra.mxu0 %v11264_v4 }
0x1e21   :  { %9380 = vmatprep.subr.bf16.mxu0 %v10282_v3 }
0x1ed6   :  { %v2568_v29 = vpop.f32.mrb[30].mxu0 }
0x1ed7   :  { %v2569_v32 = vadd.f32 %v11152_v7, %v2568_v29  ;;  %v7408_v37 = vpop.f32.mrb[31].mxu0  ;;  %v2756_v7 = vld [vmem:[#allocation10] sm:$0xff] }
0x1ed8   :  { %v11268_v27 = vpack.c.bf16 %v2757_v14, %v2756_v7  ;;  %v11342_v7 = vld [vmem:[%s12056_s4] ss:$0 sm:$0xff] }
0x1ed9   :  { %v2572_v41 = vmax.f32 %v2569_v32, 0.0 }
0x1edb   :  { %7442 = vmatmul.mubr.f32.vlgmr.msra.gmra.mrb[30].mxu1 %v2572_v41  ;;  %v2770_v41 = vld [vmem:[#allocation10 + $0x70] sm:$0xff] }
0x1edc   :  { %7511 = vmatprep.mubr.msk.f32.mxu1 %vm10283_vm0, %v10284_v6  ;;  %9358 = vmatpush3.bf16.msra.mxu1 %v11268_v27  ;;  %v11307_v52 = vpack.c.bf16 %v2771_v48, %v2770_v41  ;;  %v2953_v41 = vld [vmem:[#allocation13 + $0x48] sm:$0xff] }
0x1edd   :  { %9359 = vmatprep.subr.bf16.mxu1 %v10282_v3 }
0x1fae   :  { %v2639_v28 = vpop.f32.mrb[30].mxu1 }
0x1faf   :  { %v2640_v31 = vadd.f32 %v11176_v18, %v2639_v28  ;;  %v7443_v34 = vpop.f32.mrb[31].mxu1  ;;  %v11271_v18 = vpack.c.bf16 %v2759_v15, %v2758_v21  ;;  %v11322_v28 = vpack.c.bf16 %v2857_v25, %v2856_v22  ;;  %v11382_v22 = vld [vmem:[%s12058_s6] ss:$0 sm:$0xff] }
0x1fb0   :  { %v2859_v34 = vld [vmem:[#allocation11 + $0x48] sm:$0xff] }
0x1fb1   :  { %v2643_v20 = vmul.f32 %v2640_v31, %v11186_v58  ;;  %9361 = vmatpush3.bf16.msra.mxu1 %v11271_v18 }
0x1fb2   :  { %9362 = vmatprep.subr.bf16.mxu1 %v10282_v3 }
0x1fb3   :  { %2644 = vadd.xlane.f32.xlu1 %v2643_v20 }
0x1fb5   :  { %9364 = vmatpush3.bf16.msra.mxu1 %v11275_v33 }
0x1fb6   :  { %9365 = vmatprep.subr.bf16.mxu1 %v10282_v3 }
0x1fb9   :  { %9367 = vmatpush3.bf16.msra.mxu1 %v11279_v42 }
0x1fba   :  { %9368 = vmatprep.subr.bf16.mxu1 %v10282_v3 }
0x1fbd   :  { %9370 = vmatpush3.bf16.msra.mxu1 %v11283_v50 }
0x1fbe   :  { %9371 = vmatprep.subr.bf16.mxu1 %v10282_v3 }
0x1fc1   :  { %9373 = vmatpush3.bf16.msra.mxu1 %v11287_v0 }
0x1fc2   :  { %9374 = vmatprep.subr.bf16.mxu1 %v10282_v3 }
0x1fc5   :  { %9376 = vmatpush3.bf16.msra.mxu1 %v11291_v59 }
0x1fc6   :  { %9377 = vmatprep.subr.bf16.mxu1 %v10282_v3 }
0x1fc9   :  { %9379 = vmatpush3.bf16.msra.mxu1 %v11307_v52 }
0x1fca   :  { %9404 = vmatprep.subr.bf16.mxu1 %v10282_v3 }
0x2040   :  { %v2645_v62 = vpop.xlane.xlu1 %2644 }
0x2041   :  { %v2646_v1 = vsub.f32 %v2640_v31, %v2645_v62  ;;  %v2858_v31 = vld [vmem:[#allocation11 + $0x40] sm:$0xff] }
0x2042   :  { %v11326_v20 = vpack.c.bf16 %v2859_v34, %v2858_v31  ;;  %v2948_v62 = vld [vmem:[#allocation13 + $0x20] sm:$0xff] }
0x2043   :  { %v2647_v8 = vmul.f32 %v2646_v1, %v11186_v58  ;;  %v2850_v58 = vld [vmem:[#allocation11] sm:$0xff]  ;;  %v2949_v1 = vld [vmem:[#allocation13 + $0x28] sm:$0xff] }
0x2045   :  { %v2648_v11 = vmul.f32 %v2647_v8, %v10629_v35  ;;  %v11358_v8 = vpack.c.bf16 %v2949_v1, %v2948_v62 }
0x2047   :  { %v2653_v29 = vadd.f32 %v11188_v2, %v2648_v11  ;;  %v2851_v2 = vld [vmem:[#allocation11 + $0x8] sm:$0xff]  ;;  %v2950_v11 = vld [vmem:[#allocation13 + $0x30] sm:$0xff] }
0x2049   :  { %v2655_v32 = vmul.f32 %v2654_v23, %v2653_v29  ;;  %v2951_v23 = vld [vmem:[#allocation13 + $0x38] sm:$0xff] }
0x204a   :  { %v11362_v29 = vpack.c.bf16 %v2951_v23, %v2950_v11  ;;  %v11442_v23 = vstv %s2660_s2 }
0x204b   :  { %v11301_v37 = vadd.f32 %v2655_v32, %v10900_v38  ;;  %v11311_v38 = vpack.c.bf16 %v2851_v2, %v2850_v58  ;;  %v2952_v32 = vld [vmem:[#allocation13 + $0x40] sm:$0xff]  ;;  %v2954_v58 = vld [vmem:[#allocation13 + $0x50] sm:$0xff]  ;;  %v2955_v2 = vld [vmem:[#allocation13 + $0x58] sm:$0xff] }
0x204c   :  { %v11366_v48 = vpack.c.bf16 %v2953_v41, %v2952_v32  ;;  %v11370_v57 = vpack.c.bf16 %v2955_v2, %v2954_v58 }
0x204d   :  { %2658 = vst [vmem:[#allocation14 + $0x8] sm:$0xff] %v11301_v37  ;;  %7477 = vmatmul.mubr.f32.vlgmr.msra.gmra.mrb[32].mxu0 %v11301_v37 }
0x204e   :  { %7546 = vmatprep.mubr.msk.f32.mxu0 %vm10283_vm0, %v10284_v6  ;;  %9382 = vmatpush3.bf16.msra.mxu0 %v11311_v38 }
0x204f   :  { %9383 = vmatprep.subr.bf16.mxu0 %v10282_v3 }
0x2052   :  { %9385 = vmatpush3.bf16.msra.mxu0 %v11314_v5 }
0x2053   :  { %9386 = vmatprep.subr.bf16.mxu0 %v10282_v3 }
0x2056   :  { %9388 = vmatpush3.bf16.msra.mxu0 %v11318_v17 }
0x2057   :  { %9389 = vmatprep.subr.bf16.mxu0 %v10282_v3 }
0x205a   :  { %9391 = vmatpush3.bf16.msra.mxu0 %v11322_v28 }
0x205b   :  { %9392 = vmatprep.subr.bf16.mxu0 %v10282_v3 }
0x205e   :  { %9394 = vmatpush3.bf16.msra.mxu0 %v11326_v20 }
0x205f   :  { %9395 = vmatprep.subr.bf16.mxu0 %v10282_v3 }
0x2062   :  { %9397 = vmatpush3.bf16.msra.mxu0 %v11330_v55 }
0x2063   :  { %9398 = vmatprep.subr.bf16.mxu0 %v10282_v3 }
0x2066   :  { %9400 = vmatpush3.bf16.msra.mxu0 %v11334_v51 }
0x2067   :  { %9401 = vmatprep.subr.bf16.mxu0 %v10282_v3 }
0x206a   :  { %9403 = vmatpush3.bf16.msra.mxu0 %v11347_v39 }
0x206b   :  { %9428 = vmatprep.subr.bf16.mxu0 %v10282_v3 }
0x2120   :  { %v2751_v14 = vpop.f32.mrb[32].mxu0 }
0x2121   :  { %v2752_v21 = vadd.f32 %v11342_v7, %v2751_v14  ;;  %v7478_v15 = vpop.f32.mrb[33].mxu0  ;;  %v11410_v14 = vld [vmem:[%s12060_s8] ss:$0 sm:$0xff] }
0x2123   :  { %v2755_v24 = vmax.f32 %v2752_v21, 0.0 }
0x2125   :  { %7512 = vmatmul.mubr.f32.vlgmr.msra.gmra.mrb[32].mxu1 %v2755_v24 }
0x2126   :  { %7581 = vmatprep.mubr.msk.f32.mxu1 %vm10283_vm0, %v10284_v6  ;;  %9406 = vmatpush3.bf16.msra.mxu1 %v11351_v63 }
0x2127   :  { %9407 = vmatprep.subr.bf16.mxu1 %v10282_v3 }
0x212a   :  { %9409 = vmatpush3.bf16.msra.mxu1 %v11354_v56 }
0x212b   :  { %9410 = vmatprep.subr.bf16.mxu1 %v10282_v3 }
0x212e   :  { %9412 = vmatpush3.bf16.msra.mxu1 %v11358_v8 }
0x212f   :  { %9413 = vmatprep.subr.bf16.mxu1 %v10282_v3 }
0x2132   :  { %9415 = vmatpush3.bf16.msra.mxu1 %v11362_v29 }
0x2133   :  { %9416 = vmatprep.subr.bf16.mxu1 %v10282_v3 }
0x2136   :  { %9418 = vmatpush3.bf16.msra.mxu1 %v11366_v48 }
0x2137   :  { %9419 = vmatprep.subr.bf16.mxu1 %v10282_v3 }
0x213a   :  { %9421 = vmatpush3.bf16.msra.mxu1 %v11370_v57 }
0x213b   :  { %9422 = vmatprep.subr.bf16.mxu1 %v10282_v3 }
0x213e   :  { %9424 = vmatpush3.bf16.msra.mxu1 %v11374_v16 }
0x213f   :  { %9425 = vmatprep.subr.bf16.mxu1 %v10282_v3 }
0x2142   :  { %9427 = vmatpush3.bf16.msra.mxu1 %v11403_v61 }
0x2143   :  { %9452 = vmatprep.subr.bf16.mxu1 %v10282_v3 }
0x21f8   :  { %v2845_v25 = vpop.f32.mrb[32].mxu1 }
0x21f9   :  { %v2846_v31 = vadd.f32 %v11382_v22, %v2845_v25  ;;  %v7513_v34 = vpop.f32.mrb[33].mxu1 }
0x21fb   :  { %v2849_v44 = vmax.f32 %v2846_v31, 0.0 }
0x21fd   :  { %7547 = vmatmul.mubr.f32.vlgmr.msra.gmra.mrb[34].mxu0 %v2849_v44 }
0x21fe   :  { %9430 = vmatpush3.bf16.msra.mxu0 %v11234_v9  ;;  %7616 = vmatprep.mubr.msk.f32.mxu0 %vm10283_vm0, %v10284_v6 }
0x21ff   :  { %9431 = vmatprep.subr.bf16.mxu0 %v10282_v3 }
0x2202   :  { %9433 = vmatpush3.bf16.msra.mxu0 %v11237_v43 }
0x2203   :  { %9434 = vmatprep.subr.bf16.mxu0 %v10282_v3 }
0x2206   :  { %9436 = vmatpush3.bf16.msra.mxu0 %v11241_v10 }
0x2207   :  { %9437 = vmatprep.subr.bf16.mxu0 %v10282_v3 }
0x220a   :  { %9439 = vmatpush3.bf16.msra.mxu0 %v11245_v19 }
0x220b   :  { %9440 = vmatprep.subr.bf16.mxu0 %v10282_v3 }
0x220e   :  { %9442 = vmatpush3.bf16.msra.mxu0 %v11249_v26 }
0x220f   :  { %9443 = vmatprep.subr.bf16.mxu0 %v10282_v3 }
0x2212   :  { %9445 = vmatpush3.bf16.msra.mxu0 %v11256_v53 }
0x2213   :  { %9446 = vmatprep.subr.bf16.mxu0 %v10282_v3 }
0x2216   :  { %9448 = vmatpush3.bf16.msra.mxu0 %v11260_v60 }
0x2217   :  { %9449 = vmatprep.subr.bf16.mxu0 %v10282_v3 }
0x221a   :  { %9451 = vmatpush3.bf16.msra.mxu0 %v11264_v4 }
0x221b   :  { %9476 = vmatprep.subr.bf16.mxu0 %v10282_v3 }
0x22d0   :  { %v2939_v21 = vpop.f32.mrb[34].mxu0 }
0x22d1   :  { %v2940_v15 = vadd.f32 %v11410_v14, %v2939_v21  ;;  %v7548_v24 = vpop.f32.mrb[35].mxu0 }
0x22d3   :  { %v2943_v30 = vmax.f32 %v2940_v15, 0.0 }
0x22d5   :  { %7582 = vmatmul.mubr.f32.vlgmr.msra.gmra.mrb[34].mxu1 %v2943_v30 }
0x22d6   :  { %9454 = vmatpush3.bf16.msra.mxu1 %v11268_v27  ;;  %7651 = vmatprep.mubr.msk.f32.mxu1 %vm10283_vm0, %v10284_v6 }
0x22d7   :  { %9455 = vmatprep.subr.bf16.mxu1 %v10282_v3 }
0x22da   :  { %9457 = vmatpush3.bf16.msra.mxu1 %v11271_v18 }
0x22db   :  { %9458 = vmatprep.subr.bf16.mxu1 %v10282_v3 }
0x22de   :  { %9460 = vmatpush3.bf16.msra.mxu1 %v11275_v33 }
0x22df   :  { %9461 = vmatprep.subr.bf16.mxu1 %v10282_v3 }
0x22e2   :  { %9463 = vmatpush3.bf16.msra.mxu1 %v11279_v42 }
0x22e3   :  { %9464 = vmatprep.subr.bf16.mxu1 %v10282_v3 }
0x22e6   :  { %9466 = vmatpush3.bf16.msra.mxu1 %v11283_v50 }
0x22e7   :  { %9467 = vmatprep.subr.bf16.mxu1 %v10282_v3 }
0x22ea   :  { %9469 = vmatpush3.bf16.msra.mxu1 %v11287_v0 }
0x22eb   :  { %9470 = vmatprep.subr.bf16.mxu1 %v10282_v3 }
0x22ee   :  { %9472 = vmatpush3.bf16.msra.mxu1 %v11291_v59 }
0x22ef   :  { %9473 = vmatprep.subr.bf16.mxu1 %v10282_v3 }
0x22f2   :  { %9475 = vmatpush3.bf16.msra.mxu1 %v11307_v52 }
0x22f3   :  { %9500 = vmatprep.subr.bf16.mxu1 %v10282_v3 }
0x23a8   :  { %v3033_v45 = vpop.f32.mrb[34].mxu1 }
0x23a9   :  { %v3034_v46 = vadd.f32 %v11434_v36, %v3033_v45  ;;  %v7583_v12 = vpop.f32.mrb[35].mxu1 }
0x23ab   :  { %v3037_v54 = vmul.f32 %v3034_v46, %v11301_v37 }
0x23ad   :  { %3038 = vadd.xlane.f32.xlu0 %v3037_v54 }
0x243a   :  { %v3039_v62 = vpop.xlane.xlu0 %3038 }
0x243b   :  { %v3040_v1 = vsub.f32 %v3034_v46, %v3039_v62 }
0x243d   :  { %v3041_v11 = vmul.f32 %v3040_v1, %v11301_v37 }
0x243f   :  { %v11445_v32 = vmul.f32 %v3041_v11, %v10629_v35 }
0x2441   :  { %v3044_v41 = vmul.f32 %v11442_v23, %v11445_v32 }
0x2443   :  { %v11450_v58 = vadd.f32 %v3044_v41, %v11301_v37 }
0x2445   :  { %7617 = vmatmul.mubr.f32.vlgmr.msra.gmra.mrb[36].mxu0 %v11450_v58 }
0x2446   :  { %9478 = vmatpush3.bf16.msra.mxu0 %v11311_v38  ;;  %7686 = vmatprep.mubr.msk.f32.mxu0 %vm10283_vm0, %v10284_v6 }
0x2447   :  { %9479 = vmatprep.subr.bf16.mxu0 %v10282_v3 }
0x244a   :  { %9481 = vmatpush3.bf16.msra.mxu0 %v11314_v5 }
0x244b   :  { %9482 = vmatprep.subr.bf16.mxu0 %v10282_v3 }
0x244e   :  { %9484 = vmatpush3.bf16.msra.mxu0 %v11318_v17 }
0x244f   :  { %9485 = vmatprep.subr.bf16.mxu0 %v10282_v3 }
0x2452   :  { %9487 = vmatpush3.bf16.msra.mxu0 %v11322_v28 }
0x2453   :  { %9488 = vmatprep.subr.bf16.mxu0 %v10282_v3 }
0x2456   :  { %9490 = vmatpush3.bf16.msra.mxu0 %v11326_v20 }
0x2457   :  { %9491 = vmatprep.subr.bf16.mxu0 %v10282_v3 }
0x245a   :  { %9493 = vmatpush3.bf16.msra.mxu0 %v11330_v55 }
0x245b   :  { %9494 = vmatprep.subr.bf16.mxu0 %v10282_v3 }
0x245e   :  { %9496 = vmatpush3.bf16.msra.mxu0 %v11334_v51 }
0x245f   :  { %9497 = vmatprep.subr.bf16.mxu0 %v10282_v3 }
0x2462   :  { %9499 = vmatpush3.bf16.msra.mxu0 %v11347_v39 }
0x2463   :  { %9524 = vmatprep.subr.bf16.mxu0 %v10282_v3 }
0x2518   :  { %v3112_v2 = vpop.f32.mrb[36].mxu0 }
0x2519   :  { %v3113_v40 = vadd.f32 %v11342_v7, %v3112_v2  ;;  %v7618_v13 = vpop.f32.mrb[37].mxu0 }
0x251b   :  { %v3116_v25 = vmax.f32 %v3113_v40, 0.0 }
0x251d   :  { %7652 = vmatmul.mubr.f32.vlgmr.msra.gmra.mrb[36].mxu1 %v3116_v25 }
0x251e   :  { %9502 = vmatpush3.bf16.msra.mxu1 %v11351_v63  ;;  %7721 = vmatprep.mubr.msk.f32.mxu1 %vm10283_vm0, %v10284_v6 }
0x251f   :  { %9503 = vmatprep.subr.bf16.mxu1 %v10282_v3 }
0x2522   :  { %9505 = vmatpush3.bf16.msra.mxu1 %v11354_v56 }
0x2523   :  { %9506 = vmatprep.subr.bf16.mxu1 %v10282_v3 }
0x2526   :  { %9508 = vmatpush3.bf16.msra.mxu1 %v11358_v8 }
0x2527   :  { %9509 = vmatprep.subr.bf16.mxu1 %v10282_v3 }
0x252a   :  { %9511 = vmatpush3.bf16.msra.mxu1 %v11362_v29 }
0x252b   :  { %9512 = vmatprep.subr.bf16.mxu1 %v10282_v3 }
0x252e   :  { %9514 = vmatpush3.bf16.msra.mxu1 %v11366_v48 }
0x252f   :  { %9515 = vmatprep.subr.bf16.mxu1 %v10282_v3 }
0x2532   :  { %9517 = vmatpush3.bf16.msra.mxu1 %v11370_v57 }
0x2533   :  { %9518 = vmatprep.subr.bf16.mxu1 %v10282_v3 }
0x2536   :  { %9520 = vmatpush3.bf16.msra.mxu1 %v11374_v16 }
0x2537   :  { %9521 = vmatprep.subr.bf16.mxu1 %v10282_v3 }
0x253a   :  { %9523 = vmatpush3.bf16.msra.mxu1 %v11403_v61 }
0x253b   :  { %9548 = vmatprep.subr.bf16.mxu1 %v10282_v3 }
0x25f0   :  { %v3183_v31 = vpop.f32.mrb[36].mxu1 }
0x25f1   :  { %v3184_v34 = vadd.f32 %v11382_v22, %v3183_v31  ;;  %v7653_v44 = vpop.f32.mrb[37].mxu1 }
0x25f3   :  { %v3187_v49 = vmax.f32 %v3184_v34, 0.0 }
0x25f5   :  { %7687 = vmatmul.mubr.f32.vlgmr.msra.gmra.mrb[38].mxu0 %v3187_v49 }
0x25f6   :  { %9526 = vmatpush3.bf16.msra.mxu0 %v11234_v9  ;;  %7756 = vmatprep.mubr.msk.f32.mxu0 %vm10283_vm0, %v10284_v6 }
0x25f7   :  { %9527 = vmatprep.subr.bf16.mxu0 %v10282_v3 }
0x25fa   :  { %9529 = vmatpush3.bf16.msra.mxu0 %v11237_v43 }
0x25fb   :  { %9530 = vmatprep.subr.bf16.mxu0 %v10282_v3 }
0x25fe   :  { %9532 = vmatpush3.bf16.msra.mxu0 %v11241_v10 }
0x25ff   :  { %9533 = vmatprep.subr.bf16.mxu0 %v10282_v3 }
0x2602   :  { %9535 = vmatpush3.bf16.msra.mxu0 %v11245_v19 }
0x2603   :  { %9536 = vmatprep.subr.bf16.mxu0 %v10282_v3 }
0x2606   :  { %9538 = vmatpush3.bf16.msra.mxu0 %v11249_v26 }
0x2607   :  { %9539 = vmatprep.subr.bf16.mxu0 %v10282_v3 }
0x260a   :  { %9541 = vmatpush3.bf16.msra.mxu0 %v11256_v53 }
0x260b   :  { %9542 = vmatprep.subr.bf16.mxu0 %v10282_v3 }
0x260e   :  { %9544 = vmatpush3.bf16.msra.mxu0 %v11260_v60 }
0x260f   :  { %9545 = vmatprep.subr.bf16.mxu0 %v10282_v3 }
0x2612   :  { %9547 = vmatpush3.bf16.msra.mxu0 %v11264_v4 }
0x2613   :  { %9572 = vmatprep.subr.bf16.mxu0 %v10282_v3 }
0x26c8   :  { %v3254_v47 = vpop.f32.mrb[38].mxu0 }
0x26c9   :  { %v3255_v21 = vadd.f32 %v11410_v14, %v3254_v47  ;;  %v7688_v15 = vpop.f32.mrb[39].mxu0 }
0x26cb   :  { %v3258_v24 = vmax.f32 %v3255_v21, 0.0 }
0x26cd   :  { %7722 = vmatmul.mubr.f32.vlgmr.msra.gmra.mrb[38].mxu1 %v3258_v24 }
0x26ce   :  { %9550 = vmatpush3.bf16.msra.mxu1 %v11268_v27  ;;  %7791 = vmatprep.mubr.msk.f32.mxu1 %vm10283_vm0, %v10284_v6 }
0x26cf   :  { %9551 = vmatprep.subr.bf16.mxu1 %v10282_v3 }
0x26d2   :  { %9553 = vmatpush3.bf16.msra.mxu1 %v11271_v18 }
0x26d3   :  { %9554 = vmatprep.subr.bf16.mxu1 %v10282_v3 }
0x26d6   :  { %9556 = vmatpush3.bf16.msra.mxu1 %v11275_v33 }
0x26d7   :  { %9557 = vmatprep.subr.bf16.mxu1 %v10282_v3 }
0x26da   :  { %9559 = vmatpush3.bf16.msra.mxu1 %v11279_v42 }
0x26db   :  { %9560 = vmatprep.subr.bf16.mxu1 %v10282_v3 }
0x26de   :  { %9562 = vmatpush3.bf16.msra.mxu1 %v11283_v50 }
0x26df   :  { %9563 = vmatprep.subr.bf16.mxu1 %v10282_v3 }
0x26e2   :  { %9565 = vmatpush3.bf16.msra.mxu1 %v11287_v0 }
0x26e3   :  { %9566 = vmatprep.subr.bf16.mxu1 %v10282_v3 }
0x26e6   :  { %9568 = vmatpush3.bf16.msra.mxu1 %v11291_v59 }
0x26e7   :  { %9569 = vmatprep.subr.bf16.mxu1 %v10282_v3 }
0x26ea   :  { %9571 = vmatpush3.bf16.msra.mxu1 %v11307_v52 }
0x26eb   :  { %9596 = vmatprep.subr.bf16.mxu1 %v10282_v3 }
0x27a0   :  { %v3325_v30 = vpop.f32.mrb[38].mxu1 }
0x27a1   :  { %v3326_v45 = vadd.f32 %v11434_v36, %v3325_v30  ;;  %v7723_v46 = vpop.f32.mrb[39].mxu1 }
0x27a3   :  { %v3329_v12 = vmul.f32 %v3326_v45, %v11450_v58 }
0x27a5   :  { %3330 = vadd.xlane.f32.xlu1 %v3329_v12 }
0x2832   :  { %v3331_v54 = vpop.xlane.xlu1 %3330 }
0x2833   :  { %v3332_v62 = vsub.f32 %v3326_v45, %v3331_v54 }
0x2835   :  { %v3333_v1 = vmul.f32 %v3332_v62, %v11450_v58 }
0x2837   :  { %v11532_v11 = vmul.f32 %v3333_v1, %v10629_v35 }
0x2839   :  { %v3335_v41 = vmul.f32 %v11532_v11, %v11442_v23  ;;  %v3918_v62 = vmul.f32 2.0, %v11532_v11 }
0x283b   :  { %v11537_v2 = vadd.f32 %v3335_v41, %v11301_v37  ;;  %v3626_v41 = vstv %s11438_s12 }
0x283d   :  { %7757 = vmatmul.mubr.f32.vlgmr.msra.gmra.mrb[40].mxu0 %v11537_v2 }
0x283e   :  { %9574 = vmatpush3.bf16.msra.mxu0 %v11311_v38  ;;  %7826 = vmatprep.mubr.msk.f32.mxu0 %vm10283_vm0, %v10284_v6 }
0x283f   :  { %9575 = vmatprep.subr.bf16.mxu0 %v10282_v3 }
0x2842   :  { %9577 = vmatpush3.bf16.msra.mxu0 %v11314_v5 }
0x2843   :  { %9578 = vmatprep.subr.bf16.mxu0 %v10282_v3 }
0x2846   :  { %9580 = vmatpush3.bf16.msra.mxu0 %v11318_v17 }
0x2847   :  { %9581 = vmatprep.subr.bf16.mxu0 %v10282_v3 }
0x284a   :  { %9583 = vmatpush3.bf16.msra.mxu0 %v11322_v28 }
0x284b   :  { %9584 = vmatprep.subr.bf16.mxu0 %v10282_v3 }
0x284e   :  { %9586 = vmatpush3.bf16.msra.mxu0 %v11326_v20 }
0x284f   :  { %9587 = vmatprep.subr.bf16.mxu0 %v10282_v3 }
0x2852   :  { %9589 = vmatpush3.bf16.msra.mxu0 %v11330_v55 }
0x2853   :  { %9590 = vmatprep.subr.bf16.mxu0 %v10282_v3 }
0x2856   :  { %9592 = vmatpush3.bf16.msra.mxu0 %v11334_v51 }
0x2857   :  { %9593 = vmatprep.subr.bf16.mxu0 %v10282_v3 }
0x285a   :  { %9595 = vmatpush3.bf16.msra.mxu0 %v11347_v39 }
0x285b   :  { %9620 = vmatprep.subr.bf16.mxu0 %v10282_v3 }
0x2910   :  { %v3403_v23 = vpop.f32.mrb[40].mxu0 }
0x2911   :  { %v3404_v58 = vadd.f32 %v11342_v7, %v3403_v23  ;;  %v7758_v40 = vpop.f32.mrb[41].mxu0 }
0x2913   :  { %v3407_v13 = vmax.f32 %v3404_v58, 0.0  ;;  %v3919_v58 = vadd.f32 %v3918_v62, %v11445_v32 }
0x2915   :  { %7792 = vmatmul.mubr.f32.vlgmr.msra.gmra.mrb[40].mxu1 %v3407_v13 }
0x2916   :  { %9598 = vmatpush3.bf16.msra.mxu1 %v11351_v63  ;;  %7861 = vmatprep.mubr.msk.f32.mxu1 %vm10283_vm0, %v10284_v6 }
0x2917   :  { %9599 = vmatprep.subr.bf16.mxu1 %v10282_v3 }
0x291a   :  { %9601 = vmatpush3.bf16.msra.mxu1 %v11354_v56 }
0x291b   :  { %9602 = vmatprep.subr.bf16.mxu1 %v10282_v3 }
0x291e   :  { %9604 = vmatpush3.bf16.msra.mxu1 %v11358_v8 }
0x291f   :  { %9605 = vmatprep.subr.bf16.mxu1 %v10282_v3 }
0x2922   :  { %9607 = vmatpush3.bf16.msra.mxu1 %v11362_v29 }
0x2923   :  { %9608 = vmatprep.subr.bf16.mxu1 %v10282_v3 }
0x2926   :  { %9610 = vmatpush3.bf16.msra.mxu1 %v11366_v48 }
0x2927   :  { %9611 = vmatprep.subr.bf16.mxu1 %v10282_v3 }
0x292a   :  { %9613 = vmatpush3.bf16.msra.mxu1 %v11370_v57 }
0x292b   :  { %9614 = vmatprep.subr.bf16.mxu1 %v10282_v3 }
0x292e   :  { %9616 = vmatpush3.bf16.msra.mxu1 %v11374_v16 }
0x292f   :  { %9617 = vmatprep.subr.bf16.mxu1 %v10282_v3 }
0x2932   :  { %9619 = vmatpush3.bf16.msra.mxu1 %v11403_v61 }
0x2933   :  { %9644 = vmatprep.subr.bf16.mxu1 %v10282_v3 }
0x29e8   :  { %v3474_v25 = vpop.f32.mrb[40].mxu1 }
0x29e9   :  { %v3475_v31 = vadd.f32 %v11382_v22, %v3474_v25  ;;  %v7793_v34 = vpop.f32.mrb[41].mxu1 }
0x29eb   :  { %v3478_v44 = vmax.f32 %v3475_v31, 0.0 }
0x29ed   :  { %7827 = vmatmul.mubr.f32.vlgmr.msra.gmra.mrb[42].mxu0 %v3478_v44 }
0x29ee   :  { %9622 = vmatpush3.bf16.msra.mxu0 %v11234_v9  ;;  %7896 = vmatprep.mubr.msk.f32.mxu0 %vm10283_vm0, %v10284_v6 }
0x29ef   :  { %9623 = vmatprep.subr.bf16.mxu0 %v10282_v3 }
0x29f2   :  { %9625 = vmatpush3.bf16.msra.mxu0 %v11237_v43 }
0x29f3   :  { %9626 = vmatprep.subr.bf16.mxu0 %v10282_v3 }
0x29f6   :  { %9628 = vmatpush3.bf16.msra.mxu0 %v11241_v10 }
0x29f7   :  { %9629 = vmatprep.subr.bf16.mxu0 %v10282_v3 }
0x29fa   :  { %9631 = vmatpush3.bf16.msra.mxu0 %v11245_v19 }
0x29fb   :  { %9632 = vmatprep.subr.bf16.mxu0 %v10282_v3 }
0x29fe   :  { %9634 = vmatpush3.bf16.msra.mxu0 %v11249_v26 }
0x29ff   :  { %9635 = vmatprep.subr.bf16.mxu0 %v10282_v3 }
0x2a02   :  { %9637 = vmatpush3.bf16.msra.mxu0 %v11256_v53 }
0x2a03   :  { %9638 = vmatprep.subr.bf16.mxu0 %v10282_v3 }
0x2a06   :  { %9640 = vmatpush3.bf16.msra.mxu0 %v11260_v60 }
0x2a07   :  { %9641 = vmatprep.subr.bf16.mxu0 %v10282_v3 }
0x2a0a   :  { %9643 = vmatpush3.bf16.msra.mxu0 %v11264_v4 }
0x2a0b   :  { %9668 = vmatprep.subr.bf16.mxu0 %v10282_v3 }
0x2ac0   :  { %v3545_v49 = vpop.f32.mrb[42].mxu0 }
0x2ac1   :  { %v3546_v47 = vadd.f32 %v11410_v14, %v3545_v49  ;;  %v7828_v21 = vpop.f32.mrb[43].mxu0 }
0x2ac3   :  { %v3549_v15 = vmax.f32 %v3546_v47, 0.0 }
0x2ac5   :  { %7862 = vmatmul.mubr.f32.vlgmr.msra.gmra.mrb[42].mxu1 %v3549_v15 }
0x2ac6   :  { %9646 = vmatpush3.bf16.msra.mxu1 %v11268_v27  ;;  %7931 = vmatprep.mubr.msk.f32.mxu1 %vm10283_vm0, %v10284_v6 }
0x2ac7   :  { %9647 = vmatprep.subr.bf16.mxu1 %v10282_v3 }
0x2aca   :  { %9649 = vmatpush3.bf16.msra.mxu1 %v11271_v18 }
0x2acb   :  { %9650 = vmatprep.subr.bf16.mxu1 %v10282_v3 }
0x2ace   :  { %9652 = vmatpush3.bf16.msra.mxu1 %v11275_v33 }
0x2acf   :  { %9653 = vmatprep.subr.bf16.mxu1 %v10282_v3 }
0x2ad2   :  { %9655 = vmatpush3.bf16.msra.mxu1 %v11279_v42 }
0x2ad3   :  { %9656 = vmatprep.subr.bf16.mxu1 %v10282_v3 }
0x2ad6   :  { %9658 = vmatpush3.bf16.msra.mxu1 %v11283_v50 }
0x2ad7   :  { %9659 = vmatprep.subr.bf16.mxu1 %v10282_v3 }
0x2ada   :  { %9661 = vmatpush3.bf16.msra.mxu1 %v11287_v0 }
0x2adb   :  { %9662 = vmatprep.subr.bf16.mxu1 %v10282_v3 }
0x2ade   :  { %9664 = vmatpush3.bf16.msra.mxu1 %v11291_v59 }
0x2adf   :  { %9665 = vmatprep.subr.bf16.mxu1 %v10282_v3 }
0x2ae2   :  { %9667 = vmatpush3.bf16.msra.mxu1 %v11307_v52 }
0x2ae3   :  { %9692 = vmatprep.subr.bf16.mxu1 %v10282_v3 }
0x2b98   :  { %v3616_v24 = vpop.f32.mrb[42].mxu1 }
0x2b99   :  { %v3617_v30 = vadd.f32 %v11434_v36, %v3616_v24  ;;  %v7863_v45 = vpop.f32.mrb[43].mxu1 }
0x2b9b   :  { %v3620_v46 = vmul.f32 %v3617_v30, %v11537_v2 }
0x2b9d   :  { %3621 = vadd.xlane.f32.xlu0 %v3620_v46 }
0x2c2a   :  { %v3622_v12 = vpop.xlane.xlu0 %3621 }
0x2c2b   :  { %v3623_v54 = vsub.f32 %v3617_v30, %v3622_v12 }
0x2c2d   :  { %v3624_v1 = vmul.f32 %v3623_v54, %v11537_v2 }
0x2c2f   :  { %v3625_v23 = vmul.f32 %v3624_v1, %v10629_v35 }
0x2c31   :  { %v3627_v40 = vmul.f32 %v3626_v41, %v3625_v23  ;;  %v3920_v13 = vmul.f32 2.0, %v3625_v23 }
0x2c33   :  { %v11623_v25 = vadd.f32 %v3627_v40, %v11301_v37  ;;  %v11625_v31 = vadd.f32 %v3920_v13, %v3919_v58  ;;  %v3923_v40 = vstv %s2661_s30 }
0x2c35   :  { %7897 = vmatmul.mubr.f32.vlgmr.msra.gmra.mrb[44].mxu0 %v11623_v25 }
0x2c36   :  { %9670 = vmatpush3.bf16.msra.mxu0 %v11311_v38  ;;  %7966 = vmatprep.mubr.msk.f32.mxu0 %vm10283_vm0, %v10284_v6 }
0x2c37   :  { %9671 = vmatprep.subr.bf16.mxu0 %v10282_v3 }
0x2c3a   :  { %9673 = vmatpush3.bf16.msra.mxu0 %v11314_v5 }
0x2c3b   :  { %9674 = vmatprep.subr.bf16.mxu0 %v10282_v3 }
0x2c3e   :  { %9676 = vmatpush3.bf16.msra.mxu0 %v11318_v17 }
0x2c3f   :  { %9677 = vmatprep.subr.bf16.mxu0 %v10282_v3 }
0x2c42   :  { %9679 = vmatpush3.bf16.msra.mxu0 %v11322_v28 }
0x2c43   :  { %9680 = vmatprep.subr.bf16.mxu0 %v10282_v3 }
0x2c46   :  { %9682 = vmatpush3.bf16.msra.mxu0 %v11326_v20 }
0x2c47   :  { %9683 = vmatprep.subr.bf16.mxu0 %v10282_v3 }
0x2c4a   :  { %9685 = vmatpush3.bf16.msra.mxu0 %v11330_v55 }
0x2c4b   :  { %9686 = vmatprep.subr.bf16.mxu0 %v10282_v3 }
0x2c4e   :  { %9688 = vmatpush3.bf16.msra.mxu0 %v11334_v51 }
0x2c4f   :  { %9689 = vmatprep.subr.bf16.mxu0 %v10282_v3 }
0x2c52   :  { %9691 = vmatpush3.bf16.msra.mxu0 %v11347_v39 }
0x2c53   :  { %9716 = vmatprep.subr.bf16.mxu0 %v10282_v3 }
0x2d08   :  { %v3695_v32 = vpop.f32.mrb[44].mxu0 }
0x2d09   :  { %v3696_v11 = vadd.f32 %v11342_v7, %v3695_v32  ;;  %v7898_v2 = vpop.f32.mrb[45].mxu0 }
0x2d0b   :  { %v3699_v34 = vmax.f32 %v3696_v11, 0.0 }
0x2d0d   :  { %7932 = vmatmul.mubr.f32.vlgmr.msra.gmra.mrb[44].mxu1 %v3699_v34 }
0x2d0e   :  { %9694 = vmatpush3.bf16.msra.mxu1 %v11351_v63  ;;  %8001 = vmatprep.mubr.msk.f32.mxu1 %vm10283_vm0, %v10284_v6 }
0x2d0f   :  { %9695 = vmatprep.subr.bf16.mxu1 %v10282_v3 }
0x2d12   :  { %9697 = vmatpush3.bf16.msra.mxu1 %v11354_v56 }
0x2d13   :  { %9698 = vmatprep.subr.bf16.mxu1 %v10282_v3 }
0x2d16   :  { %9700 = vmatpush3.bf16.msra.mxu1 %v11358_v8 }
0x2d17   :  { %9701 = vmatprep.subr.bf16.mxu1 %v10282_v3 }
0x2d1a   :  { %9703 = vmatpush3.bf16.msra.mxu1 %v11362_v29 }
0x2d1b   :  { %9704 = vmatprep.subr.bf16.mxu1 %v10282_v3 }
0x2d1e   :  { %9706 = vmatpush3.bf16.msra.mxu1 %v11366_v48 }
0x2d1f   :  { %9707 = vmatprep.subr.bf16.mxu1 %v10282_v3 }
0x2d22   :  { %9709 = vmatpush3.bf16.msra.mxu1 %v11370_v57 }
0x2d23   :  { %9710 = vmatprep.subr.bf16.mxu1 %v10282_v3 }
0x2d26   :  { %9712 = vmatpush3.bf16.msra.mxu1 %v11374_v16 }
0x2d27   :  { %9713 = vmatprep.subr.bf16.mxu1 %v10282_v3 }
0x2d2a   :  { %9715 = vmatpush3.bf16.msra.mxu1 %v11403_v61 }
0x2d2b   :  { %9740 = vmatprep.subr.bf16.mxu1 %v10282_v3 }
0x2de0   :  { %v3766_v44 = vpop.f32.mrb[44].mxu1 }
0x2de1   :  { %v3767_v49 = vadd.f32 %v11382_v22, %v3766_v44  ;;  %v7933_v47 = vpop.f32.mrb[45].mxu1 }
0x2de3   :  { %v3770_v21 = vmax.f32 %v3767_v49, 0.0 }
0x2de5   :  { %7967 = vmatmul.mubr.f32.vlgmr.msra.gmra.mrb[46].mxu0 %v3770_v21 }
0x2de6   :  { %9718 = vmatpush3.bf16.msra.mxu0 %v11234_v9  ;;  %8036 = vmatprep.mubr.msk.f32.mxu0 %vm10283_vm0, %v10284_v6 }
0x2de7   :  { %9719 = vmatprep.subr.bf16.mxu0 %v10282_v3 }
0x2dea   :  { %9721 = vmatpush3.bf16.msra.mxu0 %v11237_v43 }
0x2deb   :  { %9722 = vmatprep.subr.bf16.mxu0 %v10282_v3 }
0x2dee   :  { %9724 = vmatpush3.bf16.msra.mxu0 %v11241_v10 }
0x2def   :  { %9725 = vmatprep.subr.bf16.mxu0 %v10282_v3 }
0x2df2   :  { %9727 = vmatpush3.bf16.msra.mxu0 %v11245_v19 }
0x2df3   :  { %9728 = vmatprep.subr.bf16.mxu0 %v10282_v3 }
0x2df6   :  { %9730 = vmatpush3.bf16.msra.mxu0 %v11249_v26 }
0x2df7   :  { %9731 = vmatprep.subr.bf16.mxu0 %v10282_v3 }
0x2dfa   :  { %9733 = vmatpush3.bf16.msra.mxu0 %v11256_v53 }
0x2dfb   :  { %9734 = vmatprep.subr.bf16.mxu0 %v10282_v3 }
0x2dfe   :  { %9736 = vmatpush3.bf16.msra.mxu0 %v11260_v60 }
0x2dff   :  { %9737 = vmatprep.subr.bf16.mxu0 %v10282_v3 }
0x2e02   :  { %9739 = vmatpush3.bf16.msra.mxu0 %v11264_v4 }
0x2e03   :  { %9764 = vmatprep.subr.bf16.mxu0 %v10282_v3 }
0x2eb8   :  { %v3837_v15 = vpop.f32.mrb[46].mxu0 }
0x2eb9   :  { %v3838_v24 = vadd.f32 %v11410_v14, %v3837_v15  ;;  %v7968_v30 = vpop.f32.mrb[47].mxu0 }
0x2ebb   :  { %v3841_v45 = vmax.f32 %v3838_v24, 0.0 }
0x2ebd   :  { %8002 = vmatmul.mubr.f32.vlgmr.msra.gmra.mrb[46].mxu1 %v3841_v45 }
0x2ebe   :  { %9742 = vmatpush3.bf16.msra.mxu1 %v11268_v27  ;;  %8071 = vmatprep.mubr.msk.f32.mxu1 %vm10283_vm0, %v10284_v6 }
0x2ebf   :  { %9743 = vmatprep.subr.bf16.mxu1 %v10282_v3 }
0x2ec2   :  { %9745 = vmatpush3.bf16.msra.mxu1 %v11271_v18 }
0x2ec3   :  { %9746 = vmatprep.subr.bf16.mxu1 %v10282_v3 }
0x2ec6   :  { %9748 = vmatpush3.bf16.msra.mxu1 %v11275_v33 }
0x2ec7   :  { %9749 = vmatprep.subr.bf16.mxu1 %v10282_v3 }
0x2eca   :  { %9751 = vmatpush3.bf16.msra.mxu1 %v11279_v42 }
0x2ecb   :  { %9752 = vmatprep.subr.bf16.mxu1 %v10282_v3 }
0x2ece   :  { %9754 = vmatpush3.bf16.msra.mxu1 %v11283_v50 }
0x2ecf   :  { %9755 = vmatprep.subr.bf16.mxu1 %v10282_v3 }
0x2ed2   :  { %9757 = vmatpush3.bf16.msra.mxu1 %v11287_v0 }
0x2ed3   :  { %9758 = vmatprep.subr.bf16.mxu1 %v10282_v3 }
0x2ed6   :  { %9760 = vmatpush3.bf16.msra.mxu1 %v11291_v59 }
0x2ed7   :  { %9761 = vmatprep.subr.bf16.mxu1 %v10282_v3 }
0x2eda   :  { %9763 = vmatpush3.bf16.msra.mxu1 %v11307_v52 }
0x2edb   :  { %9788 = vmatprep.subr.bf16.mxu1 %v10282_v3 }
0x2f90   :  { %v3908_v46 = vpop.f32.mrb[46].mxu1 }
0x2f91   :  { %v3909_v12 = vadd.f32 %v11434_v36, %v3908_v46  ;;  %v8003_v54 = vpop.f32.mrb[47].mxu1 }
0x2f93   :  { %v3912_v62 = vmul.f32 %v3909_v12, %v11623_v25 }
0x2f95   :  { %3913 = vadd.xlane.f32.xlu1 %v3912_v62 }
0x3022   :  { %v3914_v1 = vpop.xlane.xlu1 %3913 }
0x3023   :  { %v3915_v41 = vsub.f32 %v3909_v12, %v3914_v1 }
0x3025   :  { %v3916_v23 = vmul.f32 %v3915_v41, %v11623_v25  ;;  %v11795_v41 = vstv %s3929_s1 }
0x3027   :  { %v3917_v58 = vmul.f32 %v3916_v23, %v10629_v35 }
0x3029   :  { %v3922_v13 = vadd.f32 %v11625_v31, %v3917_v58 }
0x302b   :  { %v3924_v32 = vmul.f32 %v3923_v40, %v3922_v13 }
0x302d   :  { %v11710_v11 = vadd.f32 %v3924_v32, %v11301_v37  ;;  %v11827_v32 = vld [vmem:[%s12056_s4] ss:$0 sm:$0xff] }
0x302f   :  { %3927 = vst [vmem:[#allocation14 + $0x10] sm:$0xff] %v11710_v11  ;;  %8037 = vmatmul.mubr.f32.vlgmr.msra.gmra.mrb[48].mxu0 %v11710_v11 }
0x3030   :  { %9766 = vmatpush3.bf16.msra.mxu0 %v11311_v38  ;;  %8106 = vmatprep.mubr.msk.f32.mxu0 %vm10283_vm0, %v10284_v6 }
0x3031   :  { %9767 = vmatprep.subr.bf16.mxu0 %v10282_v3 }
0x3034   :  { %9769 = vmatpush3.bf16.msra.mxu0 %v11314_v5 }
0x3035   :  { %9770 = vmatprep.subr.bf16.mxu0 %v10282_v3 }
0x3038   :  { %9772 = vmatpush3.bf16.msra.mxu0 %v11318_v17 }
0x3039   :  { %9773 = vmatprep.subr.bf16.mxu0 %v10282_v3 }
0x303c   :  { %9775 = vmatpush3.bf16.msra.mxu0 %v11322_v28 }
0x303d   :  { %9776 = vmatprep.subr.bf16.mxu0 %v10282_v3 }
0x3040   :  { %9778 = vmatpush3.bf16.msra.mxu0 %v11326_v20 }
0x3041   :  { %9779 = vmatprep.subr.bf16.mxu0 %v10282_v3 }
0x3044   :  { %9781 = vmatpush3.bf16.msra.mxu0 %v11330_v55 }
0x3045   :  { %9782 = vmatprep.subr.bf16.mxu0 %v10282_v3 }
0x3048   :  { %9784 = vmatpush3.bf16.msra.mxu0 %v11334_v51 }
0x3049   :  { %9785 = vmatprep.subr.bf16.mxu0 %v10282_v3 }
0x304c   :  { %9787 = vmatpush3.bf16.msra.mxu0 %v11347_v39 }
0x304d   :  { %9812 = vmatprep.subr.bf16.mxu0 %v10282_v3 }
0x3102   :  { %v4020_v37 = vpop.f32.mrb[48].mxu0 }
0x3103   :  { %v4021_v25 = vadd.f32 %v11342_v7, %v4020_v37  ;;  %v8038_v31 = vpop.f32.mrb[49].mxu0 }
0x3105   :  { %v4024_v2 = vmax.f32 %v4021_v25, 0.0 }
0x3107   :  { %8072 = vmatmul.mubr.f32.vlgmr.msra.gmra.mrb[48].mxu1 %v4024_v2 }
0x3108   :  { %9790 = vmatpush3.bf16.msra.mxu1 %v11351_v63  ;;  %8141 = vmatprep.mubr.msk.f32.mxu1 %vm10283_vm0, %v10284_v6 }
0x3109   :  { %9791 = vmatprep.subr.bf16.mxu1 %v10282_v3 }
0x310c   :  { %9793 = vmatpush3.bf16.msra.mxu1 %v11354_v56 }
0x310d   :  { %9794 = vmatprep.subr.bf16.mxu1 %v10282_v3 }
0x3110   :  { %9796 = vmatpush3.bf16.msra.mxu1 %v11358_v8 }
0x3111   :  { %9797 = vmatprep.subr.bf16.mxu1 %v10282_v3 }
0x3114   :  { %9799 = vmatpush3.bf16.msra.mxu1 %v11362_v29 }
0x3115   :  { %9800 = vmatprep.subr.bf16.mxu1 %v10282_v3 }
0x3118   :  { %9802 = vmatpush3.bf16.msra.mxu1 %v11366_v48 }
0x3119   :  { %9803 = vmatprep.subr.bf16.mxu1 %v10282_v3 }
0x311c   :  { %9805 = vmatpush3.bf16.msra.mxu1 %v11370_v57 }
0x311d   :  { %9806 = vmatprep.subr.bf16.mxu1 %v10282_v3 }
0x3120   :  { %9808 = vmatpush3.bf16.msra.mxu1 %v11374_v16 }
0x3121   :  { %9809 = vmatprep.subr.bf16.mxu1 %v10282_v3 }
0x3124   :  { %9811 = vmatpush3.bf16.msra.mxu1 %v11403_v61 }
0x3125   :  { %9836 = vmatprep.subr.bf16.mxu1 %v10282_v3 }
0x31da   :  { %v4114_v7 = vpop.f32.mrb[48].mxu1 }
0x31db   :  { %v4115_v34 = vadd.f32 %v11382_v22, %v4114_v7  ;;  %v8073_v44 = vpop.f32.mrb[49].mxu1 }
0x31dd   :  { %v4118_v49 = vmax.f32 %v4115_v34, 0.0 }
0x31df   :  { %8107 = vmatmul.mubr.f32.vlgmr.msra.gmra.mrb[50].mxu0 %v4118_v49 }
0x31e0   :  { %9814 = vmatpush3.bf16.msra.mxu0 %v11234_v9  ;;  %8176 = vmatprep.mubr.msk.f32.mxu0 %vm10283_vm0, %v10284_v6 }
0x31e1   :  { %9815 = vmatprep.subr.bf16.mxu0 %v10282_v3 }
0x31e4   :  { %9817 = vmatpush3.bf16.msra.mxu0 %v11237_v43 }
0x31e5   :  { %9818 = vmatprep.subr.bf16.mxu0 %v10282_v3 }
0x31e8   :  { %9820 = vmatpush3.bf16.msra.mxu0 %v11241_v10 }
0x31e9   :  { %9821 = vmatprep.subr.bf16.mxu0 %v10282_v3 }
0x31ec   :  { %9823 = vmatpush3.bf16.msra.mxu0 %v11245_v19 }
0x31ed   :  { %9824 = vmatprep.subr.bf16.mxu0 %v10282_v3 }
0x31f0   :  { %9826 = vmatpush3.bf16.msra.mxu0 %v11249_v26 }
0x31f1   :  { %9827 = vmatprep.subr.bf16.mxu0 %v10282_v3 }
0x31f4   :  { %9829 = vmatpush3.bf16.msra.mxu0 %v11256_v53 }
0x31f5   :  { %9830 = vmatprep.subr.bf16.mxu0 %v10282_v3 }
0x31f8   :  { %9832 = vmatpush3.bf16.msra.mxu0 %v11260_v60 }
0x31f9   :  { %9833 = vmatprep.subr.bf16.mxu0 %v10282_v3 }
0x31fc   :  { %9835 = vmatpush3.bf16.msra.mxu0 %v11264_v4 }
0x31fd   :  { %9860 = vmatprep.subr.bf16.mxu0 %v10282_v3 }
0x32b2   :  { %v4208_v47 = vpop.f32.mrb[50].mxu0 }
0x32b3   :  { %v4209_v21 = vadd.f32 %v11410_v14, %v4208_v47  ;;  %v8108_v15 = vpop.f32.mrb[51].mxu0 }
0x32b5   :  { %v4212_v24 = vmax.f32 %v4209_v21, 0.0 }
0x32b7   :  { %8142 = vmatmul.mubr.f32.vlgmr.msra.gmra.mrb[50].mxu1 %v4212_v24 }
0x32b8   :  { %9838 = vmatpush3.bf16.msra.mxu1 %v11268_v27  ;;  %8211 = vmatprep.mubr.msk.f32.mxu1 %vm10283_vm0, %v10284_v6 }
0x32b9   :  { %9839 = vmatprep.subr.bf16.mxu1 %v10282_v3 }
0x32bc   :  { %9841 = vmatpush3.bf16.msra.mxu1 %v11271_v18 }
0x32bd   :  { %9842 = vmatprep.subr.bf16.mxu1 %v10282_v3 }
0x32c0   :  { %9844 = vmatpush3.bf16.msra.mxu1 %v11275_v33 }
0x32c1   :  { %9845 = vmatprep.subr.bf16.mxu1 %v10282_v3 }
0x32c4   :  { %9847 = vmatpush3.bf16.msra.mxu1 %v11279_v42 }
0x32c5   :  { %9848 = vmatprep.subr.bf16.mxu1 %v10282_v3 }
0x32c8   :  { %9850 = vmatpush3.bf16.msra.mxu1 %v11283_v50 }
0x32c9   :  { %9851 = vmatprep.subr.bf16.mxu1 %v10282_v3 }
0x32cc   :  { %9853 = vmatpush3.bf16.msra.mxu1 %v11287_v0 }
0x32cd   :  { %9854 = vmatprep.subr.bf16.mxu1 %v10282_v3 }
0x32d0   :  { %9856 = vmatpush3.bf16.msra.mxu1 %v11291_v59 }
0x32d1   :  { %9857 = vmatprep.subr.bf16.mxu1 %v10282_v3 }
0x32d4   :  { %9859 = vmatpush3.bf16.msra.mxu1 %v11307_v52 }
0x32d5   :  { %9884 = vmatprep.subr.bf16.mxu1 %v10282_v3 }
0x338a   :  { %v4302_v30 = vpop.f32.mrb[50].mxu1 }
0x338b   :  { %v4303_v45 = vadd.f32 %v11434_v36, %v4302_v30  ;;  %v8143_v46 = vpop.f32.mrb[51].mxu1 }
0x338d   :  { %v4306_v12 = vmul.f32 %v4303_v45, %v11710_v11 }
0x338f   :  { %4307 = vadd.xlane.f32.xlu0 %v4306_v12 }
0x341c   :  { %v4308_v54 = vpop.xlane.xlu0 %4307 }
0x341d   :  { %v4309_v62 = vsub.f32 %v4303_v45, %v4308_v54 }
0x341f   :  { %v4310_v1 = vmul.f32 %v4309_v62, %v11710_v11 }
0x3421   :  { %v11798_v23 = vmul.f32 %v4310_v1, %v10629_v35 }
0x3423   :  { %v4313_v58 = vmul.f32 %v11795_v41, %v11798_v23 }
0x3425   :  { %v11803_v40 = vadd.f32 %v4313_v58, %v11710_v11 }
0x3427   :  { %8177 = vmatmul.mubr.f32.vlgmr.msra.gmra.mrb[52].mxu0 %v11803_v40 }
0x3428   :  { %9862 = vmatpush3.bf16.msra.mxu0 %v11311_v38  ;;  %8246 = vmatprep.mubr.msk.f32.mxu0 %vm10283_vm0, %v10284_v6 }
0x3429   :  { %9863 = vmatprep.subr.bf16.mxu0 %v10282_v3 }
0x342c   :  { %9865 = vmatpush3.bf16.msra.mxu0 %v11314_v5 }
0x342d   :  { %9866 = vmatprep.subr.bf16.mxu0 %v10282_v3 }
0x3430   :  { %9868 = vmatpush3.bf16.msra.mxu0 %v11318_v17 }
0x3431   :  { %9869 = vmatprep.subr.bf16.mxu0 %v10282_v3 }
0x3434   :  { %9871 = vmatpush3.bf16.msra.mxu0 %v11322_v28 }
0x3435   :  { %9872 = vmatprep.subr.bf16.mxu0 %v10282_v3 }
0x3438   :  { %9874 = vmatpush3.bf16.msra.mxu0 %v11326_v20 }
0x3439   :  { %9875 = vmatprep.subr.bf16.mxu0 %v10282_v3 }
0x343c   :  { %9877 = vmatpush3.bf16.msra.mxu0 %v11330_v55 }
0x343d   :  { %9878 = vmatprep.subr.bf16.mxu0 %v10282_v3 }
0x3440   :  { %9880 = vmatpush3.bf16.msra.mxu0 %v11334_v51 }
0x3441   :  { %9881 = vmatprep.subr.bf16.mxu0 %v10282_v3 }
0x3444   :  { %9883 = vmatpush3.bf16.msra.mxu0 %v11347_v39 }
0x3445   :  { %9908 = vmatprep.subr.bf16.mxu0 %v10282_v3 }
0x34fa   :  { %v4381_v13 = vpop.f32.mrb[52].mxu0 }
0x34fb   :  { %v4382_v37 = vadd.f32 %v11827_v32, %v4381_v13  ;;  %v8178_v25 = vpop.f32.mrb[53].mxu0 }
0x34fd   :  { %v4385_v31 = vmax.f32 %v4382_v37, 0.0  ;;  %v11938_v37 = vld [vmem:[%s12058_s6] ss:$0 sm:$0xff] }
0x34ff   :  { %8212 = vmatmul.mubr.f32.vlgmr.msra.gmra.mrb[52].mxu1 %v4385_v31 }
0x3500   :  { %9886 = vmatpush3.bf16.msra.mxu1 %v11351_v63  ;;  %8281 = vmatprep.mubr.msk.f32.mxu1 %vm10283_vm0, %v10284_v6 }
0x3501   :  { %9887 = vmatprep.subr.bf16.mxu1 %v10282_v3 }
0x3504   :  { %9889 = vmatpush3.bf16.msra.mxu1 %v11354_v56 }
0x3505   :  { %9890 = vmatprep.subr.bf16.mxu1 %v10282_v3 }
0x3508   :  { %9892 = vmatpush3.bf16.msra.mxu1 %v11358_v8 }
0x3509   :  { %9893 = vmatprep.subr.bf16.mxu1 %v10282_v3 }
0x350c   :  { %9895 = vmatpush3.bf16.msra.mxu1 %v11362_v29 }
0x350d   :  { %9896 = vmatprep.subr.bf16.mxu1 %v10282_v3 }
0x3510   :  { %9898 = vmatpush3.bf16.msra.mxu1 %v11366_v48 }
0x3511   :  { %9899 = vmatprep.subr.bf16.mxu1 %v10282_v3 }
0x3514   :  { %9901 = vmatpush3.bf16.msra.mxu1 %v11370_v57 }
0x3515   :  { %9902 = vmatprep.subr.bf16.mxu1 %v10282_v3 }
0x3518   :  { %9904 = vmatpush3.bf16.msra.mxu1 %v11374_v16 }
0x3519   :  { %9905 = vmatprep.subr.bf16.mxu1 %v10282_v3 }
0x351c   :  { %9907 = vmatpush3.bf16.msra.mxu1 %v11403_v61 }
0x351d   :  { %9932 = vmatprep.subr.bf16.mxu1 %v10282_v3 }
0x35d2   :  { %v4452_v2 = vpop.f32.mrb[52].mxu1 }
0x35d3   :  { %v4453_v7 = vadd.f32 %v11382_v22, %v4452_v2  ;;  %v8213_v34 = vpop.f32.mrb[53].mxu1 }
0x35d5   :  { %v4456_v44 = vmax.f32 %v4453_v7, 0.0 }
0x35d7   :  { %8247 = vmatmul.mubr.f32.vlgmr.msra.gmra.mrb[54].mxu0 %v4456_v44 }
0x35d8   :  { %9910 = vmatpush3.bf16.msra.mxu0 %v11234_v9  ;;  %8316 = vmatprep.mubr.msk.f32.mxu0 %vm10283_vm0, %v10284_v6 }
0x35d9   :  { %9911 = vmatprep.subr.bf16.mxu0 %v10282_v3 }
0x35dc   :  { %9913 = vmatpush3.bf16.msra.mxu0 %v11237_v43 }
0x35dd   :  { %9914 = vmatprep.subr.bf16.mxu0 %v10282_v3 }
0x35e0   :  { %9916 = vmatpush3.bf16.msra.mxu0 %v11241_v10 }
0x35e1   :  { %9917 = vmatprep.subr.bf16.mxu0 %v10282_v3 }
0x35e4   :  { %9919 = vmatpush3.bf16.msra.mxu0 %v11245_v19 }
0x35e5   :  { %9920 = vmatprep.subr.bf16.mxu0 %v10282_v3 }
0x35e8   :  { %9922 = vmatpush3.bf16.msra.mxu0 %v11249_v26 }
0x35e9   :  { %9923 = vmatprep.subr.bf16.mxu0 %v10282_v3 }
0x35ec   :  { %9925 = vmatpush3.bf16.msra.mxu0 %v11256_v53 }
0x35ed   :  { %9926 = vmatprep.subr.bf16.mxu0 %v10282_v3 }
0x35f0   :  { %9928 = vmatpush3.bf16.msra.mxu0 %v11260_v60 }
0x35f1   :  { %9929 = vmatprep.subr.bf16.mxu0 %v10282_v3 }
0x35f4   :  { %9931 = vmatpush3.bf16.msra.mxu0 %v11264_v4 }
0x35f5   :  { %9956 = vmatprep.subr.bf16.mxu0 %v10282_v3 }
0x36aa   :  { %v4523_v22 = vpop.f32.mrb[54].mxu0 }
0x36ab   :  { %v4524_v49 = vadd.f32 %v11410_v14, %v4523_v22  ;;  %v8248_v47 = vpop.f32.mrb[55].mxu0 }
0x36ad   :  { %v4527_v21 = vmax.f32 %v4524_v49, 0.0 }
0x36af   :  { %8282 = vmatmul.mubr.f32.vlgmr.msra.gmra.mrb[54].mxu1 %v4527_v21 }
0x36b0   :  { %9934 = vmatpush3.bf16.msra.mxu1 %v11268_v27  ;;  %8351 = vmatprep.mubr.msk.f32.mxu1 %vm10283_vm0, %v10284_v6 }
0x36b1   :  { %9935 = vmatprep.subr.bf16.mxu1 %v10282_v3 }
0x36b4   :  { %9937 = vmatpush3.bf16.msra.mxu1 %v11271_v18 }
0x36b5   :  { %9938 = vmatprep.subr.bf16.mxu1 %v10282_v3 }
0x36b8   :  { %9940 = vmatpush3.bf16.msra.mxu1 %v11275_v33 }
0x36b9   :  { %9941 = vmatprep.subr.bf16.mxu1 %v10282_v3 }
0x36bc   :  { %9943 = vmatpush3.bf16.msra.mxu1 %v11279_v42 }
0x36bd   :  { %9944 = vmatprep.subr.bf16.mxu1 %v10282_v3 }
0x36c0   :  { %9946 = vmatpush3.bf16.msra.mxu1 %v11283_v50 }
0x36c1   :  { %9947 = vmatprep.subr.bf16.mxu1 %v10282_v3 }
0x36c4   :  { %9949 = vmatpush3.bf16.msra.mxu1 %v11287_v0 }
0x36c5   :  { %9950 = vmatprep.subr.bf16.mxu1 %v10282_v3 }
0x36c8   :  { %9952 = vmatpush3.bf16.msra.mxu1 %v11291_v59 }
0x36c9   :  { %9953 = vmatprep.subr.bf16.mxu1 %v10282_v3 }
0x36cc   :  { %9955 = vmatpush3.bf16.msra.mxu1 %v11307_v52 }
0x36cd   :  { %9980 = vmatprep.subr.bf16.mxu1 %v10282_v3 }
0x3782   :  { %v4594_v14 = vpop.f32.mrb[54].mxu1 }
0x3783   :  { %v4595_v15 = vadd.f32 %v11434_v36, %v4594_v14  ;;  %v8283_v24 = vpop.f32.mrb[55].mxu1 }
0x3785   :  { %v4598_v30 = vmul.f32 %v4595_v15, %v11803_v40 }
0x3787   :  { %4599 = vadd.xlane.f32.xlu1 %v4598_v30 }
0x3814   :  { %v4600_v45 = vpop.xlane.xlu1 %4599 }
0x3815   :  { %v4601_v46 = vsub.f32 %v4595_v15, %v4600_v45 }
0x3817   :  { %v4602_v12 = vmul.f32 %v4601_v46, %v11803_v40 }
0x3819   :  { %v11890_v54 = vmul.f32 %v4602_v12, %v10629_v35 }
0x381b   :  { %v4604_v62 = vmul.f32 %v11890_v54, %v11795_v41 }
0x381d   :  { %v11895_v1 = vadd.f32 %v4604_v62, %v11710_v11 }
0x381f   :  { %8317 = vmatmul.mubr.f32.vlgmr.msra.gmra.mrb[56].mxu0 %v11895_v1 }
0x3820   :  { %9958 = vmatpush3.bf16.msra.mxu0 %v11311_v38  ;;  %8386 = vmatprep.mubr.msk.f32.mxu0 %vm10283_vm0, %v10284_v6 }
0x3821   :  { %9959 = vmatprep.subr.bf16.mxu0 %v10282_v3 }
0x3824   :  { %9961 = vmatpush3.bf16.msra.mxu0 %v11314_v5 }
0x3825   :  { %9962 = vmatprep.subr.bf16.mxu0 %v10282_v3 }
0x3828   :  { %9964 = vmatpush3.bf16.msra.mxu0 %v11318_v17 }
0x3829   :  { %9965 = vmatprep.subr.bf16.mxu0 %v10282_v3 }
0x382c   :  { %9967 = vmatpush3.bf16.msra.mxu0 %v11322_v28 }
0x382d   :  { %9968 = vmatprep.subr.bf16.mxu0 %v10282_v3 }
0x3830   :  { %9970 = vmatpush3.bf16.msra.mxu0 %v11326_v20 }
0x3831   :  { %9971 = vmatprep.subr.bf16.mxu0 %v10282_v3 }
0x3834   :  { %9973 = vmatpush3.bf16.msra.mxu0 %v11330_v55 }
0x3835   :  { %9974 = vmatprep.subr.bf16.mxu0 %v10282_v3 }
0x3838   :  { %9976 = vmatpush3.bf16.msra.mxu0 %v11334_v51 }
0x3839   :  { %9977 = vmatprep.subr.bf16.mxu0 %v10282_v3 }
0x383c   :  { %9979 = vmatpush3.bf16.msra.mxu0 %v11347_v39 }
0x383d   :  { %10004 = vmatprep.subr.bf16.mxu0 %v10282_v3 }
0x38f2   :  { %v4672_v36 = vpop.f32.mrb[56].mxu0 }
0x38f3   :  { %v4673_v41 = vadd.f32 %v11827_v32, %v4672_v36  ;;  %v8318_v58 = vpop.f32.mrb[57].mxu0 }
0x38f5   :  { %v4676_v40 = vmax.f32 %v4673_v41, 0.0 }
0x38f7   :  { %8352 = vmatmul.mubr.f32.vlgmr.msra.gmra.mrb[56].mxu1 %v4676_v40 }
0x38f8   :  { %9982 = vmatpush3.bf16.msra.mxu1 %v11351_v63  ;;  %8421 = vmatprep.mubr.msk.f32.mxu1 %vm10283_vm0, %v10284_v6 }
0x38f9   :  { %9983 = vmatprep.subr.bf16.mxu1 %v10282_v3 }
0x38fc   :  { %9985 = vmatpush3.bf16.msra.mxu1 %v11354_v56 }
0x38fd   :  { %9986 = vmatprep.subr.bf16.mxu1 %v10282_v3 }
0x3900   :  { %9988 = vmatpush3.bf16.msra.mxu1 %v11358_v8 }
0x3901   :  { %9989 = vmatprep.subr.bf16.mxu1 %v10282_v3 }
0x3904   :  { %9991 = vmatpush3.bf16.msra.mxu1 %v11362_v29 }
0x3905   :  { %9992 = vmatprep.subr.bf16.mxu1 %v10282_v3 }
0x3908   :  { %9994 = vmatpush3.bf16.msra.mxu1 %v11366_v48 }
0x3909   :  { %9995 = vmatprep.subr.bf16.mxu1 %v10282_v3 }
0x390c   :  { %9997 = vmatpush3.bf16.msra.mxu1 %v11370_v57 }
0x390d   :  { %9998 = vmatprep.subr.bf16.mxu1 %v10282_v3 }
0x3910   :  { %10000 = vmatpush3.bf16.msra.mxu1 %v11374_v16 }
0x3911   :  { %10001 = vmatprep.subr.bf16.mxu1 %v10282_v3 }
0x3914   :  { %10003 = vmatpush3.bf16.msra.mxu1 %v11403_v61 }
0x3915   :  { %10028 = vmatprep.subr.bf16.mxu1 %v10282_v3 }
0x39ca   :  { %v4743_v13 = vpop.f32.mrb[56].mxu1 }
0x39cb   :  { %v4744_v25 = vadd.f32 %v11938_v37, %v4743_v13  ;;  %v8353_v31 = vpop.f32.mrb[57].mxu1 }
0x39cd   :  { %v4747_v2 = vmax.f32 %v4744_v25, 0.0 }
0x39cf   :  { %8387 = vmatmul.mubr.f32.vlgmr.msra.gmra.mrb[58].mxu0 %v4747_v2 }
0x39d0   :  { %10006 = vmatpush3.bf16.msra.mxu0 %v11234_v9  ;;  %8456 = vmatprep.mubr.msk.f32.mxu0 %vm10283_vm0, %v10284_v6 }
0x39d1   :  { %10007 = vmatprep.subr.bf16.mxu0 %v10282_v3 }
0x39d4   :  { %10009 = vmatpush3.bf16.msra.mxu0 %v11237_v43  ;;  %v11962_v43 = vld [vmem:[%s12060_s8] ss:$0 sm:$0xff] }
0x39d5   :  { %10010 = vmatprep.subr.bf16.mxu0 %v10282_v3 }
0x39d8   :  { %10012 = vmatpush3.bf16.msra.mxu0 %v11241_v10 }
0x39d9   :  { %10013 = vmatprep.subr.bf16.mxu0 %v10282_v3 }
0x39dc   :  { %10015 = vmatpush3.bf16.msra.mxu0 %v11245_v19 }
0x39dd   :  { %10016 = vmatprep.subr.bf16.mxu0 %v10282_v3 }
0x39e0   :  { %10018 = vmatpush3.bf16.msra.mxu0 %v11249_v26 }
0x39e1   :  { %10019 = vmatprep.subr.bf16.mxu0 %v10282_v3 }
0x39e4   :  { %10021 = vmatpush3.bf16.msra.mxu0 %v11256_v53 }
0x39e5   :  { %10022 = vmatprep.subr.bf16.mxu0 %v10282_v3 }
0x39e8   :  { %10024 = vmatpush3.bf16.msra.mxu0 %v11260_v60  ;;  %v11986_v60 = vld [vmem:[%s12062_s10] ss:$0 sm:$0xff]  ;;  %s3930_s10 = smul.f32 0.16666667, %s11791_s15 }
0x39e9   :  { %10025 = vmatprep.subr.bf16.mxu0 %v10282_v3 }
0x39ea   :  { %v5192_v47 = vstv %s3930_s10 }
0x39ec   :  { %10027 = vmatpush3.bf16.msra.mxu0 %v11264_v4 }
0x39ed   :  { %10052 = vmatprep.subr.bf16.mxu0 %v10282_v3 }
0x3aa2   :  { %v4814_v9 = vpop.f32.mrb[58].mxu0 }
0x3aa3   :  { %v4815_v10 = vadd.f32 %v11962_v43, %v4814_v9  ;;  %v8388_v19 = vpop.f32.mrb[59].mxu0 }
0x3aa5   :  { %v4818_v26 = vmax.f32 %v4815_v10, 0.0 }
0x3aa7   :  { %8422 = vmatmul.mubr.f32.vlgmr.msra.gmra.mrb[58].mxu1 %v4818_v26 }
0x3aa8   :  { %10030 = vmatpush3.bf16.msra.mxu1 %v11268_v27  ;;  %8491 = vmatprep.mubr.msk.f32.mxu1 %vm10283_vm0, %v10284_v6 }
0x3aa9   :  { %10031 = vmatprep.subr.bf16.mxu1 %v10282_v3 }
0x3aac   :  { %10033 = vmatpush3.bf16.msra.mxu1 %v11271_v18 }
0x3aad   :  { %10034 = vmatprep.subr.bf16.mxu1 %v10282_v3 }
0x3ab0   :  { %10036 = vmatpush3.bf16.msra.mxu1 %v11275_v33 }
0x3ab1   :  { %10037 = vmatprep.subr.bf16.mxu1 %v10282_v3 }
0x3ab4   :  { %10039 = vmatpush3.bf16.msra.mxu1 %v11279_v42 }
0x3ab5   :  { %10040 = vmatprep.subr.bf16.mxu1 %v10282_v3 }
0x3ab8   :  { %10042 = vmatpush3.bf16.msra.mxu1 %v11283_v50  ;;  %v5187_v50 = vmul.f32 2.0, %v11890_v54 }
0x3ab9   :  { %10043 = vmatprep.subr.bf16.mxu1 %v10282_v3 }
0x3aba   :  { %v5188_v7 = vadd.f32 %v5187_v50, %v11798_v23 }
0x3abc   :  { %10045 = vmatpush3.bf16.msra.mxu1 %v11287_v0 }
0x3abd   :  { %10046 = vmatprep.subr.bf16.mxu1 %v10282_v3 }
0x3ac0   :  { %10048 = vmatpush3.bf16.msra.mxu1 %v11291_v59  ;;  %v4895_v59 = vstv %s11791_s15 }
0x3ac1   :  { %10049 = vmatprep.subr.bf16.mxu1 %v10282_v3 }
0x3ac4   :  { %10051 = vmatpush3.bf16.msra.mxu1 %v11307_v52 }
0x3ac5   :  { %10076 = vmatprep.subr.bf16.mxu1 %v10282_v3 }
0x3b7a   :  { %v4885_v53 = vpop.f32.mrb[58].mxu1 }
0x3b7b   :  { %v4886_v4 = vadd.f32 %v11986_v60, %v4885_v53  ;;  %v8423_v27 = vpop.f32.mrb[59].mxu1 }
0x3b7d   :  { %v4889_v18 = vmul.f32 %v4886_v4, %v11895_v1 }
0x3b7f   :  { %4890 = vadd.xlane.f32.xlu0 %v4889_v18 }
0x3c0c   :  { %v4891_v33 = vpop.xlane.xlu0 %4890 }
0x3c0d   :  { %v4892_v42 = vsub.f32 %v4886_v4, %v4891_v33 }
0x3c0f   :  { %v4893_v0 = vmul.f32 %v4892_v42, %v11895_v1 }
0x3c11   :  { %v4894_v52 = vmul.f32 %v4893_v0, %v10629_v35 }
0x3c13   :  { %v4896_v34 = vmul.f32 %v4895_v59, %v4894_v52  ;;  %v5189_v44 = vmul.f32 2.0, %v4894_v52 }
0x3c15   :  { %v4897_v22 = vadd.f32 %v4896_v34, %v11710_v11  ;;  %v5190_v49 = vadd.f32 %v5189_v44, %v5188_v7 }
0x3c17   :  { %8457 = vmatmul.mubr.f32.vlgmr.msra.gmra.mrb[60].mxu0 %v4897_v22 }
0x3c18   :  { %10054 = vmatpush3.bf16.msra.mxu0 %v11311_v38  ;;  %8526 = vmatprep.mubr.msk.f32.mxu0 %vm10283_vm0, %v10284_v6 }
0x3c19   :  { %10055 = vmatprep.subr.bf16.mxu0 %v10282_v3 }
0x3c1c   :  { %10057 = vmatpush3.bf16.msra.mxu0 %v11314_v5 }
0x3c1d   :  { %10058 = vmatprep.subr.bf16.mxu0 %v10282_v3 }
0x3c20   :  { %10060 = vmatpush3.bf16.msra.mxu0 %v11318_v17 }
0x3c21   :  { %10061 = vmatprep.subr.bf16.mxu0 %v10282_v3 }
0x3c24   :  { %10063 = vmatpush3.bf16.msra.mxu0 %v11322_v28 }
0x3c25   :  { %10064 = vmatprep.subr.bf16.mxu0 %v10282_v3 }
0x3c28   :  { %10066 = vmatpush3.bf16.msra.mxu0 %v11326_v20 }
0x3c29   :  { %10067 = vmatprep.subr.bf16.mxu0 %v10282_v3 }
0x3c2c   :  { %10069 = vmatpush3.bf16.msra.mxu0 %v11330_v55 }
0x3c2d   :  { %10070 = vmatprep.subr.bf16.mxu0 %v10282_v3 }
0x3c30   :  { %10072 = vmatpush3.bf16.msra.mxu0 %v11334_v51 }
0x3c31   :  { %10073 = vmatprep.subr.bf16.mxu0 %v10282_v3 }
0x3c34   :  { %10075 = vmatpush3.bf16.msra.mxu0 %v11347_v39 }
0x3cea   :  { %v4964_v38 = vpop.f32.mrb[60].mxu0 }
0x3ceb   :  { %v4965_v5 = vadd.f32 %v11827_v32, %v4964_v38  ;;  %v8458_v17 = vpop.f32.mrb[61].mxu0 }
0x3ced   :  { %v4968_v28 = vmax.f32 %v4965_v5, 0.0 }
0x3cef   :  { %8492 = vmatmul.mubr.f32.vlgmr.msra.gmra.mrb[60].mxu1 %v4968_v28 }
0x3cf0   :  { %10078 = vmatpush3.bf16.msra.mxu1 %v11351_v63  ;;  %8561 = vmatprep.mubr.msk.f32.mxu1 %vm10283_vm0, %v10284_v6 }
0x3cf1   :  { %10079 = vmatprep.subr.bf16.mxu1 %v10282_v3 }
0x3cf4   :  { %10081 = vmatpush3.bf16.msra.mxu1 %v11354_v56 }
0x3cf5   :  { %10082 = vmatprep.subr.bf16.mxu1 %v10282_v3 }
0x3cf8   :  { %10084 = vmatpush3.bf16.msra.mxu1 %v11358_v8 }
0x3cf9   :  { %10085 = vmatprep.subr.bf16.mxu1 %v10282_v3 }
0x3cfc   :  { %10087 = vmatpush3.bf16.msra.mxu1 %v11362_v29 }
0x3cfd   :  { %10088 = vmatprep.subr.bf16.mxu1 %v10282_v3 }
0x3d00   :  { %10090 = vmatpush3.bf16.msra.mxu1 %v11366_v48 }
0x3d01   :  { %10091 = vmatprep.subr.bf16.mxu1 %v10282_v3 }
0x3d04   :  { %10093 = vmatpush3.bf16.msra.mxu1 %v11370_v57 }
0x3d05   :  { %10094 = vmatprep.subr.bf16.mxu1 %v10282_v3 }
0x3d08   :  { %10096 = vmatpush3.bf16.msra.mxu1 %v11374_v16 }
0x3d09   :  { %10097 = vmatprep.subr.bf16.mxu1 %v10282_v3 }
0x3d0c   :  { %10099 = vmatpush3.bf16.msra.mxu1 %v11403_v61 }
0x3dc2   :  { %v5035_v6 = vpop.f32.mrb[60].mxu1 }
0x3dc3   :  { %v5036_v20 = vadd.f32 %v11938_v37, %v5035_v6  ;;  %v8493_v55 = vpop.f32.mrb[61].mxu1 }
0x3dc5   :  { %v5039_v51 = vmax.f32 %v5036_v20, 0.0 }
0x3dc7   :  { %8527 = vmatmul.mubr.f32.vlgmr.msra.gmra.mrb[62].mxu0 %v5039_v51 }
0x3e9a   :  { %v5106_v39 = vpop.f32.mrb[62].mxu0 }
0x3e9b   :  { %v5107_v63 = vadd.f32 %v11962_v43, %v5106_v39  ;;  %v8528_v56 = vpop.f32.mrb[63].mxu0 }
0x3e9d   :  { %v5110_v8 = vmax.f32 %v5107_v63, 0.0 }
0x3e9f   :  { %8562 = vmatmul.mubr.f32.vlgmr.msra.gmra.mrb[62].mxu1 %v5110_v8 }
0x3f72   :  { %v5177_v29 = vpop.f32.mrb[62].mxu1 }
0x3f73   :  { %v5178_v48 = vadd.f32 %v11986_v60, %v5177_v29  ;;  %v8563_v57 = vpop.f32.mrb[63].mxu1 }
0x3f75   :  { %v5181_v3 = vmul.f32 %v5178_v48, %v4897_v22 }
0x3f77   :  { %5182 = vadd.xlane.f32.xlu1 %v5181_v3 }
0x4004   :  { %v5183_v16 = vpop.xlane.xlu1 %5182 }
0x4005   :  { %v5184_v61 = vsub.f32 %v5178_v48, %v5183_v16 }
0x4007   :  { %v5185_v23 = vmul.f32 %v5184_v61, %v4897_v22 }
0x4009   :  { %v5186_v32 = vmul.f32 %v5185_v23, %v10629_v35 }
0x400b   :  { %v5191_v21 = vadd.f32 %v5190_v49, %v5186_v32 }
0x400d   :  { %v5193_v14 = vmul.f32 %v5192_v47, %v5191_v21 }
0x400f   :  { %v5194_v15 = vadd.f32 %v5193_v14, %v11710_v11 }
0x4011   :  { %5196 = vst [vmem:[#allocation14 + $0x18] sm:$0xff] %v5194_v15 }
0x4012   :  { %10253 = shalt.err (!%p10250_p7)
}
0x4013   :  { %s10254_s14 = scalar_lea.hbm %s12063_s11, 512 }
0x4014   :  { %p10255_p8 = scmp.ne.s32.totalorder %s12063_s11, %s10254_s14  ;;  %p10258_p9 = scmp.lt.u32.totalorder %s10254_s14, %s12063_s11 }
0x4016   :  { %p10260_p10 = pnand %p10258_p9, %p10255_p8 }
0x4018   :  { %10263 = shalt.err (!%p10260_p10)
}
0x4019   :  { %5208 = dma.vmem_to_hbm [thread:$0]  %s5203_s16, 512, %s12063_s11, [#allocation5], %s10275_s27, %s10275_s27, %s10276_s28  }
0x401a   :  { %10272 = dma.done.wait [#allocation5], 512  }
0x401b   :  { %10273 = vsyncadd [#allocation5], 4294966784 }
0x401c   :  { %5212 = vsyncpa [#allocation4], 1 }
0x401d   :  { %5213 = vsyncpa [#allocation9], 1 }
0x401e   :  { %5214 = vsyncpa [#allocation12], 1 }
0x401f   :  { %5215 = vsyncpa [#allocation5], 1 }
0x4020   :  { %5216 = vsyncpa [#allocation6], 1 }

</bundles_post_ra>
